<compile_context>
chip_gen: v7x
topology: tpu7x:2x2x1
jax: 0.10.0
libtpu: 0.0.40
codegen_flags: <defaults>
</compile_context>

<pallas_src>
import jax
import jax.numpy as jnp
import numpy as np
from jax.experimental import pallas as pl
from jax.experimental.pallas import tpu as pltpu

LANE = 128  # TPU lane width; channel axis is padded to a multiple of this.


def _resblock_kernel(x_ref, s1_ref, b1_ref, w1_ref, s2_ref, b2_ref, w2_ref,
                     o_ref, pad_ref):
    # x_ref:   (1, H, W, C) f32, one batch element (NHWC, C lane-padded)
    # s*/b*:   (1, C) f32 folded BN scale / bias
    # w*_ref:  (9C, C) bf16, K-stacked taps: rows [t*C:(t+1)*C] = tap t = kh*3+kw
    # pad_ref: (H+2, W+2, C) bf16 scratch (zero halo + interior), reused by both convs
    _, H, W, C = x_ref.shape

    def conv3x3(w_ref):
        # Restage: the three kw-shifted slabs are read once (the only
        # sublane-unaligned reads); every kh view is a free leading-axis slice.
        views = (pad_ref[:, 0:W, :],        # kw = 0
                 pad_ref[:, 1:W + 1, :],    # kw = 1
                 pad_ref[:, 2:W + 2, :])    # kw = 2
        # K-stack all 9 taps along lanes -> one (H*W, 9C) @ (9C, C) MXU matmul.
        parts = [views[kw][kh:kh + H] for kh in range(3) for kw in range(3)]
        patch = jnp.concatenate(parts, axis=-1)           # (H, W, 9C) bf16
        patch = patch.reshape(H * W, 9 * C)               # W % 16 == 0 -> layout friendly
        return jnp.dot(patch, w_ref[...],
                       preferred_element_type=jnp.float32)  # (H*W, C) f32

    # Zero the whole slab with a single contiguous unmasked store; the halo then
    # stays zero for both convs (only the interior is overwritten below).
    pad_ref[...] = jnp.zeros((H + 2, W + 2, C), pad_ref.dtype)

    # ---- BN1 (folded) + ReLU -> slab interior (bf16) ----
    a1 = jnp.maximum(x_ref[0].astype(jnp.float32) * s1_ref[0] + b1_ref[0], 0.0)
    pad_ref[1:H + 1, 1:W + 1, :] = a1.astype(pad_ref.dtype)

    # ---- conv1 with fused BN2 + ReLU epilogue -> overwrite slab interior ----
    acc1 = conv3x3(w1_ref)
    a2 = jnp.maximum(acc1 * s2_ref[0] + b2_ref[0], 0.0)
    pad_ref[1:H + 1, 1:W + 1, :] = a2.reshape(H, W, C).astype(pad_ref.dtype)

    # ---- conv2 with fused residual-add epilogue (x re-read from VMEM block) ----
    acc2 = conv3x3(w2_ref)
    out = acc2.reshape(H, W, C) + x_ref[0].astype(jnp.float32)
    o_ref[0] = out.astype(o_ref.dtype)


def _round_up(x, m):
    return (x + m - 1) // m * m


def _vmem_limit_bytes(H, W, C):
    """Shape-derived scoped-VMEM budget (re-derived instead of a blanket 48 MiB)."""
    bf16, f32 = 2, 4
    io_block = H * W * C * f32                 # one (1,H,W,C) block
    pad = (H + 2) * (W + 2) * C * bf16         # scratch slab
    weights = 2 * 9 * C * C * bf16             # w1 + w2
    patch = 9 * H * W * C * bf16               # K-stacked patch (live temp)
    acc = H * W * C * f32                      # matmul result / epilogue temp
    need = 2 * 2 * io_block + pad + 2 * weights + 2 * (patch + 2 * acc)
    return int(min(112 * 2 ** 20, max(16 * 2 ** 20, need)))


def residual_block_nhwc(x, s1, b1, w1_hwio, s2, b2, w2_hwio):
    """x: (N, H, W, C) float32; w*_hwio: (3, 3, Cin, Cout); s/b: (C,)."""
    N, H, W, C = x.shape
    Cp = max(LANE, _round_up(C, LANE))   # lane-dense channel axis

    def pad_c(a):
        if Cp == C:
            return a
        return jnp.pad(a, [(0, 0)] * (a.ndim - 1) + [(0, Cp - C)])

    xp = pad_c(x.astype(jnp.float32))
    s1p = pad_c(s1.astype(jnp.float32)).reshape(1, Cp)
    b1p = pad_c(b1.astype(jnp.float32)).reshape(1, Cp)
    s2p = pad_c(s2.astype(jnp.float32)).reshape(1, Cp)
    b2p = pad_c(b2.astype(jnp.float32)).reshape(1, Cp)

    def pack_w(w_hwio):
        w = w_hwio
        if Cp != C:
            w = jnp.pad(w, ((0, 0), (0, 0), (0, Cp - C), (0, Cp - C)))
        # (3,3,Cin,Cout) -> (9*Cin, Cout); rows tap-major (t=kh*3+kw), cin-minor.
        return w.astype(jnp.bfloat16).reshape(9 * Cp, Cp)

    w1 = pack_w(w1_hwio)
    w2 = pack_w(w2_hwio)

    flops = int(2 * 2 * 9 * H * W * Cp * Cp * N)
    bytes_accessed = int(2 * xp.size * 4 + (w1.size + w2.size) * 2 + 4 * Cp * 4)

    grid_spec = pltpu.PrefetchScalarGridSpec(
        num_scalar_prefetch=0,
        grid=(N,),
        in_specs=[
            pl.BlockSpec((1, H, W, Cp), lambda n: (n, 0, 0, 0)),
            pl.BlockSpec((1, Cp), lambda n: (0, 0)),
            pl.BlockSpec((1, Cp), lambda n: (0, 0)),
            pl.BlockSpec((9 * Cp, Cp), lambda n: (0, 0)),
            pl.BlockSpec((1, Cp), lambda n: (0, 0)),
            pl.BlockSpec((1, Cp), lambda n: (0, 0)),
            pl.BlockSpec((9 * Cp, Cp), lambda n: (0, 0)),
        ],
        out_specs=pl.BlockSpec((1, H, W, Cp), lambda n: (n, 0, 0, 0)),
        scratch_shapes=[pltpu.VMEM((H + 2, W + 2, Cp), jnp.bfloat16)],
    )
    yp = pl.pallas_call(
        _resblock_kernel,
        out_shape=jax.ShapeDtypeStruct((N, H, W, Cp), x.dtype),
        grid_spec=grid_spec,
        compiler_params=pltpu.CompilerParams(
            dimension_semantics=("parallel",),           # batch elems independent
            vmem_limit_bytes=_vmem_limit_bytes(H, W, Cp),
        ),
        cost_estimate=pl.CostEstimate(flops=flops, transcendentals=0,
                                      bytes_accessed=bytes_accessed),
    )(xp, s1p, b1p, w1, s2p, b2p, w2)
    return yp[..., :C]


def residual_block(x_nchw, params):
    """PyTorch-style NCHW entry point."""
    x = jnp.transpose(x_nchw, (0, 2, 3, 1))           # NCHW -> NHWC
    y = residual_block_nhwc(x, *params)
    return jnp.transpose(y, (0, 3, 1, 2))             # NHWC -> NCHW


# ---------- deterministic parameter init (mirrors module __init__ shapes) ----------
def init_params(key, C, eps=1e-5):
    k1, k2 = jax.random.split(key)
    # PyTorch Conv2d weight is (Cout, Cin, kh, kw); build the HWIO equivalent.
    w1_oihw = 0.1 * jax.random.normal(k1, (C, C, 3, 3), jnp.float32)
    w2_oihw = 0.1 * jax.random.normal(k2, (C, C, 3, 3), jnp.float32)
    w1_hwio = jnp.transpose(w1_oihw, (2, 3, 1, 0))
    w2_hwio = jnp.transpose(w2_oihw, (2, 3, 1, 0))

    idx = jnp.arange(C, dtype=jnp.float32)
    gamma1, beta1 = 1.0 + 0.05 * idx, 0.01 * idx
    mean1, var1 = 0.10 * idx, 1.0 + 0.10 * idx
    gamma2, beta2 = 1.0 - 0.03 * idx, -0.02 * idx
    mean2, var2 = -0.05 * idx, 0.5 + 0.20 * idx

    s1 = gamma1 / jnp.sqrt(var1 + eps)
    b1 = beta1 - mean1 * s1
    s2 = gamma2 / jnp.sqrt(var2 + eps)
    b2 = beta2 - mean2 * s2
    return (s1, b1, w1_hwio, s2, b2, w2_hwio)


# ---------- pure-JAX reference (f32 end-to-end) ----------
def _bn_relu_conv_ref(x_nhwc, s, b, w_hwio):
    a = jnp.maximum(x_nhwc * s + b, 0.0)
    return jax.lax.conv_general_dilated(
        a, w_hwio, window_strides=(1, 1), padding="SAME",
        dimension_numbers=("NHWC", "HWIO", "NHWC"))


def residual_block_ref(x_nchw, params):
    s1, b1, w1, s2, b2, w2 = params
    x = jnp.transpose(x_nchw, (0, 2, 3, 1))
    out = _bn_relu_conv_ref(x, s1, b1, w1)
    out = _bn_relu_conv_ref(out, s2, b2, w2)
    out = out + x
    return jnp.transpose(out, (0, 3, 1, 2))


if __name__ == "__main__":
    N, C, H, W = 2, 4, 16, 16
    key = jax.random.PRNGKey(0)
    k_x, k_p = jax.random.split(key)
    x = jax.random.normal(k_x, (N, C, H, W), jnp.float32)   # PyTorch NCHW input
    params = init_params(k_p, C)

    out = jax.block_until_ready(residual_block(x, params))

    ref = residual_block_ref(x, params)
    # Conv weights/activations are bf16 on the MXU (f32 accumulation), so
    # ~1e-2-level deviations from the pure-f32 reference are expected.
    np.testing.assert_allclose(np.asarray(out), np.asarray(ref),
                               rtol=5e-2, atol=5e-2)
    print("KERNEL_OK")
</pallas_src>

<mosaic_0001>
module attributes {stable_mosaic.version = 11 : i64} {
  func.func @_resblock_kernel(%arg0: i32, %arg1: memref<1x16x16x128xf32, #tpu.memory_space<vmem>>, %arg2: memref<1x128xf32, #tpu.memory_space<vmem>>, %arg3: memref<1x128xf32, #tpu.memory_space<vmem>>, %arg4: memref<1152x128xbf16, #tpu.memory_space<vmem>>, %arg5: memref<1x128xf32, #tpu.memory_space<vmem>>, %arg6: memref<1x128xf32, #tpu.memory_space<vmem>>, %arg7: memref<1152x128xbf16, #tpu.memory_space<vmem>>, %arg8: memref<1x16x16x128xf32, #tpu.memory_space<vmem>>, %arg9: memref<18x18x128xbf16, #tpu.memory_space<vmem>>) attributes {dimension_semantics = [#tpu.dimension_semantics<parallel>], iteration_bounds = array<i64: 2>, scalar_prefetch = 0 : i64, scratch_operands = 1 : i64, tpu.core_type = #tpu.core_type<tc>, window_params = [{transform_indices = @transform_0, window_bounds = array<i64: 1, 16, 16, 128>}, {pipeline_mode = #tpu.pipeline_mode<synchronous>, transform_indices = @transform_1, window_bounds = array<i64: 1, 128>}, {pipeline_mode = #tpu.pipeline_mode<synchronous>, transform_indices = @transform_2, window_bounds = array<i64: 1, 128>}, {pipeline_mode = #tpu.pipeline_mode<synchronous>, transform_indices = @transform_3, window_bounds = array<i64: 1152, 128>}, {pipeline_mode = #tpu.pipeline_mode<synchronous>, transform_indices = @transform_4, window_bounds = array<i64: 1, 128>}, {pipeline_mode = #tpu.pipeline_mode<synchronous>, transform_indices = @transform_5, window_bounds = array<i64: 1, 128>}, {pipeline_mode = #tpu.pipeline_mode<synchronous>, transform_indices = @transform_6, window_bounds = array<i64: 1152, 128>}, {transform_indices = @transform_7, window_bounds = array<i64: 1, 16, 16, 128>}]} {
    %cst = arith.constant 0.000000e+00 : bf16
    %0 = vector.broadcast %cst : bf16 to vector<18x18x128xbf16>
    %c0 = arith.constant 0 : index
    %c0_0 = arith.constant 0 : index
    %c0_1 = arith.constant 0 : index
    %1 = vector.load %arg9[%c0, %c0_0, %c0_1] : memref<18x18x128xbf16, #tpu.memory_space<vmem>>, vector<18x18x128xbf16>
    tpu.vector_store %arg9[%c0, %c0_0, %c0_1], %0 {strides = array<i32>} : memref<18x18x128xbf16, #tpu.memory_space<vmem>>, vector<18x18x128xbf16>,
    %c0_2 = arith.constant 0 : index
    %c0_3 = arith.constant 0 : index
    %c0_4 = arith.constant 0 : index
    %c0_5 = arith.constant 0 : index
    %2 = vector.load %arg1[%c0_2, %c0_3, %c0_4, %c0_5] : memref<1x16x16x128xf32, #tpu.memory_space<vmem>>, vector<1x16x16x128xf32>
    %3 = vector.shape_cast %2 : vector<1x16x16x128xf32> to vector<16x16x128xf32>
    %c0_6 = arith.constant 0 : index
    %c0_7 = arith.constant 0 : index
    %4 = vector.load %arg2[%c0_6, %c0_7] : memref<1x128xf32, #tpu.memory_space<vmem>>, vector<1x128xf32>
    %5 = vector.shape_cast %4 : vector<1x128xf32> to vector<128xf32>
    %6 = vector.shape_cast %5 : vector<128xf32> to vector<1x1x128xf32>
    %7 = vector.broadcast %6 : vector<1x1x128xf32> to vector<16x16x128xf32>
    %8 = arith.mulf %3, %7 : vector<16x16x128xf32>
    %c0_8 = arith.constant 0 : index
    %c0_9 = arith.constant 0 : index
    %9 = vector.load %arg3[%c0_8, %c0_9] : memref<1x128xf32, #tpu.memory_space<vmem>>, vector<1x128xf32>
    %10 = vector.shape_cast %9 : vector<1x128xf32> to vector<128xf32>
    %11 = vector.shape_cast %10 : vector<128xf32> to vector<1x1x128xf32>
    %12 = vector.broadcast %11 : vector<1x1x128xf32> to vector<16x16x128xf32>
    %13 = arith.addf %8, %12 : vector<16x16x128xf32>
    %cst_10 = arith.constant 0.000000e+00 : f32
    %14 = vector.broadcast %cst_10 : f32 to vector<16x16x128xf32>
    %15 = arith.maximumf %13, %14 : vector<16x16x128xf32>
    %16 = arith.truncf %15 : vector<16x16x128xf32> to vector<16x16x128xbf16>
    %c1 = arith.constant 1 : index
    %c1_11 = arith.constant 1 : index
    %c0_12 = arith.constant 0 : index
    %17 = vector.load %arg9[%c1, %c1_11, %c0_12] : memref<18x18x128xbf16, #tpu.memory_space<vmem>>, vector<16x16x128xbf16>
    tpu.vector_store %arg9[%c1, %c1_11, %c0_12], %16 {strides = array<i32>} : memref<18x18x128xbf16, #tpu.memory_space<vmem>>, vector<16x16x128xbf16>,
    %c0_13 = arith.constant 0 : index
    %c0_14 = arith.constant 0 : index
    %c0_15 = arith.constant 0 : index
    %18 = vector.load %arg9[%c0_13, %c0_14, %c0_15] : memref<18x18x128xbf16, #tpu.memory_space<vmem>>, vector<18x16x128xbf16>
    %c0_16 = arith.constant 0 : index
    %c1_17 = arith.constant 1 : index
    %c0_18 = arith.constant 0 : index
    %19 = vector.load %arg9[%c0_16, %c1_17, %c0_18] : memref<18x18x128xbf16, #tpu.memory_space<vmem>>, vector<18x16x128xbf16>
    %c0_19 = arith.constant 0 : index
    %c2 = arith.constant 2 : index
    %c0_20 = arith.constant 0 : index
    %20 = vector.load %arg9[%c0_19, %c2, %c0_20] : memref<18x18x128xbf16, #tpu.memory_space<vmem>>, vector<18x16x128xbf16>
    %21 = vector.extract_strided_slice %18 {offsets = [0, 0, 0], sizes = [16, 16, 128], strides = [1, 1, 1]} : vector<18x16x128xbf16> to vector<16x16x128xbf16>
    %22 = vector.extract_strided_slice %19 {offsets = [0, 0, 0], sizes = [16, 16, 128], strides = [1, 1, 1]} : vector<18x16x128xbf16> to vector<16x16x128xbf16>
    %23 = vector.extract_strided_slice %20 {offsets = [0, 0, 0], sizes = [16, 16, 128], strides = [1, 1, 1]} : vector<18x16x128xbf16> to vector<16x16x128xbf16>
    %24 = vector.extract_strided_slice %18 {offsets = [1, 0, 0], sizes = [16, 16, 128], strides = [1, 1, 1]} : vector<18x16x128xbf16> to vector<16x16x128xbf16>
    %25 = vector.extract_strided_slice %19 {offsets = [1, 0, 0], sizes = [16, 16, 128], strides = [1, 1, 1]} : vector<18x16x128xbf16> to vector<16x16x128xbf16>
    %26 = vector.extract_strided_slice %20 {offsets = [1, 0, 0], sizes = [16, 16, 128], strides = [1, 1, 1]} : vector<18x16x128xbf16> to vector<16x16x128xbf16>
    %27 = vector.extract_strided_slice %18 {offsets = [2, 0, 0], sizes = [16, 16, 128], strides = [1, 1, 1]} : vector<18x16x128xbf16> to vector<16x16x128xbf16>
    %28 = vector.extract_strided_slice %19 {offsets = [2, 0, 0], sizes = [16, 16, 128], strides = [1, 1, 1]} : vector<18x16x128xbf16> to vector<16x16x128xbf16>
    %29 = vector.extract_strided_slice %20 {offsets = [2, 0, 0], sizes = [16, 16, 128], strides = [1, 1, 1]} : vector<18x16x128xbf16> to vector<16x16x128xbf16>
    %30 = tpu.concatenate %21, %22, %23, %24, %25, %26, %27, %28, %29 in 2 : vector<16x16x128xbf16>, vector<16x16x128xbf16>, vector<16x16x128xbf16>, vector<16x16x128xbf16>, vector<16x16x128xbf16>, vector<16x16x128xbf16>, vector<16x16x128xbf16>, vector<16x16x128xbf16>, vector<16x16x128xbf16> -> vector<16x16x1152xbf16>
    %31 = vector.shape_cast %30 : vector<16x16x1152xbf16> to vector<256x1152xbf16>
    %c0_21 = arith.constant 0 : index
    %c0_22 = arith.constant 0 : index
    %32 = vector.load %arg4[%c0_21, %c0_22] : memref<1152x128xbf16, #tpu.memory_space<vmem>>, vector<1152x128xbf16>
    %cst_23 = arith.constant dense<0.000000e+00> : vector<256x128xf32>
    %33 = tpu.matmul %31, %32, %cst_23 {dimension_numbers = #tpu.dot_dimension_numbers<[1], [0], [0], [1], [0, 0, 1, 1], [], []>} : vector<256x1152xbf16>, vector<1152x128xbf16>, vector<256x128xf32> -> vector<256x128xf32>
    %c0_24 = arith.constant 0 : index
    %c0_25 = arith.constant 0 : index
    %34 = vector.load %arg5[%c0_24, %c0_25] : memref<1x128xf32, #tpu.memory_space<vmem>>, vector<1x128xf32>
    %35 = vector.shape_cast %34 : vector<1x128xf32> to vector<128xf32>
    %36 = vector.shape_cast %35 : vector<128xf32> to vector<1x128xf32>
    %37 = vector.broadcast %36 : vector<1x128xf32> to vector<256x128xf32>
    %38 = arith.mulf %33, %37 : vector<256x128xf32>
    %c0_26 = arith.constant 0 : index
    %c0_27 = arith.constant 0 : index
    %39 = vector.load %arg6[%c0_26, %c0_27] : memref<1x128xf32, #tpu.memory_space<vmem>>, vector<1x128xf32>
    %40 = vector.shape_cast %39 : vector<1x128xf32> to vector<128xf32>
    %41 = vector.shape_cast %40 : vector<128xf32> to vector<1x128xf32>
    %42 = vector.broadcast %41 : vector<1x128xf32> to vector<256x128xf32>
    %43 = arith.addf %38, %42 : vector<256x128xf32>
    %cst_28 = arith.constant 0.000000e+00 : f32
    %44 = vector.broadcast %cst_28 : f32 to vector<256x128xf32>
    %45 = arith.maximumf %43, %44 : vector<256x128xf32>
    %46 = vector.shape_cast %45 : vector<256x128xf32> to vector<16x16x128xf32>
    %47 = arith.truncf %46 : vector<16x16x128xf32> to vector<16x16x128xbf16>
    %c1_29 = arith.constant 1 : index
    %c1_30 = arith.constant 1 : index
    %c0_31 = arith.constant 0 : index
    %48 = vector.load %arg9[%c1_29, %c1_30, %c0_31] : memref<18x18x128xbf16, #tpu.memory_space<vmem>>, vector<16x16x128xbf16>
    tpu.vector_store %arg9[%c1_29, %c1_30, %c0_31], %47 {strides = array<i32>} : memref<18x18x128xbf16, #tpu.memory_space<vmem>>, vector<16x16x128xbf16>,
    %c0_32 = arith.constant 0 : index
    %c0_33 = arith.constant 0 : index
    %c0_34 = arith.constant 0 : index
    %49 = vector.load %arg9[%c0_32, %c0_33, %c0_34] : memref<18x18x128xbf16, #tpu.memory_space<vmem>>, vector<18x16x128xbf16>
    %c0_35 = arith.constant 0 : index
    %c1_36 = arith.constant 1 : index
    %c0_37 = arith.constant 0 : index
    %50 = vector.load %arg9[%c0_35, %c1_36, %c0_37] : memref<18x18x128xbf16, #tpu.memory_space<vmem>>, vector<18x16x128xbf16>
    %c0_38 = arith.constant 0 : index
    %c2_39 = arith.constant 2 : index
    %c0_40 = arith.constant 0 : index
    %51 = vector.load %arg9[%c0_38, %c2_39, %c0_40] : memref<18x18x128xbf16, #tpu.memory_space<vmem>>, vector<18x16x128xbf16>
    %52 = vector.extract_strided_slice %49 {offsets = [0, 0, 0], sizes = [16, 16, 128], strides = [1, 1, 1]} : vector<18x16x128xbf16> to vector<16x16x128xbf16>
    %53 = vector.extract_strided_slice %50 {offsets = [0, 0, 0], sizes = [16, 16, 128], strides = [1, 1, 1]} : vector<18x16x128xbf16> to vector<16x16x128xbf16>
    %54 = vector.extract_strided_slice %51 {offsets = [0, 0, 0], sizes = [16, 16, 128], strides = [1, 1, 1]} : vector<18x16x128xbf16> to vector<16x16x128xbf16>
    %55 = vector.extract_strided_slice %49 {offsets = [1, 0, 0], sizes = [16, 16, 128], strides = [1, 1, 1]} : vector<18x16x128xbf16> to vector<16x16x128xbf16>
    %56 = vector.extract_strided_slice %50 {offsets = [1, 0, 0], sizes = [16, 16, 128], strides = [1, 1, 1]} : vector<18x16x128xbf16> to vector<16x16x128xbf16>
    %57 = vector.extract_strided_slice %51 {offsets = [1, 0, 0], sizes = [16, 16, 128], strides = [1, 1, 1]} : vector<18x16x128xbf16> to vector<16x16x128xbf16>
    %58 = vector.extract_strided_slice %49 {offsets = [2, 0, 0], sizes = [16, 16, 128], strides = [1, 1, 1]} : vector<18x16x128xbf16> to vector<16x16x128xbf16>
    %59 = vector.extract_strided_slice %50 {offsets = [2, 0, 0], sizes = [16, 16, 128], strides = [1, 1, 1]} : vector<18x16x128xbf16> to vector<16x16x128xbf16>
    %60 = vector.extract_strided_slice %51 {offsets = [2, 0, 0], sizes = [16, 16, 128], strides = [1, 1, 1]} : vector<18x16x128xbf16> to vector<16x16x128xbf16>
    %61 = tpu.concatenate %52, %53, %54, %55, %56, %57, %58, %59, %60 in 2 : vector<16x16x128xbf16>, vector<16x16x128xbf16>, vector<16x16x128xbf16>, vector<16x16x128xbf16>, vector<16x16x128xbf16>, vector<16x16x128xbf16>, vector<16x16x128xbf16>, vector<16x16x128xbf16>, vector<16x16x128xbf16> -> vector<16x16x1152xbf16>
    %62 = vector.shape_cast %61 : vector<16x16x1152xbf16> to vector<256x1152xbf16>
    %c0_41 = arith.constant 0 : index
    %c0_42 = arith.constant 0 : index
    %63 = vector.load %arg7[%c0_41, %c0_42] : memref<1152x128xbf16, #tpu.memory_space<vmem>>, vector<1152x128xbf16>
    %cst_43 = arith.constant dense<0.000000e+00> : vector<256x128xf32>
    %64 = tpu.matmul %62, %63, %cst_43 {dimension_numbers = #tpu.dot_dimension_numbers<[1], [0], [0], [1], [0, 0, 1, 1], [], []>} : vector<256x1152xbf16>, vector<1152x128xbf16>, vector<256x128xf32> -> vector<256x128xf32>
    %65 = vector.shape_cast %64 : vector<256x128xf32> to vector<16x16x128xf32>
    %c0_44 = arith.constant 0 : index
    %c0_45 = arith.constant 0 : index
    %c0_46 = arith.constant 0 : index
    %c0_47 = arith.constant 0 : index
    %66 = vector.load %arg1[%c0_44, %c0_45, %c0_46, %c0_47] : memref<1x16x16x128xf32, #tpu.memory_space<vmem>>, vector<1x16x16x128xf32>
    %67 = vector.shape_cast %66 : vector<1x16x16x128xf32> to vector<16x16x128xf32>
    %68 = arith.addf %65, %67 : vector<16x16x128xf32>
    %c0_48 = arith.constant 0 : index
    %c0_49 = arith.constant 0 : index
    %c0_50 = arith.constant 0 : index
    %c0_51 = arith.constant 0 : index
    %69 = vector.load %arg8[%c0_48, %c0_49, %c0_50, %c0_51] : memref<1x16x16x128xf32, #tpu.memory_space<vmem>>, vector<1x16x16x128xf32>
    %70 = vector.shape_cast %69 : vector<1x16x16x128xf32> to vector<16x16x128xf32>
    %71 = vector.shape_cast %68 : vector<16x16x128xf32> to vector<1x16x16x128xf32>
    tpu.vector_store %arg8[%c0_48, %c0_49, %c0_50, %c0_51], %71 {strides = array<i32>} : memref<1x16x16x128xf32, #tpu.memory_space<vmem>>, vector<1x16x16x128xf32>,
    return
  }
  func.func @transform_0(%arg0: i32) -> (i32, i32, i32, i32) {
    %c0_i32 = arith.constant 0 : i32
    %c0_i32_0 = arith.constant 0 : i32
    %c0_i32_1 = arith.constant 0 : i32
    %c0_i32_2 = arith.constant 0 : i32
    return %arg0, %c0_i32, %c0_i32_0, %c0_i32_1 : i32, i32, i32, i32
  }
  func.func @transform_1(%arg0: i32) -> (i32, i32) {
    %c0_i32 = arith.constant 0 : i32
    %c0_i32_0 = arith.constant 0 : i32
    %c0_i32_1 = arith.constant 0 : i32
    return %c0_i32, %c0_i32_0 : i32, i32
  }
  func.func @transform_2(%arg0: i32) -> (i32, i32) {
    %c0_i32 = arith.constant 0 : i32
    %c0_i32_0 = arith.constant 0 : i32
    %c0_i32_1 = arith.constant 0 : i32
    return %c0_i32, %c0_i32_0 : i32, i32
  }
  func.func @transform_3(%arg0: i32) -> (i32, i32) {
    %c0_i32 = arith.constant 0 : i32
    %c0_i32_0 = arith.constant 0 : i32
    %c0_i32_1 = arith.constant 0 : i32
    return %c0_i32, %c0_i32_0 : i32, i32
  }
  func.func @transform_4(%arg0: i32) -> (i32, i32) {
    %c0_i32 = arith.constant 0 : i32
    %c0_i32_0 = arith.constant 0 : i32
    %c0_i32_1 = arith.constant 0 : i32
    return %c0_i32, %c0_i32_0 : i32, i32
  }
  func.func @transform_5(%arg0: i32) -> (i32, i32) {
    %c0_i32 = arith.constant 0 : i32
    %c0_i32_0 = arith.constant 0 : i32
    %c0_i32_1 = arith.constant 0 : i32
    return %c0_i32, %c0_i32_0 : i32, i32
  }
  func.func @transform_6(%arg0: i32) -> (i32, i32) {
    %c0_i32 = arith.constant 0 : i32
    %c0_i32_0 = arith.constant 0 : i32
    %c0_i32_1 = arith.constant 0 : i32
    return %c0_i32, %c0_i32_0 : i32, i32
  }
  func.func @transform_7(%arg0: i32) -> (i32, i32, i32, i32) {
    %c0_i32 = arith.constant 0 : i32
    %c0_i32_0 = arith.constant 0 : i32
    %c0_i32_1 = arith.constant 0 : i32
    %c0_i32_2 = arith.constant 0 : i32
    return %arg0, %c0_i32, %c0_i32_0, %c0_i32_1 : i32, i32, i32, i32
  }
}

</mosaic_0001>

<bundles_post_ra>
// kernel: tpu_custom_call.1
= control target key start
LH: loop header
LB: loop body
LE: loop exit
PB: predicated region body
PF: predicated region fallthrough
CT: control target
= control target key end

     0   :  { %12 = vsyncpa [#allocation4], 0  ;;  %s9796_s0 = inlined_call_operand.hbm [shape: f32[2,16,16,128], index: 0, kind: input, shape index: {}]   ;;  %s9797_s1 = inlined_call_operand.vmem [shape: f32[1,128], index: 1, kind: input, shape index: {}]   ;;  %s9798_s2 = inlined_call_operand.vmem [shape: f32[1,128], index: 2, kind: input, shape index: {}]   ;;  %s9799_s3 = inlined_call_operand.hbm [shape: bf16[1152,128], index: 3, kind: input, shape index: {}]   ;;  %s9800_s4 = inlined_call_operand.vmem [shape: f32[1,128], index: 4, kind: input, shape index: {}]   ;;  %s9801_s5 = inlined_call_operand.vmem [shape: f32[1,128], index: 5, kind: input, shape index: {}]   ;;  %s9802_s6 = inlined_call_operand.hbm [shape: bf16[1152,128], index: 6, kind: input, shape index: {}]   ;;  %s9803_s7 = inlined_call_operand.hbm [shape: f32[2,16,16,128], index: 7, kind: output, shape index: {}]  }
   0x1   :  { %14 = vsyncpa [#allocation4 + $0x1], 0 }
   0x2   :  { %15 = vsyncpa [#allocation7], 0 }
   0x3   :  { %16 = vsyncpa [#allocation5], 0 }
   0x4   :  { %18 = vsyncpa [#allocation5 + $0x1], 0  ;;  %s7827_s24 = smov 0   ;;  %s7829_s25 = smov 0  }
   0x5   :  { %s7831_s26 = smov 0   ;;  %s7833_s27 = smov 0  }
   0x6 LB: > { %s7848_s28 = sadd.s32 4294967295, %s7774_s27   ;;  %s5852_s29 = sadd.s32 4294967294, %s7774_s27   ;;  %s7774_s27 = sphi %s7833_s27, %s9851_s27   ;;  %s7770_s26 = sphi %s7831_s26, %s9850_s26   ;;  %s7766_s25 = sphi %s7829_s25, %s9849_s25   ;;  %s7762_s24 = sphi %s7827_s24, %s9848_s24  }
   0x7   : > { %p44_p0 = scmp.ne.s32.totalorder %s7766_s25, %s7762_s24  ;;  %p9804_p1 = scmp.eq.s32.totalorder %s7848_s28, 0 }
   0x8   : > { %p200_p3 = scmp.eq.s32.totalorder %s5852_s29, 1  ;;  %p5853_p5 = scmp.ge.s32.totalorder %s7774_s27, 1 }
   0x9   : > { %p7857_p4 = por %p9804_p1, %p44_p0  ;;  %p207_p7 = scmp.lt.s32.totalorder %s7774_s27, 3 }
   0xa   : > { %p7862_p6 = por %p200_p3, %p44_p0  ;;  %s7776_s10 = smov [#allocation6]  }
   0xb   : > { %s9817_s30 = scalar_select %p7857_p4, 1, 0 }
   0xc   : > { %s9818_s8 = scalar_select %p7862_p6, 1, 0 }
   0xd   : > { %p7867_p8 = pnand %p5853_p5, %p207_p7  ;;  %s225_s11 = sshll.u32 %s7776_s10, 4  ;;  %s7871_s11 = int_to_ptr.vmem [resolvable:$true] %s225_s11 }
   0xe   : > { %s7777_s13 = smov [#allocation8]   ;;  %s7618_s17 = scalar_lea.hbm %s9799_s3, 9216 }
   0xf   : > { %p7308_p9 = pneg %p7867_p8  ;;  %s244_s14 = sshll.u32 %s7777_s13, 4  ;;  %s7882_s14 = int_to_ptr.vmem [resolvable:$true] %s244_s14 }
  0x10   : > { %p7619_p12 = scmp.ne.s32.totalorder %s9799_s3, %s7618_s17  ;;  %p7625_p5 = scmp.lt.u32.totalorder %s7618_s17, %s9799_s3 }
  0x11   : > { %p7878_p11 = pnand %p7308_p9, %p9804_p1 }
  0x13   : > { %p7620_p13 = pneg %p7878_p11 }
  0x15   : > { %p7621_p0 = pnand %p7620_p13, %p7619_p12 }
  0x17   : > { %p7622_p3 = pneg %p7621_p0 }
  0x19   : > { %p7627_p7 = pnand %p7625_p5, %p7622_p3 }
  0x1b   : > { %7630 = shalt.err (!%p7627_p7)
}
  0x1c   : > { %s7631_s22 = scalar_lea.vmem %s7871_s11, 9216  ;;  %p7639_p2 = scmp.lt.s32.totalorder %s7871_s11, %s7871_s11 }
  0x1d   : > { %p7632_p9 = scmp.ne.s32.totalorder %s7871_s11, %s7631_s22  ;;  %p7640_p12 = scmp.lt.s32.totalorder %s7631_s22, %s7631_s22 }
  0x1f   : > { %p7634_p10 = pnand %p7632_p9, %p7620_p13  ;;  %p7641_p0 = por %p7640_p12, %p7639_p2 }
  0x21   : > { %p7635_p1 = pneg %p7634_p10 }
  0x23   : > { %p7642_p6 = pnand %p7641_p0, %p7635_p1 }
  0x25   : > { %7645 = shalt.err (!%p7642_p6)
}
  0x26   : > { %s7778_s23 = smov 64   ;;  %s7779_s29 = smov 4  }
  0x27   : > { %7311 = dma.hbm_to_vmem [thread:$0]  (!%p7878_p11), %s9799_s3, 9216, %s7871_s11, [#allocation7], %s7778_s23, %s7778_s23, %s7779_s29  }
  0x28   : > { %s7646_s17 = scalar_lea.hbm %s9802_s6, 9216 }
  0x29   : > { %p7647_p2 = scmp.ne.s32.totalorder %s9802_s6, %s7646_s17  ;;  %p7653_p10 = scmp.lt.u32.totalorder %s7646_s17, %s9802_s6 }
  0x2b   : > { %p7649_p1 = pnand %p7647_p2, %p7620_p13 }
  0x2d   : > { %p7650_p6 = pneg %p7649_p1 }
  0x2f   : > { %p7655_p3 = pnand %p7653_p10, %p7650_p6 }
  0x31   : > { %7658 = shalt.err (!%p7655_p3)
}
  0x32   : > { %s7659_s11 = scalar_lea.vmem %s7882_s14, 9216  ;;  %p7667_p12 = scmp.lt.s32.totalorder %s7882_s14, %s7882_s14 }
  0x33   : > { %p7660_p5 = scmp.ne.s32.totalorder %s7882_s14, %s7659_s11  ;;  %p7668_p0 = scmp.lt.s32.totalorder %s7659_s11, %s7659_s11 }
  0x35   : > { %p7662_p7 = pnand %p7660_p5, %p7620_p13  ;;  %p7669_p2 = por %p7668_p0, %p7667_p12 }
  0x37   : > { %p7663_p9 = pneg %p7662_p7 }
  0x39   : > { %p7670_p1 = pnand %p7669_p2, %p7663_p9 }
  0x3b   : > { %7673 = shalt.err (!%p7670_p1)
}
  0x3c   : > { %7314 = dma.hbm_to_vmem [thread:$0]  (!%p7878_p11), %s9802_s6, 9216, %s7882_s14, [#allocation7], %s7778_s23, %s7778_s23, %s7779_s29  }
  0x3d   : > { %s7937_s13 = sadd.s32 1, %s7774_s27   ;;  %s31_s12 = sadd.s32 1, %s7770_s26 }
  0x3e   : > { %s28_s15 = ssub.s32 %s7774_s27, %s7937_s13  ;;  %p38_p13 = scmp.ne.s32.totalorder %s7770_s26, %s7766_s25 }
  0x3f   : > { %p29_p6 = scmp.eq.s32.totalorder %s28_s15, 0  ;;  %p39_p10 = scmp.eq.s32.totalorder %s7774_s27, 0 }
  0x40   : > { %p9821_p3 = scmp.eq.s32.totalorder %s7848_s28, 1  ;;  %p7325_p7 = scmp.lt.s32.totalorder %s7774_s27, 2 }
  0x41   : > { %s7953_s17 = scalar_select %p29_p6, %s7770_s26, %s31_s12  }
  0x42   : > { %p7947_p5 = por %p9821_p3, %p38_p13  ;;  %p40_p9 = por %p39_p10, %p38_p13 }
  0x43   : > { %s258_s18 = sand.u32 1, %s7770_s26   ;;  %s6190_s14 = sshll.u32 %s7774_s27, 12 }
  0x44   : > { %s9822_s16 = scalar_select %p7947_p5, 1, 0 }
  0x45   : > { %s5857_s19 = sshll.u32 %s258_s18, 8  ;;  %s7960_s20 = scalar_lea.hbm %s9796_s0, %s6190_s14 }
  0x46   : > { %s262_s21 = scalar_lea.vmem [#allocation3], %s5857_s19  ;;  %p7964_p11 = pnand %p7325_p7, %p40_p9 }
  0x47   : > { %s269_s11 = sshll.u32 %s262_s21, 4  ;;  %s7968_s10 = scalar_lea.sflag [#allocation4], %s258_s18  ;;  %s7962_s11 = int_to_ptr.vmem [resolvable:$true] %s269_s11 }
  0x48   : > { %s7674_s12 = scalar_lea.hbm %s7960_s20, 4096  ;;  %p7676_p0 = pneg %p7964_p11 }
  0x49   : > { %p7675_p12 = scmp.ne.s32.totalorder %s7960_s20, %s7674_s12  ;;  %s7679_s14 = scalar_lea.hbm %s9796_s0, 8192 }
  0x4a   : > { %p7680_p13 = scmp.lt.u32.totalorder %s7960_s20, %s9796_s0  ;;  %p7681_p6 = scmp.lt.u32.totalorder %s7679_s14, %s7674_s12 }
  0x4b   : > { %p7677_p2 = pnand %p7676_p0, %p7675_p12  ;;  %p7683_p3 = scmp.lt.u32.totalorder %s7674_s12, %s7960_s20 }
  0x4c   : > { %p7682_p10 = por %p7681_p6, %p7680_p13 }
  0x4d   : > { %p7678_p1 = pneg %p7677_p2 }
  0x4e   : > { %p7684_p7 = por %p7683_p3, %p7682_p10 }
  0x50   : > { %p7685_p9 = pnand %p7684_p7, %p7678_p1 }
  0x52   : > { %7688 = shalt.err (!%p7685_p9)
}
  0x53   : > { %s7689_s18 = scalar_lea.vmem %s7962_s11, 4096  ;;  %s7780_s21 = smov [#allocation3]  }
  0x54   : > { %p7690_p12 = scmp.ne.s32.totalorder %s7962_s11, %s7689_s18  ;;  %s7694_s15 = sshll.u32 %s7780_s21, 4  ;;  %s7695_s15 = int_to_ptr.vmem [resolvable:$false] %s7694_s15 }
  0x55   : > { %s7696_s19 = scalar_lea.vmem %s7695_s15, 8192  ;;  %p7697_p4 = scmp.lt.s32.totalorder %s7962_s11, %s7695_s15 }
  0x56   : > { %p7692_p2 = pnand %p7690_p12, %p7676_p0  ;;  %p7698_p13 = scmp.lt.s32.totalorder %s7696_s19, %s7689_s18 }
  0x58   : > { %p7693_p5 = pneg %p7692_p2  ;;  %p7699_p6 = por %p7698_p13, %p7697_p4 }
  0x5a   : > { %p7700_p10 = pnand %p7699_p6, %p7693_p5 }
  0x5c   : > { %7703 = shalt.err (!%p7700_p10)
}
  0x5d   : > { %s7781_s12 = smov 128   ;;  %s7782_s14 = smov 8  }
  0x5e   : > { %7318 = dma.hbm_to_vmem [thread:$0]  (!%p7964_p11), %s7960_s20, 4096, %s7962_s11, %s7968_s10, %s7781_s12, %s7781_s12, %s7782_s14  }
  0x5f   : > { %281 = sbr.rel (%p7867_p8) target bundleno = 1246 (0x4de), region = 48 }
  0x66   : > { %s7999_s23 = sand.u32 1, %s7766_s25   ;;  %p9824_p4 = scmp.ne.s32.totalorder %s9817_s30, 0 }
  0x67   : > { %s5861_s29 = sshll.u32 %s7999_s23, 8  ;;  %s284_s18 = scalar_lea.sflag [#allocation4], %s7999_s23 }
  0x68   : > { %s8005_s21 = scalar_lea.vmem [#allocation3], %s5861_s29 }
  0x69   : > { %7749 = dma.done.wait (%p9824_p4), %s284_s18, 4096  }
  0x6a   : > { %7751 = vsyncadd (%p9824_p4), %s284_s18, 4294963200  ;;  %p9825_p5 = scmp.eq.s32.totalorder %s7848_s28, 0 }
  0x6c   : > { %7753 = dma.done.wait (%p9825_p5), [#allocation7], 18432   ;;  %p9826_p8 = pmov %p9825_p5 }
  0x6d   : > { %v7783_v0 = vmov 0   ;;  %v7370_v1 = vld [vmem:[#allocation6 + $0x40] sm:$0xff]   ;;  %v7374_v5 = vld [vmem:[#allocation6 + $0x48] sm:$0xff]   ;;  %v7378_v9 = vld [vmem:[#allocation6 + $0x50] sm:$0xff]   ;;  %vm1276_vm0 = vsmask.f32 7424 }
  0x6e   : > { %7755 = vsyncadd (%p9826_p8), [#allocation7], 4294948864  ;;  %327 = vst [vmem:[#allocation2] sm:$0xf] %v7783_v0  ;;  %v7371_v2 = vld [vmem:[#allocation6 + $0xc0] sm:$0xff]   ;;  %6256 = vmatprep.subr.bf16.mxu0 %v7370_v1  ;;  %v7375_v6 = vld [vmem:[#allocation6 + $0xc8] sm:$0xff]  }
  0x6f   : > { %328 = vst [vmem:[#allocation2 + $0x4] sm:$0xf] %v7783_v0  ;;  %329 = vst [vmem:[#allocation2 + $0x8] sm:$0x1] %v7783_v0  ;;  %v7372_v3 = vld [vmem:[#allocation6] sm:$0xff]   ;;  %6368 = vmatprep.subr.bf16.mxu1 %v7371_v2  ;;  %v7376_v7 = vld [vmem:[#allocation6 + $0x8] sm:$0xff]  }
  0x70   : > { %330 = vst [vmem:[#allocation2 + $0xc] sm:$0xf] %v7783_v0  ;;  %331 = vst [vmem:[#allocation2 + $0x10] sm:$0xf] %v7783_v0  ;;  %v7373_v4 = vld [vmem:[#allocation6 + $0x80] sm:$0xff]   ;;  %6257 = vmatpush3.bf16.msra.mxu0 %v7372_v3  ;;  %v7377_v8 = vld [vmem:[#allocation6 + $0x88] sm:$0xff]  }
  0x71   : > { %332 = vst [vmem:[#allocation2 + $0x14] sm:$0x1] %v7783_v0  ;;  %333 = vst [vmem:[#allocation2 + $0x18] sm:$0xf] %v7783_v0  ;;  %6369 = vmatpush3.bf16.msra.mxu1 %v7373_v4  ;;  %6258 = vmatprep.subr.bf16.mxu0 %v7374_v5  ;;  %v7379_v10 = vld [vmem:[#allocation6 + $0xd0] sm:$0xff]   ;;  %v7382_v13 = vld [vmem:[#allocation6 + $0x58] sm:$0xff]  }
  0x72   : > { %334 = vst [vmem:[#allocation2 + $0x1c] sm:$0xf] %v7783_v0  ;;  %335 = vst [vmem:[#allocation2 + $0x20] sm:$0x1] %v7783_v0  ;;  %6370 = vmatprep.subr.bf16.mxu1 %v7375_v6  ;;  %v7380_v11 = vld [vmem:[#allocation6 + $0x10] sm:$0xff]   ;;  %v7383_v14 = vld [vmem:[#allocation6 + $0xd8] sm:$0xff]  }
  0x73   : > { %336 = vst [vmem:[#allocation2 + $0x24] sm:$0xf] %v7783_v0  ;;  %337 = vst [vmem:[#allocation2 + $0x28] sm:$0xf] %v7783_v0  ;;  %v7381_v12 = vld [vmem:[#allocation6 + $0x90] sm:$0xff]   ;;  %v7384_v15 = vld [vmem:[#allocation6 + $0x18] sm:$0xff]  }
  0x74   : > { %338 = vst [vmem:[#allocation2 + $0x2c] sm:$0x1] %v7783_v0  ;;  %339 = vst [vmem:[#allocation2 + $0x30] sm:$0xf] %v7783_v0  ;;  %6259 = vmatpush3.bf16.msra.mxu0 %v7376_v7  ;;  %v7385_v16 = vld [vmem:[#allocation6 + $0x98] sm:$0xff]   ;;  %v7386_v17 = vld [vmem:[#allocation6 + $0x60] sm:$0xff]  }
  0x75   : > { %340 = vst [vmem:[#allocation2 + $0x34] sm:$0xf] %v7783_v0  ;;  %341 = vst [vmem:[#allocation2 + $0x38] sm:$0x1] %v7783_v0  ;;  %6371 = vmatpush3.bf16.msra.mxu1 %v7377_v8  ;;  %6260 = vmatprep.subr.bf16.mxu0 %v7378_v9  ;;  %v7387_v18 = vld [vmem:[#allocation6 + $0xe0] sm:$0xff]   ;;  %v7390_v21 = vld [vmem:[#allocation6 + $0x68] sm:$0xff]  }
  0x76   : > { %342 = vst [vmem:[#allocation2 + $0x3c] sm:$0xf] %v7783_v0  ;;  %343 = vst [vmem:[#allocation2 + $0x40] sm:$0xf] %v7783_v0  ;;  %6372 = vmatprep.subr.bf16.mxu1 %v7379_v10  ;;  %v7388_v19 = vld [vmem:[#allocation6 + $0x20] sm:$0xff]   ;;  %v7391_v22 = vld [vmem:[#allocation6 + $0xe8] sm:$0xff]  }
  0x77   : > { %344 = vst [vmem:[#allocation2 + $0x44] sm:$0x1] %v7783_v0  ;;  %345 = vst [vmem:[#allocation2 + $0x48] sm:$0xf] %v7783_v0  ;;  %v7389_v20 = vld [vmem:[#allocation6 + $0xa0] sm:$0xff]   ;;  %v7392_v23 = vld [vmem:[#allocation6 + $0x28] sm:$0xff]  }
  0x78   : > { %346 = vst [vmem:[#allocation2 + $0x4c] sm:$0xf] %v7783_v0  ;;  %347 = vst [vmem:[#allocation2 + $0x50] sm:$0x1] %v7783_v0  ;;  %6261 = vmatpush3.bf16.msra.mxu0 %v7380_v11  ;;  %v7393_v24 = vld [vmem:[#allocation6 + $0xa8] sm:$0xff]   ;;  %v7394_v25 = vld [vmem:[#allocation6 + $0x70] sm:$0xff]  }
  0x79   : > { %348 = vst [vmem:[#allocation2 + $0x54] sm:$0xf] %v7783_v0  ;;  %349 = vst [vmem:[#allocation2 + $0x58] sm:$0xf] %v7783_v0  ;;  %6373 = vmatpush3.bf16.msra.mxu1 %v7381_v12  ;;  %6262 = vmatprep.subr.bf16.mxu0 %v7382_v13  ;;  %v7395_v26 = vld [vmem:[#allocation6 + $0xf0] sm:$0xff]   ;;  %v7398_v29 = vld [vmem:[#allocation6 + $0x78] sm:$0xff]  }
  0x7a   : > { %350 = vst [vmem:[#allocation2 + $0x5c] sm:$0x1] %v7783_v0  ;;  %351 = vst [vmem:[#allocation2 + $0x60] sm:$0xf] %v7783_v0  ;;  %6374 = vmatprep.subr.bf16.mxu1 %v7383_v14  ;;  %v7396_v27 = vld [vmem:[#allocation6 + $0x30] sm:$0xff]   ;;  %v7399_v30 = vld [vmem:[#allocation6 + $0xf8] sm:$0xff]  }
  0x7b   : > { %352 = vst [vmem:[#allocation2 + $0x64] sm:$0xf] %v7783_v0  ;;  %353 = vst [vmem:[#allocation2 + $0x68] sm:$0x1] %v7783_v0  ;;  %v7397_v28 = vld [vmem:[#allocation6 + $0xb0] sm:$0xff]   ;;  %v7400_v31 = vld [vmem:[#allocation6 + $0x38] sm:$0xff]  }
  0x7c   : > { %354 = vst [vmem:[#allocation2 + $0x6c] sm:$0xf] %v7783_v0  ;;  %355 = vst [vmem:[#allocation2 + $0x70] sm:$0xf] %v7783_v0  ;;  %6263 = vmatpush3.bf16.msra.mxu0 %v7384_v15  ;;  %v7401_v32 = vld [vmem:[#allocation6 + $0xb8] sm:$0xff]   ;;  %v381_v37 = vld [vmem:[%s8005_s21] sm:$0xff] }
  0x7d   : > { %356 = vst [vmem:[#allocation2 + $0x74] sm:$0x1] %v7783_v0  ;;  %357 = vst [vmem:[#allocation2 + $0x78] sm:$0xf] %v7783_v0  ;;  %6375 = vmatpush3.bf16.msra.mxu1 %v7385_v16  ;;  %6264 = vmatprep.subr.bf16.mxu0 %v7386_v17  ;;  %v1060_v33 = vld [vmem:[#allocation2] sm:$0xf] }
  0x7e   : > { %358 = vst [vmem:[#allocation2 + $0x7c] sm:$0xf] %v7783_v0  ;;  %359 = vst [vmem:[#allocation2 + $0x80] sm:$0x1] %v7783_v0  ;;  %6376 = vmatprep.subr.bf16.mxu1 %v7387_v18  ;;  %v1061_v34 = vld [vmem:[#allocation2 + $0x4] sm:$0xf] }
  0x7f   : > { %360 = vst [vmem:[#allocation2 + $0x84] sm:$0xf] %v7783_v0  ;;  %361 = vst [vmem:[#allocation2 + $0x88] sm:$0xf] %v7783_v0  ;;  %v5899_v35 = vcombine.low %v1060_v33, %v1061_v34  ;;  %v382_v38 = vld [vmem:[%s8005_s21 + $0x8] sm:$0xff]  ;;  %vm943_vm3 = vcmask 1043456  }
  0x80   : > { %362 = vst [vmem:[#allocation2 + $0x8c] sm:$0x1] %v7783_v0  ;;  %363 = vst [vmem:[#allocation2 + $0x90] sm:$0xf] %v7783_v0  ;;  %6265 = vmatpush3.bf16.msra.mxu0 %v7388_v19  ;;  %v8020_v39 = vld [vmem:[%s9797_s1] ss:$0 sm:$0xff] }
  0x81   : > { %364 = vst [vmem:[#allocation2 + $0x94] sm:$0xf] %v7783_v0  ;;  %365 = vst [vmem:[#allocation2 + $0x98] sm:$0x1] %v7783_v0  ;;  %6377 = vmatpush3.bf16.msra.mxu1 %v7389_v20  ;;  %6266 = vmatprep.subr.bf16.mxu0 %v7390_v21  ;;  %v8025_v40 = vld [vmem:[%s9798_s2] ss:$0 sm:$0xff]  ;;  %v420_v44 = vmul.f32 %v8020_v39, %v381_v37  ;;  %v421_v47 = vmul.f32 %v8020_v39, %v382_v38 }
  0x82   : > { %366 = vst [vmem:[#allocation2 + $0x9c] sm:$0xf] %v7783_v0  ;;  %367 = vst [vmem:[#allocation2 + $0xa0] sm:$0xf] %v7783_v0  ;;  %6378 = vmatprep.subr.bf16.mxu1 %v7391_v22  ;;  %vm619_vm1 = vsmask.f32 256 }
  0x83   : > { %368 = vst [vmem:[#allocation2 + $0xa4] sm:$0x1] %v7783_v0  ;;  %369 = vst [vmem:[#allocation2 + $0xa8] sm:$0xf] %v7783_v0  ;;  %vm620_vm2 = vsmask.f32 4368  ;;  %v459_v51 = vadd.f32 %v8025_v40, %v420_v44  ;;  %v460_v52 = vadd.f32 %v8025_v40, %v421_v47 }
  0x84   : > { %370 = vst [vmem:[#allocation2 + $0xac] sm:$0xf] %v7783_v0  ;;  %371 = vst [vmem:[#allocation2 + $0xb0] sm:$0x1] %v7783_v0  ;;  %6267 = vmatpush3.bf16.msra.mxu0 %v7392_v23  ;;  %v1278_v41 = vshrl.u32 %v5899_v35, 16  ;;  %v1280_v42 = vshll.u32 %v5899_v35, 16 }
  0x85   : > { %372 = vst [vmem:[#allocation2 + $0xb4] sm:$0xf] %v7783_v0  ;;  %373 = vst [vmem:[#allocation2 + $0xb8] sm:$0xf] %v7783_v0  ;;  %6379 = vmatpush3.bf16.msra.mxu1 %v7393_v24  ;;  %6268 = vmatprep.subr.bf16.mxu0 %v7394_v25  ;;  %v1114_v45 = vld [vmem:[#allocation2] sm:$0xe] }
  0x86   : > { %374 = vst [vmem:[#allocation2 + $0xbc] sm:$0x1] %v7783_v0  ;;  %375 = vst [vmem:[#allocation2 + $0xc0] sm:$0xf] %v7783_v0  ;;  %6380 = vmatprep.subr.bf16.mxu1 %v7395_v26  ;;  %v7406_v46 = vld [vmem:[#allocation6 + $0x140] sm:$0xff]   ;;  %v5931_v48 = vcombine.low %v1114_v45, %v1061_v34  ;;  %v1282_v49 = vrot.slane %v1280_v42, 1 }
  0x87   : > { %376 = vst [vmem:[#allocation2 + $0xc4] sm:$0xf] %v7783_v0  ;;  %377 = vst [vmem:[#allocation2 + $0xc8] sm:$0x1] %v7783_v0  ;;  %vm944_vm4 = vsmask.f32 7938 }
  0x88   : > { %378 = vst [vmem:[#allocation2 + $0xcc] sm:$0xf] %v7783_v0  ;;  %379 = vst [vmem:[#allocation2 + $0xd0] sm:$0xf] %v7783_v0  ;;  %6269 = vmatpush3.bf16.msra.mxu0 %v7396_v27  ;;  %vm1533_vm5 = vcmask 1046528   ;;  %v1534_v53 = vrot.slane %v5931_v48, 1  ;;  %v1283_v57 = vor.u32 %v1282_v49, %v1278_v41 }
  0x89   : > { %380 = vst [vmem:[#allocation2 + $0xd4] sm:$0x1] %v7783_v0  ;;  %6381 = vmatpush3.bf16.msra.mxu1 %v7397_v28  ;;  %6270 = vmatprep.subr.bf16.mxu0 %v7398_v29  ;;  %v7403_v36 = vld [vmem:[#allocation2 + $0x8] ss:$0 sps:$4 sm:$0x11]   ;;  %v384_v56 = vld [vmem:[%s8005_s21 + $0x18] sm:$0xff]  ;;  %vm8051_vm7 = vmor %vm619_vm1, %vm620_vm2 }
  0x8a   : > { %6382 = vmatprep.subr.bf16.mxu1 %v7399_v30  ;;  %v1285_v43 = vshll.u32 %v7403_v36, 16  ;;  %v1535_v54 = vrot.slane %v7403_v36, 1  ;;  %v383_v55 = vld [vmem:[%s8005_s21 + $0x10] sm:$0xff]  ;;  %v491_v58 = vmax.f32 %v459_v51, 0.0  ;;  %v423_v60 = vmul.f32 %v8020_v39, %v384_v56  ;;  %v385_v61 = vld [vmem:[%s8005_s21 + $0x20] sm:$0xff]  ;;  %v386_v0 = vld [vmem:[%s8005_s21 + $0x28] sm:$0xff] }
  0x8b   : > { %v422_v59 = vmul.f32 %v8020_v39, %v383_v55  ;;  %v492_v62 = vmax.f32 %v460_v52, 0.0  ;;  %v7407_v63 = vld [vmem:[#allocation6 + $0x100] sm:$0xff]   ;;  %vm950_vm6 = vcmask 1040384   ;;  %v424_v1 = vmul.f32 %v8020_v39, %v385_v61  ;;  %v7413_v6 = vld [vmem:[#allocation6 + $0x148] sm:$0xff]   ;;  %v387_v15 = vld [vmem:[%s8005_s21 + $0x30] sm:$0xff]  ;;  %s9655_s10 = scalar_lea.vmem [#allocation9], %s5861_s29 }
  0x8c   : > { %6271 = vmatpush3.bf16.msra.mxu0 %v7400_v31  ;;  %v1287_v50 = vrot.slane %v1285_v43, 1  ;;  %v6191_v3 = vpack.c.bf16 %v491_v58, %v491_v58  ;;  %v462_v5 = vadd.f32 %v8025_v40, %v423_v60  ;;  %v8042_v8 = vsel %vm1533_vm5, %v1534_v53, %v1535_v54  ;;  %v388_v16 = vld [vmem:[%s8005_s21 + $0x38] sm:$0xff]  ;;  %v7414_v21 = vld [vmem:[#allocation6 + $0x108] sm:$0xff]   ;;  %v946_v24 = vld [vmem:[#allocation2 + $0xc] sm:$0xf]  ;;  %s6255_s29 = sshll.u32 %s7848_s28, 12 }
  0x8d   : > { %6383 = vmatpush3.bf16.msra.mxu1 %v7401_v32  ;;  %6480 = vmatprep.subr.bf16.mxu0 %v7406_v46  ;;  %v461_v4 = vadd.f32 %v8025_v40, %v422_v59  ;;  %v6192_v7 = vpack.c.bf16 %v492_v62, %v492_v62  ;;  %v425_v9 = vmul.f32 %v8020_v39, %v386_v0  ;;  %v952_v25 = vld [vmem:[#allocation2 + $0x14] sm:$0x1]  ;;  %vm8058_vm8 = vmand %vm943_vm3, %vm944_vm4  ;;  %v7420_v41 = vld [vmem:[#allocation6 + $0x150] sm:$0xff]   ;;  %s5760_s15 = sshll.u32 %s9655_s10, 4  ;;  %s9747_s14 = scalar_lea.hbm %s9803_s7, %s6255_s29  ;;  %s9749_s15 = int_to_ptr.vmem [resolvable:$true] %s5760_s15 }
  0x8e   : > { %v1288_v2 = vsel %vm1276_vm0, %v1283_v57, %v1287_v50  ;;  %v463_v10 = vadd.f32 %v8025_v40, %v424_v1  ;;  %v623_v11 = vshrl.u32 %v6191_v3, 16  ;;  %v626_v12 = vshll.u32 %v6191_v3, 16  ;;  %vm8065_vm9 = vmand %vm950_vm6, %vm619_vm1  ;;  %v7421_v46 = vld [vmem:[#allocation6 + $0x110] sm:$0xff]   ;;  %v955_v49 = vld [vmem:[#allocation2 + $0x18] sm:$0xf]  ;;  %s5747_s28 = scalar_lea.sflag [#allocation5], %s7999_s23 }
  0x8f   : > { %2264 = vmatprep.mubr.bf16.mxu0 %v1288_v2  ;;  %v493_v13 = vmax.f32 %v461_v4, 0.0  ;;  %v494_v14 = vmax.f32 %v462_v5, 0.0  ;;  %v631_v17 = vshrl.u32 %v6192_v7, 16  ;;  %v634_v18 = vshll.u32 %v6192_v7, 16  ;;  %v959_v55 = vld [vmem:[#allocation2 + $0x20] sm:$0x1] }
  0x90   : > { %2265 = vmatmul.mubr.bf16.vlgmr.msra.gmra.mrb[0].mxu0 %v5899_v35  ;;  %v464_v19 = vadd.f32 %v8025_v40, %v425_v9  ;;  %v495_v20 = vmax.f32 %v463_v10, 0.0  ;;  %v625_v23 = vrot.slane %v623_v11, 7  ;;  %v426_v28 = vmul.f32 %v8020_v39, %v387_v15  ;;  %v962_v57 = vld [vmem:[#allocation2 + $0x24] sm:$0xf]  ;;  %v389_v62 = vld [vmem:[%s8005_s21 + $0x40] sm:$0xff]  ;;  %p9845_p0 = scmp.ne.s32.totalorder %s9822_s16, 0 }
  0x91   : > { %6481 = vmatpush3.bf16.msra.mxu0 %v7407_v63  ;;  %v6193_v26 = vpack.c.bf16 %v493_v13, %v493_v13  ;;  %v6194_v27 = vpack.c.bf16 %v494_v14, %v494_v14  ;;  %v633_v29 = vrot.slane %v631_v17, 7  ;;  %v427_v33 = vmul.f32 %v8020_v39, %v388_v16  ;;  %v7427_v63 = vld [vmem:[#allocation6 + $0x158] sm:$0xff]   ;;  %v966_v3 = vld [vmem:[#allocation2 + $0x2c] sm:$0x1]  ;;  %v390_v5 = vld [vmem:[%s8005_s21 + $0x48] sm:$0xff]  ;;  %s7784_s18 = smov [#allocation9]  }
  0x92   : > { %6482 = vmatprep.subr.bf16.mxu0 %v7413_v6  ;;  %v496_v31 = vmax.f32 %v464_v19, 0.0  ;;  %v6195_v32 = vpack.c.bf16 %v495_v20, %v495_v20  ;;  %v628_v34 = vor.u32 %v626_v12, %v625_v23  ;;  %v629_v35 = vrot.slane %v625_v23, 4  ;;  %v391_v6 = vld [vmem:[%s8005_s21 + $0x50] sm:$0xff]  ;;  %v392_v16 = vld [vmem:[%s8005_s21 + $0x58] sm:$0xff]  ;;  %s7708_s30 = sshll.u32 %s7784_s18, 4  ;;  %s7709_s30 = int_to_ptr.vmem [resolvable:$false] %s7708_s30 }
  0x93   : > { %v640_v37 = vshrl.u32 %v6193_v26, 16  ;;  %v643_v38 = vshll.u32 %v6193_v26, 16  ;;  %v636_v42 = vor.u32 %v634_v18, %v633_v29  ;;  %v638_v43 = vrot.slane %v633_v29, 4  ;;  %v7428_v17 = vld [vmem:[#allocation6 + $0x118] sm:$0xff]   ;;  %s7710_s9 = scalar_lea.vmem %s7709_s30, 8192  ;;  %p7711_p7 = scmp.lt.s32.totalorder %s9749_s15, %s7709_s30 }
  0x94   : > { %v648_v44 = vshrl.u32 %v6194_v27, 16  ;;  %v651_v45 = vshll.u32 %v6194_v27, 16  ;;  %v947_v47 = vsel %vm8058_vm8, %v628_v34, %v946_v24  ;;  %v6196_v50 = vpack.c.bf16 %v496_v31, %v496_v31 }
  0x95   : > { %6483 = vmatpush3.bf16.msra.mxu0 %v7414_v21  ;;  %v642_v48 = vrot.slane %v640_v37, 7  ;;  %v657_v51 = vshrl.u32 %v6195_v32, 16  ;;  %v637_v52 = vsel %vm8051_vm7, %v629_v35, %v636_v42  ;;  %948 = vst [vmem:[#allocation2 + $0xc] sm:$0xf] %v947_v47  ;;  %v953_v53 = vsel %vm8065_vm9, %v638_v43, %v952_v25 }
  0x96   : > { %6484 = vmatprep.subr.bf16.mxu0 %v7420_v41  ;;  %v650_v54 = vrot.slane %v648_v44, 7  ;;  %v660_v56 = vshll.u32 %v6195_v32, 16  ;;  %949 = vst [vmem:[#allocation2 + $0x10] sm:$0xf] %v637_v52  ;;  %954 = vst [vmem:[#allocation2 + $0x14] sm:$0x1] %v953_v53  ;;  %v465_v4 = vadd.f32 %v8025_v40, %v426_v28  ;;  %v466_v14 = vadd.f32 %v8025_v40, %v427_v33 }
  0x97   : > { %v645_v58 = vor.u32 %v643_v38, %v642_v48  ;;  %v646_v59 = vrot.slane %v642_v48, 4  ;;  %v659_v60 = vrot.slane %v657_v51, 7  ;;  %v665_v61 = vshrl.u32 %v6196_v50, 16 }
  0x98   : > { %v653_v0 = vor.u32 %v651_v45, %v650_v54  ;;  %v655_v1 = vrot.slane %v650_v54, 4  ;;  %v668_v2 = vshll.u32 %v6196_v50, 16  ;;  %v497_v15 = vmax.f32 %v465_v4, 0.0  ;;  %v969_v45 = vld [vmem:[#allocation2 + $0x30] sm:$0xf] }
  0x99   : > { %6485 = vmatpush3.bf16.msra.mxu0 %v7421_v46  ;;  %v956_v7 = vsel %vm8058_vm8, %v645_v58, %v955_v49  ;;  %v662_v9 = vor.u32 %v660_v56, %v659_v60  ;;  %v663_v10 = vrot.slane %v659_v60, 4  ;;  %v667_v11 = vrot.slane %v665_v61, 7 }
  0x9a   : > { %6486 = vmatprep.subr.bf16.mxu0 %v7427_v63  ;;  %v654_v12 = vsel %vm8051_vm7, %v646_v59, %v653_v0  ;;  %957 = vst [vmem:[#allocation2 + $0x18] sm:$0xf] %v956_v7  ;;  %v960_v13 = vsel %vm8065_vm9, %v655_v1, %v959_v55  ;;  %v428_v21 = vmul.f32 %v8020_v39, %v389_v62  ;;  %v498_v23 = vmax.f32 %v466_v14, 0.0 }
  0x9b   : > { %958 = vst [vmem:[#allocation2 + $0x1c] sm:$0xf] %v654_v12  ;;  %961 = vst [vmem:[#allocation2 + $0x20] sm:$0x1] %v960_v13  ;;  %v670_v18 = vor.u32 %v668_v2, %v667_v11  ;;  %v963_v19 = vsel %vm8058_vm8, %v662_v9, %v962_v57  ;;  %v672_v20 = vrot.slane %v667_v11, 4  ;;  %v6197_v24 = vpack.c.bf16 %v497_v15, %v497_v15  ;;  %v7434_v15 = vld [vmem:[#allocation6 + $0x160] sm:$0xff]  }
  0x9c   : > { %964 = vst [vmem:[#allocation2 + $0x24] sm:$0xf] %v963_v19  ;;  %v429_v25 = vmul.f32 %v8020_v39, %v390_v5  ;;  %v430_v26 = vmul.f32 %v8020_v39, %v391_v6  ;;  %v1062_v27 = vld [vmem:[#allocation2 + $0xc] sm:$0xf]  ;;  %v467_v32 = vadd.f32 %v8025_v40, %v428_v21  ;;  %v431_v33 = vmul.f32 %v8020_v39, %v392_v16 }
  0x9d   : > { %6487 = vmatpush3.bf16.msra.mxu0 %v7428_v17  ;;  %v1115_v28 = vld [vmem:[#allocation2 + $0xc] sm:$0xe]  ;;  %v671_v29 = vsel %vm8051_vm7, %v663_v10, %v670_v18  ;;  %v967_v31 = vsel %vm8065_vm9, %v672_v20, %v966_v3  ;;  %v1063_v34 = vld [vmem:[#allocation2 + $0x10] sm:$0xf]  ;;  %v6198_v35 = vpack.c.bf16 %v498_v23, %v498_v23  ;;  %v674_v37 = vshrl.u32 %v6197_v24, 16 }
  0x9e   : > { %965 = vst [vmem:[#allocation2 + $0x28] sm:$0xf] %v671_v29  ;;  %968 = vst [vmem:[#allocation2 + $0x2c] sm:$0x1] %v967_v31  ;;  %v677_v38 = vshll.u32 %v6197_v24, 16  ;;  %v468_v41 = vadd.f32 %v8025_v40, %v429_v25  ;;  %v5900_v42 = vcombine.low %v1062_v27, %v1063_v34  ;;  %v5932_v44 = vcombine.low %v1115_v28, %v1063_v34  ;;  %v7435_v31 = vld [vmem:[#allocation6 + $0x120] sm:$0xff]  }
  0x9f   : > { %v7408_v43 = vld [vmem:[#allocation2 + $0x14] ss:$0 sps:$4 sm:$0x11]   ;;  %v499_v46 = vmax.f32 %v467_v32, 0.0  ;;  %v8100_v47 = vadd.f32 %v8025_v40, %v430_v26  ;;  %v676_v48 = vrot.slane %v674_v37, 7  ;;  %v682_v49 = vshrl.u32 %v6198_v35, 16  ;;  %6488 = vmatprep.subr.bf16.mxu0 %v7434_v15 }
  0xa0   : > { %v685_v50 = vshll.u32 %v6198_v35, 16  ;;  %v500_v51 = vmax.f32 %v468_v41, 0.0  ;;  %2425 = vmatprep.mubr.bf16.mxu1 %v5900_v42  ;;  %v1290_v52 = vshrl.u32 %v5900_v42, 16  ;;  %v1292_v53 = vshll.u32 %v5900_v42, 16  ;;  %v973_v37 = vld [vmem:[#allocation2 + $0x38] sm:$0x1] }
  0xa1   : > { %v1297_v54 = vshll.u32 %v7408_v43, 16  ;;  %v1064_v55 = vld [vmem:[#allocation2 + $0x18] sm:$0xf]  ;;  %v1537_v56 = vrot.slane %v5932_v44, 1  ;;  %2426 = vmatmul.mubr.bf16.vlgmr.msra.gmra.mrb[0].mxu1 %v8042_v8  ;;  %v1538_v58 = vrot.slane %v7408_v43, 1  ;;  %v679_v59 = vor.u32 %v677_v38, %v676_v48  ;;  %6489 = vmatpush3.bf16.msra.mxu0 %v7435_v31  ;;  %v396_v15 = vld [vmem:[%s8005_s21 + $0x78] sm:$0xff] }
  0xa2   : > { %v1065_v57 = vld [vmem:[#allocation2 + $0x1c] sm:$0xf]  ;;  %v680_v60 = vrot.slane %v676_v48, 4  ;;  %v8103_v61 = vpack.c.bf16 %v499_v46, %v499_v46  ;;  %v1294_v62 = vrot.slane %v1292_v53, 1  ;;  %v684_v2 = vrot.slane %v682_v49, 7 }
  0xa3   : > { %v1299_v63 = vrot.slane %v1297_v54, 1  ;;  %v8105_v0 = vcombine.low %v1064_v55, %v1065_v57  ;;  %v7410_v1 = vld [vmem:[#allocation2 + $0x20] ss:$0 sps:$4 sm:$0x11]   ;;  %v8108_v3 = vsel %vm1533_vm5, %v1537_v56, %v1538_v58  ;;  %v1066_v4 = vld [vmem:[#allocation2 + $0x24] sm:$0xf]  ;;  %v970_v8 = vsel %vm8058_vm8, %v679_v59, %v969_v45 }
  0xa4   : > { %v1116_v5 = vld [vmem:[#allocation2 + $0x18] sm:$0xe]  ;;  %v1117_v6 = vld [vmem:[#allocation2 + $0x24] sm:$0xe]  ;;  %v8112_v7 = vpack.c.bf16 %v500_v51, %v500_v51  ;;  %v8115_v9 = vadd.f32 %v8025_v40, %v431_v33  ;;  %v1295_v10 = vor.u32 %v1294_v62, %v1290_v52  ;;  %v1309_v13 = vshll.u32 %v7410_v1, 16  ;;  %v395_v51 = vld [vmem:[%s8005_s21 + $0x70] sm:$0xff] }
  0xa5   : > { %2433 = vmatprep.mubr.bf16.mxu1 %v8105_v0  ;;  %v1302_v11 = vshrl.u32 %v8105_v0, 16  ;;  %v1304_v12 = vshll.u32 %v8105_v0, 16  ;;  %v1067_v14 = vld [vmem:[#allocation2 + $0x28] sm:$0xf]  ;;  %971 = vst [vmem:[#allocation2 + $0x30] sm:$0xf] %v970_v8  ;;  %v5933_v17 = vcombine.low %v1116_v5, %v1065_v57  ;;  %v687_v20 = vor.u32 %v685_v50, %v684_v2 }
  0xa6   : > { %v8120_v16 = vcombine.low %v1066_v4, %v1067_v14  ;;  %v1541_v18 = vrot.slane %v7410_v1, 1  ;;  %v7415_v19 = vld [vmem:[#allocation2 + $0x2c] ss:$0 sps:$4 sm:$0x11]   ;;  %v8123_v21 = vsel %vm1276_vm0, %v1295_v10, %v1299_v63  ;;  %v1311_v24 = vrot.slane %v1309_v13, 1  ;;  %v393_v45 = vld [vmem:[%s8005_s21 + $0x60] sm:$0xff] }
  0xa7   : > { %v1306_v23 = vrot.slane %v1304_v12, 1  ;;  %v5934_v25 = vcombine.low %v1117_v6, %v1067_v14  ;;  %2272 = vmatprep.mubr.bf16.mxu0 %v8123_v21  ;;  %v1540_v26 = vrot.slane %v5933_v17, 1  ;;  %v1321_v29 = vshll.u32 %v7415_v19, 16  ;;  %v394_v50 = vld [vmem:[%s8005_s21 + $0x68] sm:$0xff]  ;;  %v976_v56 = vld [vmem:[#allocation2 + $0x3c] sm:$0xf] }
  0xa8   : > { %v1314_v27 = vshrl.u32 %v8120_v16, 16  ;;  %v1316_v28 = vshll.u32 %v8120_v16, 16  ;;  %2273 = vmatmul.mubr.bf16.gmra.mrb[4].mxu0 %v5900_v42  ;;  %v688_v33 = vsel %vm8051_vm7, %v680_v60, %v687_v20  ;;  %v1544_v35 = vrot.slane %v7415_v19, 1  ;;  %v7441_v62 = vld [vmem:[#allocation6 + $0x168] sm:$0xff]  }
  0xa9   : > { %v1307_v32 = vor.u32 %v1306_v23, %v1302_v11  ;;  %v1543_v34 = vrot.slane %v5934_v25, 1  ;;  %2434 = vmatmul.mubr.bf16.gmra.mrb[4].mxu1 %v8108_v3  ;;  %v8132_v38 = vsel %vm1533_vm5, %v1540_v26, %v1541_v18  ;;  %v1323_v43 = vrot.slane %v1321_v29, 1  ;;  %972 = vst [vmem:[#allocation2 + $0x34] sm:$0xf] %v688_v33  ;;  %v7442_v5 = vld [vmem:[#allocation6 + $0x128] sm:$0xff]   ;;  %6490 = vmatprep.subr.bf16.mxu0 %v7441_v62 }
  0xaa   : > { %v1318_v41 = vrot.slane %v1316_v28, 1  ;;  %v689_v44 = vrot.slane %v684_v2, 4  ;;  %2441 = vmatprep.mubr.bf16.mxu1 %v8120_v16  ;;  %v691_v48 = vshrl.u32 %v8103_v61, 16  ;;  %v694_v49 = vshll.u32 %v8103_v61, 16  ;;  %v980_v12 = vld [vmem:[#allocation2 + $0x44] sm:$0x1]  ;;  %6491 = vmatpush3.bf16.msra.mxu0 %v7442_v5 }
  0xab   : > { %v8136_v42 = vsel %vm1276_vm0, %v1307_v32, %v1311_v24  ;;  %v8140_v46 = vsel %vm1533_vm5, %v1543_v34, %v1544_v35  ;;  %v699_v54 = vshrl.u32 %v8112_v7, 16  ;;  %v702_v55 = vshll.u32 %v8112_v7, 16  ;;  %v397_v24 = vld [vmem:[%s8005_s21 + $0x80] sm:$0xff]  ;;  %v983_v29 = vld [vmem:[#allocation2 + $0x48] sm:$0xf] }
  0xac   : > { %2280 = vmatprep.mubr.bf16.mxu0 %v8136_v42  ;;  %v1319_v52 = vor.u32 %v1318_v41, %v1314_v27  ;;  %v974_v53 = vsel %vm8065_vm9, %v689_v44, %v973_v37  ;;  %v1068_v57 = vld [vmem:[#allocation2 + $0x30] sm:$0xf]  ;;  %v693_v58 = vrot.slane %v691_v48, 7  ;;  %v501_v59 = vmax.f32 %v8100_v47, 0.0  ;;  %v7448_v37 = vld [vmem:[#allocation6 + $0x170] sm:$0xff]  }
  0xad   : > { %975 = vst [vmem:[#allocation2 + $0x38] sm:$0x1] %v974_v53  ;;  %v502_v60 = vmax.f32 %v8115_v9, 0.0  ;;  %v432_v61 = vmul.f32 %v8020_v39, %v393_v45  ;;  %v701_v1 = vrot.slane %v699_v54, 7  ;;  %v433_v2 = vmul.f32 %v8020_v39, %v394_v50  ;;  %v1118_v7 = vld [vmem:[#allocation2 + $0x30] sm:$0xe]  ;;  %6492 = vmatprep.subr.bf16.mxu0 %v7448_v37 }
  0xae   : > { %v8155_v63 = vsel %vm1276_vm0, %v1319_v52, %v1323_v43  ;;  %v434_v4 = vmul.f32 %v8020_v39, %v395_v51  ;;  %v696_v8 = vor.u32 %v694_v49, %v693_v58  ;;  %v697_v6 = vrot.slane %v693_v58, 4  ;;  %v987_v34 = vld [vmem:[#allocation2 + $0x50] sm:$0x1]  ;;  %v398_v53 = vld [vmem:[%s8005_s21 + $0x88] sm:$0xff]  ;;  %v7449_v54 = vld [vmem:[#allocation6 + $0x130] sm:$0xff]  }
  0xaf   : > { %v6201_v10 = vpack.c.bf16 %v501_v59, %v501_v59  ;;  %v6202_v47 = vpack.c.bf16 %v502_v60, %v502_v60  ;;  %v704_v9 = vor.u32 %v702_v55, %v701_v1  ;;  %v706_v11 = vrot.slane %v701_v1, 4  ;;  %v7450_v59 = vld [vmem:[#allocation6 + $0x1c0] sm:$0xff]   ;;  %6493 = vmatpush3.bf16.msra.mxu0 %v7449_v54 }
  0xb0   : > { %v471_v13 = vadd.f32 %v8025_v40, %v432_v61  ;;  %v8161_v14 = vadd.f32 %v8025_v40, %v433_v2  ;;  %2281 = vmatmul.mubr.bf16.gmra.mrb[8].mxu0 %v8105_v0  ;;  %v1069_v17 = vld [vmem:[#allocation2 + $0x34] sm:$0xf]  ;;  %v977_v18 = vsel %vm8058_vm8, %v696_v8, %v976_v56  ;;  %v435_v44 = vmul.f32 %v8020_v39, %v396_v15 }
  0xb1   : > { %v708_v19 = vshrl.u32 %v6201_v10, 16  ;;  %v711_v20 = vshll.u32 %v6201_v10, 16  ;;  %v716_v23 = vshrl.u32 %v6202_v47, 16  ;;  %2442 = vmatmul.mubr.bf16.gmra.mrb[8].mxu1 %v8132_v38  ;;  %2288 = vmatprep.mubr.bf16.mxu0 %v8155_v63  ;;  %v8170_v25 = vcombine.low %v1068_v57, %v1069_v17  ;;  %978 = vst [vmem:[#allocation2 + $0x3c] sm:$0xf] %v977_v18 }
  0xb2   : > { %v705_v26 = vsel %vm8051_vm7, %v697_v6, %v704_v9  ;;  %v5935_v27 = vcombine.low %v1118_v7, %v1069_v17  ;;  %v719_v28 = vshll.u32 %v6202_v47, 16  ;;  %v981_v31 = vsel %vm8065_vm9, %v706_v11, %v980_v12  ;;  %6592 = vmatprep.subr.bf16.mxu1 %v7450_v59  ;;  %v7451_v6 = vld [vmem:[#allocation6 + $0x180] sm:$0xff]  }
  0xb3   : > { %979 = vst [vmem:[#allocation2 + $0x40] sm:$0xf] %v705_v26  ;;  %v710_v32 = vrot.slane %v708_v19, 7  ;;  %v718_v33 = vrot.slane %v716_v23, 7  ;;  %v503_v35 = vmax.f32 %v471_v13, 0.0  ;;  %2449 = vmatprep.mubr.bf16.mxu1 %v8170_v25  ;;  %v1326_v43 = vshrl.u32 %v8170_v25, 16  ;;  %6593 = vmatpush3.bf16.msra.mxu1 %v7451_v6 }
  0xb4   : > { %v7417_v41 = vld [vmem:[#allocation2 + $0x38] ss:$0 sps:$4 sm:$0x11]   ;;  %982 = vst [vmem:[#allocation2 + $0x44] sm:$0x1] %v981_v31  ;;  %v473_v45 = vadd.f32 %v8025_v40, %v434_v4  ;;  %v436_v48 = vmul.f32 %v8020_v39, %v397_v24  ;;  %v1328_v49 = vshll.u32 %v8170_v25, 16  ;;  %v437_v17 = vmul.f32 %v8020_v39, %v398_v53 }
  0xb5   : > { %v1546_v50 = vrot.slane %v5935_v27, 1  ;;  %v713_v51 = vor.u32 %v711_v20, %v710_v32  ;;  %v714_v52 = vrot.slane %v710_v32, 4  ;;  %v1333_v55 = vshll.u32 %v7417_v41, 16  ;;  %v7452_v19 = vld [vmem:[#allocation6 + $0x1c8] sm:$0xff]  }
  0xb6   : > { %v1547_v56 = vrot.slane %v7417_v41, 1  ;;  %v721_v57 = vor.u32 %v719_v28, %v718_v33  ;;  %v723_v58 = vrot.slane %v718_v33, 4  ;;  %v1330_v60 = vrot.slane %v1328_v49, 1  ;;  %6594 = vmatprep.subr.bf16.mxu1 %v7452_v19  ;;  %v990_v41 = vld [vmem:[#allocation2 + $0x54] sm:$0xf] }
  0xb7   : > { %v984_v61 = vsel %vm8058_vm8, %v713_v51, %v983_v29  ;;  %v504_v62 = vmax.f32 %v8161_v14, 0.0  ;;  %v6203_v1 = vpack.c.bf16 %v503_v35, %v503_v35  ;;  %v1335_v2 = vrot.slane %v1333_v55, 1  ;;  %v994_v49 = vld [vmem:[#allocation2 + $0x5c] sm:$0x1]  ;;  %v400_v19 = vld [vmem:[%s8005_s21 + $0x98] sm:$0xff] }
  0xb8   : > { %v8187_v4 = vsel %vm1533_vm5, %v1546_v50, %v1547_v56  ;;  %v722_v5 = vsel %vm8051_vm7, %v714_v52, %v721_v57  ;;  %985 = vst [vmem:[#allocation2 + $0x48] sm:$0xf] %v984_v61  ;;  %v988_v8 = vsel %vm8065_vm9, %v723_v58, %v987_v34  ;;  %2289 = vmatmul.mubr.bf16.gmra.mrb[12].mxu0 %v8120_v16  ;;  %v1070_v10 = vld [vmem:[#allocation2 + $0x3c] sm:$0xf]  ;;  %v505_v15 = vmax.f32 %v473_v45, 0.0  ;;  %v7455_v61 = vld [vmem:[#allocation6 + $0x188] sm:$0xff]  }
  0xb9   : > { %v1331_v7 = vor.u32 %v1330_v60, %v1326_v43  ;;  %986 = vst [vmem:[#allocation2 + $0x4c] sm:$0xf] %v722_v5  ;;  %v1119_v47 = vld [vmem:[#allocation2 + $0x3c] sm:$0xe]  ;;  %989 = vst [vmem:[#allocation2 + $0x50] sm:$0x1] %v988_v8  ;;  %v6204_v9 = vpack.c.bf16 %v504_v62, %v504_v62  ;;  %2450 = vmatmul.mubr.bf16.gmra.mrb[12].mxu1 %v8140_v46  ;;  %v474_v14 = vadd.f32 %v8025_v40, %v435_v44 }
  0xba   : > { %v725_v11 = vshrl.u32 %v6203_v1, 16  ;;  %v728_v12 = vshll.u32 %v6203_v1, 16  ;;  %v1071_v13 = vld [vmem:[#allocation2 + $0x40] sm:$0xf]  ;;  %v8198_v18 = vadd.f32 %v8025_v40, %v436_v48  ;;  %v6205_v32 = vpack.c.bf16 %v505_v15, %v505_v15  ;;  %v1001_v15 = vld [vmem:[#allocation2 + $0x68] sm:$0x1]  ;;  %6595 = vmatpush3.bf16.msra.mxu1 %v7455_v61 }
  0xbb   : > { %v8201_v20 = vsel %vm1276_vm0, %v1331_v7, %v1335_v2  ;;  %v8203_v23 = vcombine.low %v1070_v10, %v1071_v13  ;;  %v7422_v24 = vld [vmem:[#allocation2 + $0x44] ss:$0 sps:$4 sm:$0x11]   ;;  %v5936_v26 = vcombine.low %v1119_v47, %v1071_v13  ;;  %v733_v28 = vshrl.u32 %v6204_v9, 16 }
  0xbc   : > { %v727_v27 = vrot.slane %v725_v11, 7  ;;  %2296 = vmatprep.mubr.bf16.mxu0 %v8201_v20  ;;  %v736_v29 = vshll.u32 %v6204_v9, 16  ;;  %v506_v31 = vmax.f32 %v474_v14, 0.0  ;;  %v1345_v35 = vshll.u32 %v7422_v24, 16  ;;  %v997_v14 = vld [vmem:[#allocation2 + $0x60] sm:$0xf] }
  0xbd   : > { %2457 = vmatprep.mubr.bf16.mxu1 %v8203_v23  ;;  %v1338_v33 = vshrl.u32 %v8203_v23, 16  ;;  %v1340_v34 = vshll.u32 %v8203_v23, 16  ;;  %v1549_v37 = vrot.slane %v5936_v26, 1  ;;  %v1550_v43 = vrot.slane %v7422_v24, 1  ;;  %v7456_v24 = vld [vmem:[#allocation6 + $0x1d0] sm:$0xff]  }
  0xbe   : > { %v730_v44 = vor.u32 %v728_v12, %v727_v27  ;;  %v731_v45 = vrot.slane %v727_v27, 4  ;;  %v735_v48 = vrot.slane %v733_v28, 7  ;;  %v1347_v51 = vrot.slane %v1345_v35, 1  ;;  %6596 = vmatprep.subr.bf16.mxu1 %v7456_v24  ;;  %v7464_v24 = vld [vmem:[#allocation6 + $0x138] sm:$0xff]  }
  0xbf   : > { %v1342_v50 = vrot.slane %v1340_v34, 1  ;;  %v1072_v52 = vld [vmem:[#allocation2 + $0x48] sm:$0xf]  ;;  %v6206_v54 = vpack.c.bf16 %v506_v31, %v506_v31  ;;  %v8210_v55 = vadd.f32 %v8025_v40, %v437_v17  ;;  %v8213_v57 = vsel %vm1533_vm5, %v1549_v37, %v1550_v43 }
  0xc0   : > { %v1120_v53 = vld [vmem:[#allocation2 + $0x48] sm:$0xe]  ;;  %v1073_v56 = vld [vmem:[#allocation2 + $0x4c] sm:$0xf]  ;;  %v738_v58 = vor.u32 %v736_v29, %v735_v48  ;;  %v991_v59 = vsel %vm8058_vm8, %v730_v44, %v990_v41  ;;  %v740_v60 = vrot.slane %v735_v48, 4  ;;  %2297 = vmatmul.mubr.bf16.gmra.mrb[16].mxu0 %v8170_v25  ;;  %v742_v8 = vshrl.u32 %v6205_v32, 16 }
  0xc1   : > { %v1343_v62 = vor.u32 %v1342_v50, %v1338_v33  ;;  %v8218_v1 = vcombine.low %v1072_v52, %v1073_v56  ;;  %v7424_v2 = vld [vmem:[#allocation2 + $0x50] ss:$0 sps:$4 sm:$0x11]   ;;  %992 = vst [vmem:[#allocation2 + $0x54] sm:$0xf] %v991_v59  ;;  %v5937_v5 = vcombine.low %v1120_v53, %v1073_v56  ;;  %2458 = vmatmul.mubr.bf16.gmra.mrb[16].mxu1 %v8187_v4  ;;  %v745_v10 = vshll.u32 %v6205_v32, 16 }
  0xc2   : > { %v739_v6 = vsel %vm8051_vm7, %v731_v45, %v738_v58  ;;  %v995_v7 = vsel %vm8065_vm9, %v740_v60, %v994_v49  ;;  %v750_v47 = vshrl.u32 %v6206_v54, 16  ;;  %v1357_v13 = vshll.u32 %v7424_v2, 16  ;;  %v399_v17 = vld [vmem:[%s8005_s21 + $0x90] sm:$0xff]  ;;  %v7458_v45 = vld [vmem:[#allocation6 + $0x1d8] sm:$0xff]   ;;  %v401_v52 = vld [vmem:[%s8005_s21 + $0xa0] sm:$0xff] }
  0xc3   : > { %v8226_v9 = vsel %vm1276_vm0, %v1343_v62, %v1347_v51  ;;  %2465 = vmatprep.mubr.bf16.mxu1 %v8218_v1  ;;  %v1350_v11 = vshrl.u32 %v8218_v1, 16  ;;  %v1352_v12 = vshll.u32 %v8218_v1, 16  ;;  %993 = vst [vmem:[#allocation2 + $0x58] sm:$0xf] %v739_v6  ;;  %996 = vst [vmem:[#allocation2 + $0x5c] sm:$0x1] %v995_v7  ;;  %v438_v58 = vmul.f32 %v8020_v39, %v399_v17 }
  0xc4   : > { %2304 = vmatprep.mubr.bf16.mxu0 %v8226_v9  ;;  %v1552_v26 = vrot.slane %v5937_v5, 1  ;;  %v1553_v27 = vrot.slane %v7424_v2, 1  ;;  %v744_v28 = vrot.slane %v742_v8, 7  ;;  %v752_v29 = vrot.slane %v750_v47, 7  ;;  %v7457_v44 = vld [vmem:[#allocation6 + $0x190] sm:$0xff]   ;;  %v402_v2 = vld [vmem:[%s8005_s21 + $0xa8] sm:$0xff] }
  0xc5   : > { %v1354_v31 = vrot.slane %v1352_v12, 1  ;;  %v1359_v32 = vrot.slane %v1357_v13, 1  ;;  %v753_v33 = vshll.u32 %v6206_v54, 16  ;;  %v507_v34 = vmax.f32 %v8198_v18, 0.0  ;;  %6597 = vmatpush3.bf16.msra.mxu1 %v7457_v44  ;;  %v7461_v5 = vld [vmem:[#allocation6 + $0x198] sm:$0xff]  }
  0xc6   : > { %v8236_v35 = vsel %vm1533_vm5, %v1552_v26, %v1553_v27  ;;  %v747_v37 = vor.u32 %v745_v10, %v744_v28  ;;  %v748_v41 = vrot.slane %v744_v28, 4  ;;  %v757_v43 = vrot.slane %v752_v29, 4  ;;  %6598 = vmatprep.subr.bf16.mxu1 %v7458_v45 }
  0xc7   : > { %v1355_v48 = vor.u32 %v1354_v31, %v1350_v11  ;;  %v755_v49 = vor.u32 %v753_v33, %v752_v29  ;;  %v508_v50 = vmax.f32 %v8210_v55, 0.0  ;;  %v6207_v51 = vpack.c.bf16 %v507_v34, %v507_v34  ;;  %v7463_v11 = vld [vmem:[#allocation6 + $0x178] sm:$0xff]   ;;  %v403_v31 = vld [vmem:[%s8005_s21 + $0xb0] sm:$0xff] }
  0xc8   : > { %v1074_v53 = vld [vmem:[#allocation2 + $0x54] sm:$0xf]  ;;  %v998_v18 = vsel %vm8058_vm8, %v747_v37, %v997_v14  ;;  %v1002_v56 = vsel %vm8065_vm9, %v757_v43, %v1001_v15  ;;  %v439_v59 = vmul.f32 %v8020_v39, %v400_v19  ;;  %2305 = vmatmul.mubr.bf16.gmra.mrb[20].mxu0 %v8203_v23  ;;  %v477_v7 = vadd.f32 %v8025_v40, %v438_v58  ;;  %v1004_v19 = vld [vmem:[#allocation2 + $0x6c] sm:$0xf] }
  0xc9   : > { %v1121_v54 = vld [vmem:[#allocation2 + $0x54] sm:$0xe]  ;;  %v8248_v55 = vsel %vm1276_vm0, %v1355_v48, %v1359_v32  ;;  %v756_v60 = vsel %vm8051_vm7, %v748_v41, %v755_v49  ;;  %999 = vst [vmem:[#allocation2 + $0x60] sm:$0xf] %v998_v18  ;;  %1003 = vst [vmem:[#allocation2 + $0x68] sm:$0x1] %v1002_v56  ;;  %v6208_v61 = vpack.c.bf16 %v508_v50, %v508_v50  ;;  %2466 = vmatmul.mubr.bf16.gmra.mrb[20].mxu1 %v8213_v57 }
  0xca   : > { %v759_v62 = vshrl.u32 %v6207_v51, 16  ;;  %2312 = vmatprep.mubr.bf16.mxu0 %v8248_v55  ;;  %v1075_v8 = vld [vmem:[#allocation2 + $0x58] sm:$0xf]  ;;  %1000 = vst [vmem:[#allocation2 + $0x64] sm:$0xf] %v756_v60  ;;  %v762_v6 = vshll.u32 %v6207_v51, 16  ;;  %v478_v10 = vadd.f32 %v8025_v40, %v439_v59  ;;  %v440_v47 = vmul.f32 %v8020_v39, %v401_v52  ;;  %6599 = vmatpush3.bf16.msra.mxu1 %v7461_v5 }
  0xcb   : > { %v8258_v12 = vcombine.low %v1074_v53, %v1075_v8  ;;  %v7429_v13 = vld [vmem:[#allocation2 + $0x5c] ss:$0 sps:$4 sm:$0x11]   ;;  %v5938_v14 = vcombine.low %v1121_v54, %v1075_v8  ;;  %v767_v17 = vshrl.u32 %v6208_v61, 16  ;;  %v770_v26 = vshll.u32 %v6208_v61, 16  ;;  %6494 = vmatprep.subr.bf16.mxu0 %v7463_v11 }
  0xcc   : > { %v761_v15 = vrot.slane %v759_v62, 7  ;;  %v509_v27 = vmax.f32 %v477_v7, 0.0  ;;  %v510_v28 = vmax.f32 %v478_v10, 0.0  ;;  %v441_v29 = vmul.f32 %v8020_v39, %v402_v2  ;;  %v7465_v40 = vld [vmem:[#allocation6 + $0x1e0] sm:$0xff]   ;;  %6495 = vmatpush3.bf16.msra.mxu0 %v7464_v24  ;;  %v1008_v48 = vld [vmem:[#allocation2 + $0x74] sm:$0x1] }
  0xcd   : > { %2473 = vmatprep.mubr.bf16.mxu1 %v8258_v12  ;;  %v1362_v32 = vshrl.u32 %v8258_v12, 16  ;;  %v1364_v33 = vshll.u32 %v8258_v12, 16  ;;  %v1369_v34 = vshll.u32 %v7429_v13, 16  ;;  %v1555_v37 = vrot.slane %v5938_v14, 1  ;;  %6600 = vmatprep.subr.bf16.mxu1 %v7465_v40  ;;  %v7466_v39 = vld [vmem:[#allocation6 + $0x1a0] sm:$0xff]   ;;  %v404_v14 = vld [vmem:[%s8005_s21 + $0xb8] sm:$0xff] }
  0xce   : > { %v1556_v41 = vrot.slane %v7429_v13, 1  ;;  %v764_v43 = vor.u32 %v762_v6, %v761_v15  ;;  %v765_v44 = vrot.slane %v761_v15, 4  ;;  %v769_v45 = vrot.slane %v767_v17, 7  ;;  %v8273_v59 = vld [vmem:[%s9798_s2] ss:$0 sm:$0xff]  ;;  %6601 = vmatpush3.bf16.msra.mxu1 %v7466_v39 }
  0xcf   : > { %v1366_v49 = vrot.slane %v1364_v33, 1  ;;  %v1371_v50 = vrot.slane %v1369_v34, 1  ;;  %v6209_v51 = vpack.c.bf16 %v509_v27, %v509_v27  ;;  %v6210_v52 = vpack.c.bf16 %v510_v28, %v510_v28  ;;  %v8281_v6 = vld [vmem:[%s9797_s1] ss:$0 sm:$0xff]  ;;  %v405_v27 = vld [vmem:[%s8005_s21 + $0xc0] sm:$0xff] }
  0xd0   : > { %v1076_v53 = vld [vmem:[#allocation2 + $0x60] sm:$0xf]  ;;  %v8266_v18 = vsel %vm1533_vm5, %v1555_v37, %v1556_v41  ;;  %v772_v54 = vor.u32 %v770_v26, %v769_v45  ;;  %v1005_v56 = vsel %vm8058_vm8, %v764_v43, %v1004_v19  ;;  %v479_v60 = vadd.f32 %v8273_v59, %v440_v47  ;;  %2313 = vmatmul.mubr.bf16.gmra.mrb[24].mxu0 %v8218_v1  ;;  %v7431_v2 = vld [vmem:[#allocation2 + $0x68] ss:$0 sps:$4 sm:$0x11]  }
  0xd1   : > { %v1122_v58 = vld [vmem:[#allocation2 + $0x60] sm:$0xe]  ;;  %v1367_v61 = vor.u32 %v1366_v49, %v1362_v32  ;;  %v1077_v62 = vld [vmem:[#allocation2 + $0x64] sm:$0xf]  ;;  %1006 = vst [vmem:[#allocation2 + $0x6c] sm:$0xf] %v1005_v56  ;;  %v480_v8 = vadd.f32 %v8273_v59, %v441_v29  ;;  %v442_v7 = vmul.f32 %v8281_v6, %v403_v31  ;;  %2474 = vmatmul.mubr.bf16.gmra.mrb[24].mxu1 %v8236_v35 }
  0xd2   : > { %v774_v5 = vrot.slane %v769_v45, 4  ;;  %v8285_v10 = vcombine.low %v1076_v53, %v1077_v62  ;;  %v773_v47 = vsel %vm8051_vm7, %v765_v44, %v772_v54  ;;  %v5939_v11 = vcombine.low %v1122_v58, %v1077_v62  ;;  %v7467_v15 = vld [vmem:[#allocation6 + $0x1e8] sm:$0xff]   ;;  %v1011_v45 = vld [vmem:[#allocation2 + $0x78] sm:$0xf] }
  0xd3   : > { %v776_v13 = vshrl.u32 %v6209_v51, 16  ;;  %v8291_v17 = vsel %vm1276_vm0, %v1367_v61, %v1371_v50  ;;  %v1381_v19 = vshll.u32 %v7431_v2, 16  ;;  %1007 = vst [vmem:[#allocation2 + $0x70] sm:$0xf] %v773_v47  ;;  %v1559_v24 = vrot.slane %v7431_v2, 1  ;;  %6602 = vmatprep.subr.bf16.mxu1 %v7467_v15  ;;  %v7470_v56 = vld [vmem:[#allocation6 + $0x1a8] sm:$0xff]  }
  0xd4   : > { %v1009_v26 = vsel %vm8065_vm9, %v774_v5, %v1008_v48  ;;  %2320 = vmatprep.mubr.bf16.mxu0 %v8291_v17  ;;  %2481 = vmatprep.mubr.bf16.mxu1 %v8285_v10  ;;  %v1374_v28 = vshrl.u32 %v8285_v10, 16  ;;  %v1376_v29 = vshll.u32 %v8285_v10, 16  ;;  %v1558_v31 = vrot.slane %v5939_v11, 1  ;;  %v1015_v50 = vld [vmem:[#allocation2 + $0x80] sm:$0x1]  ;;  %v7471_v11 = vld [vmem:[#allocation6 + $0x1f0] sm:$0xff]  }
  0xd5   : > { %1010 = vst [vmem:[#allocation2 + $0x74] sm:$0x1] %v1009_v26  ;;  %v778_v40 = vrot.slane %v776_v13, 7  ;;  %v1383_v32 = vrot.slane %v1381_v19, 1  ;;  %v779_v33 = vshll.u32 %v6209_v51, 16  ;;  %v784_v34 = vshrl.u32 %v6210_v52, 16  ;;  %6603 = vmatpush3.bf16.msra.mxu1 %v7470_v56 }
  0xd6   : > { %v787_v37 = vshll.u32 %v6210_v52, 16  ;;  %v1378_v41 = vrot.slane %v1376_v29, 1  ;;  %v8301_v43 = vsel %vm1533_vm5, %v1558_v31, %v1559_v24  ;;  %v511_v48 = vmax.f32 %v479_v60, 0.0  ;;  %v1018_v31 = vld [vmem:[#allocation2 + $0x84] sm:$0xf]  ;;  %6604 = vmatprep.subr.bf16.mxu1 %v7471_v11 }
  0xd7   : > { %v782_v44 = vrot.slane %v778_v40, 4  ;;  %v781_v39 = vor.u32 %v779_v33, %v778_v40  ;;  %v786_v49 = vrot.slane %v784_v34, 7  ;;  %v512_v53 = vmax.f32 %v480_v8, 0.0  ;;  %v7472_v40 = vld [vmem:[#allocation6 + $0x1b0] sm:$0xff]  }
  0xd8   : > { %v443_v54 = vmul.f32 %v8281_v6, %v404_v14  ;;  %v1379_v58 = vor.u32 %v1378_v41, %v1374_v28  ;;  %v1078_v61 = vld [vmem:[#allocation2 + $0x6c] sm:$0xf]  ;;  %v6211_v62 = vpack.c.bf16 %v511_v48, %v511_v48  ;;  %v481_v52 = vadd.f32 %v8273_v59, %v442_v7  ;;  %2321 = vmatmul.mubr.bf16.gmra.mrb[28].mxu0 %v8258_v12 }
  0xd9   : > { %v1123_v51 = vld [vmem:[#allocation2 + $0x6c] sm:$0xe]  ;;  %v8306_v2 = vmul.f32 %v8281_v6, %v405_v27  ;;  %v789_v5 = vor.u32 %v787_v37, %v786_v49  ;;  %v1012_v60 = vsel %vm8058_vm8, %v781_v39, %v1011_v45  ;;  %v791_v47 = vrot.slane %v786_v49, 4  ;;  %2482 = vmatmul.mubr.bf16.gmra.mrb[28].mxu1 %v8266_v18  ;;  %v1022_v39 = vld [vmem:[#allocation2 + $0x8c] sm:$0x1]  ;;  %v406_v49 = vld [vmem:[%s8005_s21 + $0xc8] sm:$0xff] }
  0xda   : > { %v6212_v8 = vpack.c.bf16 %v512_v53, %v512_v53  ;;  %v8313_v13 = vsel %vm1276_vm0, %v1379_v58, %v1383_v32  ;;  %v1079_v14 = vld [vmem:[#allocation2 + $0x70] sm:$0xf]  ;;  %1013 = vst [vmem:[#allocation2 + $0x78] sm:$0xf] %v1012_v60  ;;  %v793_v7 = vshrl.u32 %v6211_v62, 16  ;;  %v796_v15 = vshll.u32 %v6211_v62, 16  ;;  %6605 = vmatpush3.bf16.msra.mxu1 %v7472_v40 }
  0xdb   : > { %v482_v19 = vadd.f32 %v8273_v59, %v443_v54  ;;  %2328 = vmatprep.mubr.bf16.mxu0 %v8313_v13  ;;  %v8317_v24 = vcombine.low %v1078_v61, %v1079_v14  ;;  %v790_v27 = vsel %vm8051_vm7, %v782_v44, %v789_v5  ;;  %v5940_v28 = vcombine.low %v1123_v51, %v1079_v14  ;;  %v407_v58 = vld [vmem:[%s8005_s21 + $0xd0] sm:$0xff]  ;;  %v7473_v61 = vld [vmem:[#allocation6 + $0x1f8] sm:$0xff]  }
  0xdc   : > { %v7436_v26 = vld [vmem:[#allocation2 + $0x74] ss:$0 sps:$4 sm:$0x11]   ;;  %v1016_v29 = vsel %vm8065_vm9, %v791_v47, %v1015_v50  ;;  %1014 = vst [vmem:[#allocation2 + $0x7c] sm:$0xf] %v790_v27  ;;  %v795_v32 = vrot.slane %v793_v7, 7  ;;  %6606 = vmatprep.subr.bf16.mxu1 %v7473_v61 }
  0xdd   : > { %9833 = vst [vmem:[#allocation13_spill] sm:$0xff] %v8317_v24  ;;  %1017 = vst [vmem:[#allocation2 + $0x80] sm:$0x1] %v1016_v29  ;;  %v801_v33 = vshrl.u32 %v6212_v8, 16  ;;  %v804_v34 = vshll.u32 %v6212_v8, 16  ;;  %v513_v37 = vmax.f32 %v481_v52, 0.0  ;;  %2489 = vmatprep.mubr.bf16.mxu1 %v8317_v24 }
  0xde   : > { %v1386_v41 = vshrl.u32 %v8317_v24, 16  ;;  %v1388_v44 = vshll.u32 %v8317_v24, 16  ;;  %v1393_v45 = vshll.u32 %v7436_v26, 16  ;;  %v1561_v48 = vrot.slane %v5940_v28, 1  ;;  %v7474_v60 = vld [vmem:[#allocation6 + $0x1b8] sm:$0xff]   ;;  %v8333_v7 = vld [vmem:[#allocation6 + $0x200] sm:$0xff]  }
  0xdf   : > { %v1562_v50 = vrot.slane %v7436_v26, 1  ;;  %v798_v53 = vor.u32 %v796_v15, %v795_v32  ;;  %v799_v54 = vrot.slane %v795_v32, 4  ;;  %v803_v56 = vrot.slane %v801_v33, 7  ;;  %6607 = vmatpush3.bf16.msra.mxu1 %v7474_v60  ;;  %v1025_v32 = vld [vmem:[#allocation2 + $0x90] sm:$0xf]  ;;  %7200 = vmatprep.subr.bf16.mxu0 %v8333_v7 }
  0xe0   : > { %v1390_v51 = vrot.slane %v1388_v44, 1  ;;  %v1395_v62 = vrot.slane %v1393_v45, 1  ;;  %v514_v52 = vmax.f32 %v482_v19, 0.0  ;;  %v6213_v5 = vpack.c.bf16 %v513_v37, %v513_v37  ;;  %2329 = vmatmul.mubr.bf16.gmra.mrb[32].mxu0 %v8285_v10 }
  0xe1   : > { %v8329_v47 = vsel %vm1533_vm5, %v1561_v48, %v1562_v50  ;;  %v806_v8 = vor.u32 %v804_v34, %v803_v56  ;;  %v1019_v11 = vsel %vm8058_vm8, %v798_v53, %v1018_v31  ;;  %v808_v14 = vrot.slane %v803_v56, 4  ;;  %v1080_v26 = vld [vmem:[#allocation2 + $0x78] sm:$0xf]  ;;  %2490 = vmatmul.mubr.bf16.gmra.mrb[32].mxu1 %v8301_v43 }
  0xe2   : > { %9834 = vst [vmem:[#allocation14_spill] sm:$0xff] %v8329_v47  ;;  %v1391_v15 = vor.u32 %v1390_v51, %v1386_v41  ;;  %1020 = vst [vmem:[#allocation2 + $0x84] sm:$0xf] %v1019_v11  ;;  %v1124_v27 = vld [vmem:[#allocation2 + $0x78] sm:$0xe]  ;;  %v6214_v19 = vpack.c.bf16 %v514_v52, %v514_v52  ;;  %v810_v28 = vshrl.u32 %v6213_v5, 16  ;;  %v445_v33 = vmul.f32 %v8281_v6, %v406_v49 }
  0xe3   : > { %v813_v29 = vshll.u32 %v6213_v5, 16  ;;  %v807_v40 = vsel %vm8051_vm7, %v799_v54, %v806_v8  ;;  %v1023_v31 = vsel %vm8065_vm9, %v808_v14, %v1022_v39  ;;  %v483_v34 = vadd.f32 %v8273_v59, %v8306_v2  ;;  %v1081_v41 = vld [vmem:[#allocation2 + $0x7c] sm:$0xf]  ;;  %v1029_v53 = vld [vmem:[#allocation2 + $0x98] sm:$0x1]  ;;  %v408_v52 = vld [vmem:[%s8005_s21 + $0xd8] sm:$0xff] }
  0xe4   : > { %v8345_v37 = vsel %vm1276_vm0, %v1391_v15, %v1395_v62  ;;  %1021 = vst [vmem:[#allocation2 + $0x88] sm:$0xf] %v807_v40  ;;  %1024 = vst [vmem:[#allocation2 + $0x8c] sm:$0x1] %v1023_v31  ;;  %v812_v44 = vrot.slane %v810_v28, 7  ;;  %v818_v45 = vshrl.u32 %v6214_v19, 16  ;;  %v446_v48 = vmul.f32 %v8281_v6, %v407_v58 }
  0xe5   : > { %2336 = vmatprep.mubr.bf16.mxu0 %v8345_v37  ;;  %v8350_v39 = vcombine.low %v1080_v26, %v1081_v41  ;;  %v7438_v49 = vld [vmem:[#allocation2 + $0x80] ss:$0 sps:$4 sm:$0x11]   ;;  %v5941_v50 = vcombine.low %v1124_v27, %v1081_v41  ;;  %v821_v2 = vshll.u32 %v6214_v19, 16  ;;  %v484_v54 = vadd.f32 %v8273_v59, %v445_v33 }
  0xe6   : > { %v815_v56 = vor.u32 %v813_v29, %v812_v44  ;;  %v816_v61 = vrot.slane %v812_v44, 4  ;;  %v820_v51 = vrot.slane %v818_v45, 7  ;;  %v515_v62 = vmax.f32 %v483_v34, 0.0  ;;  %v409_v44 = vld [vmem:[%s8005_s21 + $0xe0] sm:$0xff] }
  0xe7   : > { %9835 = vst [vmem:[#allocation15_spill] sm:$0xff] %v8350_v39  ;;  %2497 = vmatprep.mubr.bf16.mxu1 %v8350_v39  ;;  %v1398_v58 = vshrl.u32 %v8350_v39, 16  ;;  %v1400_v5 = vshll.u32 %v8350_v39, 16  ;;  %v1405_v60 = vshll.u32 %v7438_v49, 16  ;;  %v1564_v8 = vrot.slane %v5941_v50, 1 }
  0xe8   : > { %v1565_v11 = vrot.slane %v7438_v49, 1  ;;  %v823_v14 = vor.u32 %v821_v2, %v820_v51  ;;  %v1026_v15 = vsel %vm8058_vm8, %v815_v56, %v1025_v32  ;;  %v825_v26 = vrot.slane %v820_v51, 4  ;;  %2337 = vmatmul.mubr.bf16.gmra.mrb[36].mxu0 %v8317_v24 }
  0xe9   : > { %v1402_v27 = vrot.slane %v1400_v5, 1  ;;  %v1407_v19 = vrot.slane %v1405_v60, 1  ;;  %v1082_v28 = vld [vmem:[#allocation2 + $0x84] sm:$0xf]  ;;  %1027 = vst [vmem:[#allocation2 + $0x90] sm:$0xf] %v1026_v15  ;;  %v6215_v40 = vpack.c.bf16 %v515_v62, %v515_v62  ;;  %v447_v31 = vmul.f32 %v8281_v6, %v408_v52  ;;  %2498 = vmatmul.mubr.bf16.gmra.mrb[36].mxu1 %v8329_v47 }
  0xea   : > { %v1125_v29 = vld [vmem:[#allocation2 + $0x84] sm:$0xe]  ;;  %v824_v33 = vsel %vm8051_vm7, %v816_v61, %v823_v14  ;;  %v1030_v34 = vsel %vm8065_vm9, %v825_v26, %v1029_v53  ;;  %v516_v41 = vmax.f32 %v484_v54, 0.0  ;;  %v485_v2 = vadd.f32 %v8273_v59, %v446_v48  ;;  %v1032_v52 = vld [vmem:[#allocation2 + $0x9c] sm:$0xf] }
  0xeb   : > { %v1403_v32 = vor.u32 %v1402_v27, %v1398_v58  ;;  %v1083_v45 = vld [vmem:[#allocation2 + $0x88] sm:$0xf]  ;;  %1028 = vst [vmem:[#allocation2 + $0x94] sm:$0xf] %v824_v33  ;;  %1031 = vst [vmem:[#allocation2 + $0x98] sm:$0x1] %v1030_v34  ;;  %v486_v53 = vadd.f32 %v8273_v59, %v447_v31  ;;  %v8375_v58 = vsel %vm1533_vm5, %v1564_v8, %v1565_v11 }
  0xec   : > { %v827_v49 = vshrl.u32 %v6215_v40, 16  ;;  %v830_v50 = vshll.u32 %v6215_v40, 16  ;;  %v8368_v56 = vcombine.low %v1082_v28, %v1083_v45  ;;  %v7443_v51 = vld [vmem:[#allocation2 + $0x8c] ss:$0 sps:$4 sm:$0x11]   ;;  %v5942_v62 = vcombine.low %v1125_v29, %v1083_v45  ;;  %9837 = vst [vmem:[#allocation17_spill] sm:$0xff] %v8375_v58 }
  0xed   : > { %v6216_v61 = vpack.c.bf16 %v516_v41, %v516_v41  ;;  %v8372_v54 = vsel %vm1276_vm0, %v1403_v32, %v1407_v19  ;;  %v517_v60 = vmax.f32 %v485_v2, 0.0  ;;  %v1417_v15 = vshll.u32 %v7443_v51, 16  ;;  %v410_v40 = vld [vmem:[%s8005_s21 + $0xe8] sm:$0xff] }
  0xee   : > { %9836 = vst [vmem:[#allocation16_spill] sm:$0xff] %v8372_v54  ;;  %v829_v5 = vrot.slane %v827_v49, 7  ;;  %2344 = vmatprep.mubr.bf16.mxu0 %v8372_v54  ;;  %2505 = vmatprep.mubr.bf16.mxu1 %v8368_v56  ;;  %v1410_v48 = vshrl.u32 %v8368_v56, 16  ;;  %v1412_v14 = vshll.u32 %v8368_v56, 16  ;;  %v448_v26 = vmul.f32 %v8281_v6, %v409_v44 }
  0xef   : > { %v1567_v27 = vrot.slane %v5942_v62, 1  ;;  %v1568_v28 = vrot.slane %v7443_v51, 1  ;;  %v835_v29 = vshrl.u32 %v6216_v61, 16  ;;  %v1419_v11 = vrot.slane %v1417_v15, 1 }
  0xf0   : > { %v832_v19 = vor.u32 %v830_v50, %v829_v5  ;;  %v1414_v8 = vrot.slane %v1412_v14, 1  ;;  %v1084_v31 = vld [vmem:[#allocation2 + $0x90] sm:$0xf]  ;;  %v838_v33 = vshll.u32 %v6216_v61, 16  ;;  %v518_v34 = vmax.f32 %v486_v53, 0.0  ;;  %2345 = vmatmul.mubr.bf16.gmra.mrb[40].mxu0 %v8350_v39 }
  0xf1   : > { %v833_v41 = vrot.slane %v829_v5, 4  ;;  %v837_v32 = vrot.slane %v835_v29, 7  ;;  %v1126_v49 = vld [vmem:[#allocation2 + $0x90] sm:$0xe]  ;;  %v6217_v2 = vpack.c.bf16 %v517_v60, %v517_v60  ;;  %v1036_v50 = vld [vmem:[#allocation2 + $0xa4] sm:$0x1]  ;;  %v449_v14 = vmul.f32 %v8281_v6, %v410_v40  ;;  %2506 = vmatmul.mubr.bf16.gmra.mrb[40].mxu1 %v8375_v58 }
  0xf2   : > { %v1033_v45 = vsel %vm8058_vm8, %v832_v19, %v1032_v52  ;;  %v1415_v44 = vor.u32 %v1414_v8, %v1410_v48  ;;  %v1085_v62 = vld [vmem:[#allocation2 + $0x94] sm:$0xf]  ;;  %v6218_v51 = vpack.c.bf16 %v518_v34, %v518_v34  ;;  %v487_v15 = vadd.f32 %v8273_v59, %v448_v26  ;;  %v8391_v53 = vld [vmem:[#allocation2 + $0x98] ss:$0 sps:$4 sm:$0x11]  }
  0xf3   : > { %1034 = vst [vmem:[#allocation2 + $0x9c] sm:$0xf] %v1033_v45  ;;  %v8389_v61 = vcombine.low %v1084_v31, %v1085_v62  ;;  %v840_v52 = vor.u32 %v838_v33, %v837_v32  ;;  %v5943_v5 = vcombine.low %v1126_v49, %v1085_v62  ;;  %v842_v60 = vrot.slane %v837_v32, 4  ;;  %v412_v62 = vld [vmem:[%s8005_s21 + $0xf8] sm:$0xff] }
  0xf4   : > { %v8394_v19 = vsel %vm1276_vm0, %v1415_v44, %v1419_v11  ;;  %v844_v48 = vshrl.u32 %v6217_v2, 16  ;;  %v847_v29 = vshll.u32 %v6217_v2, 16  ;;  %v852_v8 = vshrl.u32 %v6218_v51, 16  ;;  %v1039_v11 = vld [vmem:[#allocation2 + $0xa8] sm:$0xf] }
  0xf5   : > { %9838 = vst [vmem:[#allocation18_spill] sm:$0xff] %v8394_v19  ;;  %2352 = vmatprep.mubr.bf16.mxu0 %v8394_v19  ;;  %2513 = vmatprep.mubr.bf16.mxu1 %v8389_v61  ;;  %v1422_v26 = vshrl.u32 %v8389_v61, 16  ;;  %v1424_v40 = vshll.u32 %v8389_v61, 16  ;;  %v1429_v31 = vshll.u32 %v8391_v53, 16  ;;  %v841_v33 = vsel %vm8051_vm7, %v833_v41, %v840_v52  ;;  %v1043_v2 = vld [vmem:[#allocation2 + $0xb0] sm:$0x1] }
  0xf6   : > { %v8404_v34 = vsel %vm1533_vm5, %v1567_v27, %v1568_v28  ;;  %1035 = vst [vmem:[#allocation2 + $0xa0] sm:$0xf] %v841_v33  ;;  %v1570_v32 = vrot.slane %v5943_v5, 1  ;;  %v1037_v45 = vsel %vm8065_vm9, %v842_v60, %v1036_v50  ;;  %v846_v49 = vrot.slane %v844_v48, 7  ;;  %v411_v44 = vld [vmem:[%s8005_s21 + $0xf0] sm:$0xff] }
  0xf7   : > { %v1426_v19 = vrot.slane %v1424_v40, 1  ;;  %v1431_v58 = vrot.slane %v1429_v31, 1  ;;  %1038 = vst [vmem:[#allocation2 + $0xa4] sm:$0x1] %v1037_v45  ;;  %v854_v39 = vrot.slane %v852_v8, 7  ;;  %v855_v54 = vshll.u32 %v6218_v51, 16 }
  0xf8   : > { %v1571_v41 = vrot.slane %v8391_v53, 1  ;;  %v849_v52 = vor.u32 %v847_v29, %v846_v49  ;;  %v850_v47 = vrot.slane %v846_v49, 4  ;;  %v488_v27 = vadd.f32 %v8273_v59, %v449_v14  ;;  %2353 = vmatmul.mubr.bf16.gmra.mrb[44].mxu0 %v8368_v56  ;;  %v1046_v49 = vld [vmem:[#allocation2 + $0xb4] sm:$0xf] }
  0xf9   : > { %v1427_v28 = vor.u32 %v1426_v19, %v1422_v26  ;;  %v857_v33 = vor.u32 %v855_v54, %v854_v39  ;;  %v859_v50 = vrot.slane %v854_v39, 4  ;;  %v519_v60 = vmax.f32 %v487_v15, 0.0  ;;  %2514 = vmatmul.mubr.bf16.gmra.mrb[44].mxu1 %v8404_v34 }
  0xfa   : > { %v1086_v5 = vld [vmem:[#allocation2 + $0x9c] sm:$0xf]  ;;  %v1040_v48 = vsel %vm8058_vm8, %v849_v52, %v1039_v11  ;;  %v520_v40 = vmax.f32 %v488_v27, 0.0  ;;  %v450_v51 = vmul.f32 %v8281_v6, %v411_v44  ;;  %v451_v53 = vmul.f32 %v8281_v6, %v412_v62 }
  0xfb   : > { %v1127_v24 = vld [vmem:[#allocation2 + $0x9c] sm:$0xe]  ;;  %v8419_v14 = vsel %vm1276_vm0, %v1427_v28, %v1431_v58  ;;  %v858_v54 = vsel %vm8051_vm7, %v850_v47, %v857_v33  ;;  %1041 = vst [vmem:[#allocation2 + $0xa8] sm:$0xf] %v1040_v48  ;;  %v1044_v39 = vsel %vm8065_vm9, %v859_v50, %v1043_v2  ;;  %v6219_v15 = vpack.c.bf16 %v519_v60, %v519_v60 }
  0xfc   : > { %2360 = vmatprep.mubr.bf16.mxu0 %v8419_v14  ;;  %1042 = vst [vmem:[#allocation2 + $0xac] sm:$0xf] %v858_v54  ;;  %1045 = vst [vmem:[#allocation2 + $0xb0] sm:$0x1] %v1044_v39  ;;  %v6220_v19 = vpack.c.bf16 %v520_v40, %v520_v40  ;;  %v489_v6 = vadd.f32 %v8273_v59, %v450_v51  ;;  %v490_v29 = vadd.f32 %v8273_v59, %v451_v53 }
  0xfd   : > { %v1087_v8 = vld [vmem:[#allocation2 + $0xa0] sm:$0xf]  ;;  %v861_v58 = vshrl.u32 %v6219_v15, 16  ;;  %v864_v26 = vshll.u32 %v6219_v15, 16  ;;  %v8432_v27 = vsel %vm1533_vm5, %v1570_v32, %v1571_v41 }
  0xfe   : > { %v8428_v31 = vcombine.low %v1086_v5, %v1087_v8  ;;  %v7453_v47 = vld [vmem:[#allocation2 + $0xa4] ss:$0 sps:$4 sm:$0x11]   ;;  %v5944_v11 = vcombine.low %v1127_v24, %v1087_v8  ;;  %v869_v45 = vshrl.u32 %v6220_v19, 16  ;;  %v872_v44 = vshll.u32 %v6220_v19, 16 }
  0xff   : > { %v863_v2 = vrot.slane %v861_v58, 7  ;;  %v521_v62 = vmax.f32 %v489_v6, 0.0  ;;  %v522_v52 = vmax.f32 %v490_v29, 0.0  ;;  %v1441_v33 = vshll.u32 %v7453_v47, 16  ;;  %v1050_v5 = vld [vmem:[#allocation2 + $0xbc] sm:$0x1] }
 0x100   : > { %2521 = vmatprep.mubr.bf16.mxu1 %v8428_v31  ;;  %v1434_v59 = vshrl.u32 %v8428_v31, 16  ;;  %v1436_v28 = vshll.u32 %v8428_v31, 16  ;;  %v1573_v50 = vrot.slane %v5944_v11, 1  ;;  %v871_v48 = vrot.slane %v869_v45, 7  ;;  %2361 = vmatmul.mubr.bf16.gmra.mrb[48].mxu0 %v8389_v61 }
 0x101   : > { %v866_v60 = vor.u32 %v864_v26, %v863_v2  ;;  %v867_v24 = vrot.slane %v863_v2, 4  ;;  %v1443_v51 = vrot.slane %v1441_v33, 1  ;;  %v6221_v39 = vpack.c.bf16 %v521_v62, %v521_v62  ;;  %2522 = vmatmul.mubr.bf16.gmra.mrb[48].mxu1 %v8432_v27  ;;  %v1053_v33 = vld [vmem:[#allocation2 + $0xc0] sm:$0xf] }
 0x102   : > { %v1438_v40 = vrot.slane %v1436_v28, 1  ;;  %v1088_v53 = vld [vmem:[#allocation2 + $0xa8] sm:$0xf]  ;;  %v6222_v15 = vpack.c.bf16 %v522_v52, %v522_v52  ;;  %v1574_v41 = vrot.slane %v7453_v47, 1  ;;  %v874_v19 = vor.u32 %v872_v44, %v871_v48 }
 0x103   : > { %v1128_v54 = vld [vmem:[#allocation2 + $0xa8] sm:$0xe]  ;;  %v1089_v32 = vld [vmem:[#allocation2 + $0xac] sm:$0xf]  ;;  %v1047_v6 = vsel %vm8058_vm8, %v866_v60, %v1046_v49  ;;  %v876_v29 = vrot.slane %v871_v48, 4  ;;  %v878_v45 = vshrl.u32 %v6221_v39, 16 }
 0x104   : > { %v1439_v8 = vor.u32 %v1438_v40, %v1434_v59  ;;  %v8440_v58 = vcombine.low %v1088_v53, %v1089_v32  ;;  %v7459_v26 = vld [vmem:[#allocation2 + $0xb0] ss:$0 sps:$4 sm:$0x11]   ;;  %1048 = vst [vmem:[#allocation2 + $0xb4] sm:$0xf] %v1047_v6  ;;  %v5945_v11 = vcombine.low %v1128_v54, %v1089_v32  ;;  %v875_v2 = vsel %vm8051_vm7, %v867_v24, %v874_v19 }
 0x105   : > { %v1051_v62 = vsel %vm8065_vm9, %v876_v29, %v1050_v5  ;;  %v881_v52 = vshll.u32 %v6221_v39, 16  ;;  %v886_v47 = vshrl.u32 %v6222_v15, 16  ;;  %v1453_v28 = vshll.u32 %v7459_v26, 16  ;;  %1049 = vst [vmem:[#allocation2 + $0xb8] sm:$0xf] %v875_v2 }
 0x106   : > { %v8447_v44 = vsel %vm1276_vm0, %v1439_v8, %v1443_v51  ;;  %2529 = vmatprep.mubr.bf16.mxu1 %v8440_v58  ;;  %v1446_v49 = vshrl.u32 %v8440_v58, 16  ;;  %v1448_v59 = vshll.u32 %v8440_v58, 16  ;;  %1052 = vst [vmem:[#allocation2 + $0xbc] sm:$0x1] %v1051_v62  ;;  %v1057_v60 = vld [vmem:[#allocation2 + $0xc8] sm:$0x1]  ;;  %v8454_v5 = vsel %vm1533_vm5, %v1573_v50, %v1574_v41 }
 0x107   : > { %2368 = vmatprep.mubr.bf16.mxu0 %v8447_v44  ;;  %v1576_v24 = vrot.slane %v5945_v11, 1  ;;  %v880_v48 = vrot.slane %v878_v45, 7  ;;  %v888_v40 = vrot.slane %v886_v47, 7  ;;  %v1455_v53 = vrot.slane %v1453_v28, 1 }
 0x108   : > { %v1450_v51 = vrot.slane %v1448_v59, 1  ;;  %v1577_v54 = vrot.slane %v7459_v26, 1  ;;  %v889_v39 = vshll.u32 %v6222_v15, 16  ;;  %2369 = vmatmul.mubr.bf16.gmra.mrb[52].mxu0 %v8428_v31 }
 0x109   : > { %v883_v32 = vor.u32 %v881_v52, %v880_v48  ;;  %v884_v19 = vrot.slane %v880_v48, 4  ;;  %v893_v6 = vrot.slane %v888_v40, 4  ;;  %2530 = vmatmul.mubr.bf16.gmra.mrb[52].mxu1 %v8454_v5 }
 0x10a   : > { %v1451_v29 = vor.u32 %v1450_v51, %v1446_v49  ;;  %v891_v8 = vor.u32 %v889_v39, %v888_v40  ;;  %v8471_v47 = vsel %vm1533_vm5, %v1576_v24, %v1577_v54 }
 0x10b   : > { %v1090_v2 = vld [vmem:[#allocation2 + $0xb4] sm:$0xf]  ;;  %v1054_v50 = vsel %vm8058_vm8, %v883_v32, %v1053_v33  ;;  %v1058_v11 = vsel %vm8065_vm9, %v893_v6, %v1057_v60  ;;  %v7476_v6 = vld [vmem:[#allocation6 + $0x208] sm:$0xff]  }
 0x10c   : > { %v1129_v41 = vld [vmem:[#allocation2 + $0xb4] sm:$0xe]  ;;  %v8463_v26 = vsel %vm1276_vm0, %v1451_v29, %v1455_v53  ;;  %v892_v15 = vsel %vm8051_vm7, %v884_v19, %v891_v8  ;;  %1055 = vst [vmem:[#allocation2 + $0xc0] sm:$0xf] %v1054_v50  ;;  %1059 = vst [vmem:[#allocation2 + $0xc8] sm:$0x1] %v1058_v11 }
 0x10d   : > { %2376 = vmatprep.mubr.bf16.mxu0 %v8463_v26  ;;  %v1091_v45 = vld [vmem:[#allocation2 + $0xb8] sm:$0xf]  ;;  %1056 = vst [vmem:[#allocation2 + $0xc4] sm:$0xf] %v892_v15  ;;  %v7477_v29 = vld [vmem:[#allocation6 + $0x210] sm:$0xff]   ;;  %v7478_v8 = vld [vmem:[#allocation6 + $0x218] sm:$0xff]  }
 0x10e   : > { %v8468_v62 = vcombine.low %v1090_v2, %v1091_v45  ;;  %v7468_v52 = vld [vmem:[#allocation2 + $0xbc] ss:$0 sps:$4 sm:$0x11]   ;;  %v5946_v33 = vcombine.low %v1129_v41, %v1091_v45  ;;  %v8546_v15 = vld [vmem:[#allocation2 + $0xd0] sm:$0xf] }
 0x10f   : > { %v1465_v28 = vshll.u32 %v7468_v52, 16  ;;  %v1580_v54 = vrot.slane %v7468_v52, 1 }
 0x110   : > { %2537 = vmatprep.mubr.bf16.mxu1 %v8468_v62  ;;  %v1458_v49 = vshrl.u32 %v8468_v62, 16  ;;  %v1460_v59 = vshll.u32 %v8468_v62, 16  ;;  %2377 = vmatmul.mubr.bf16.gmra.mrb[56].mxu0 %v8440_v58  ;;  %v1579_v24 = vrot.slane %v5946_v33, 1 }
 0x111   : > { %v1467_v48 = vrot.slane %v1465_v28, 1  ;;  %2538 = vmatmul.mubr.bf16.gmra.mrb[56].mxu1 %v8471_v47 }
 0x112   : > { %v1462_v60 = vrot.slane %v1460_v59, 1  ;;  %v8489_v19 = vsel %vm1533_vm5, %v1579_v24, %v1580_v54 }
 0x113   : > { %v1092_v40 = vld [vmem:[#allocation2 + $0xc0] sm:$0xf] }
 0x114   : > { %v1463_v51 = vor.u32 %v1462_v60, %v1458_v49  ;;  %v8478_v53 = vld [vmem:[#allocation2 + $0xc4] sm:$0xf]  ;;  %v8550_v49 = vld [vmem:[#allocation2 + $0xc8] ss:$0 sps:$4 sm:$0x11]  }
 0x115   : > { %v8481_v39 = vcombine.low %v1092_v40, %v8478_v53 }
 0x116   : > { %v8484_v32 = vsel %vm1276_vm0, %v1463_v51, %v1467_v48 }
 0x117   : > { %2384 = vmatprep.mubr.bf16.mxu0 %v8484_v32  ;;  %2545 = vmatprep.mubr.bf16.mxu1 %v8481_v39  ;;  %v1610_v59 = vshll.u32 %v8481_v39, 16 }
 0x118   : > { %2385 = vmatmul.mubr.bf16.gmra.mrb[60].mxu0 %v8468_v62 }
 0x119   : > { %2546 = vmatmul.mubr.bf16.gmra.mrb[60].mxu1 %v8489_v19  ;;  %2586 = vmatprep.mubr.bf16.mxu0 %v8108_v3  ;;  %v7479_v3 = vld [vmem:[#allocation6 + $0x220] sm:$0xff]  }
 0x11a   : > { %2747 = vmatprep.mubr.bf16.mxu1 %v8136_v42 }
 0x120   : > { %2587 = vmatmul.mubr.bf16.vlgmr.msra.gmra.mrb[64].mxu0 %v8123_v21  ;;  %v7481_v21 = vld [vmem:[#allocation6 + $0x230] sm:$0xff]  }
 0x121   : > { %7201 = vmatpush3.bf16.msra.mxu0 %v8333_v7  ;;  %2748 = vmatmul.mubr.bf16.vlgmr.msra.gmra.mrb[64].mxu1 %v8105_v0  ;;  %v7480_v0 = vld [vmem:[#allocation6 + $0x228] sm:$0xff]  }
 0x122   : > { %2594 = vmatprep.mubr.bf16.mxu0 %v8132_v38  ;;  %2755 = vmatprep.mubr.bf16.mxu1 %v8155_v63 }
 0x123   : > { %7202 = vmatprep.subr.bf16.mxu0 %v7476_v6 }
 0x125   : > { %7203 = vmatpush3.bf16.msra.mxu0 %v7476_v6 }
 0x126   : > { %7204 = vmatprep.subr.bf16.mxu0 %v7477_v29 }
 0x128   : > { %2595 = vmatmul.mubr.bf16.gmra.mrb[68].mxu0 %v8136_v42  ;;  %v9839_v42 = vld [vmem:[#allocation13_spill] sm:$0xff] }
 0x129   : > { %2756 = vmatmul.mubr.bf16.gmra.mrb[68].mxu1 %v8120_v16  ;;  %2602 = vmatprep.mubr.bf16.mxu0 %v8140_v46  ;;  %v7482_v16 = vld [vmem:[#allocation6 + $0x238] sm:$0xff]  }
 0x12a   : > { %2763 = vmatprep.mubr.bf16.mxu1 %v8201_v20  ;;  %7205 = vmatpush3.bf16.msra.mxu0 %v7477_v29  ;;  %v1608_v29 = vshrl.u32 %v8481_v39, 16 }
 0x12b   : > { %7206 = vmatprep.subr.bf16.mxu0 %v7478_v8 }
 0x12e   : > { %7207 = vmatpush3.bf16.msra.mxu0 %v7478_v8  ;;  %v1612_v8 = vrot.slane %v1610_v59, 1 }
 0x12f   : > { %7208 = vmatprep.subr.bf16.mxu0 %v7479_v3 }
 0x130   : > { %2603 = vmatmul.mubr.bf16.gmra.mrb[72].mxu0 %v8155_v63  ;;  %v9840_v63 = vld [vmem:[#allocation14_spill] sm:$0xff] }
 0x131   : > { %2764 = vmatmul.mubr.bf16.gmra.mrb[72].mxu1 %v8170_v25  ;;  %2610 = vmatprep.mubr.bf16.mxu0 %v8187_v4  ;;  %v9841_v25 = vld [vmem:[#allocation16_spill] sm:$0xff] }
 0x132   : > { %2771 = vmatprep.mubr.bf16.mxu1 %v8226_v9  ;;  %7209 = vmatpush3.bf16.msra.mxu0 %v7479_v3  ;;  %v1615_v3 = vshll.u32 %v8550_v49, 16 }
 0x133   : > { %7210 = vmatprep.subr.bf16.mxu0 %v7480_v0 }
 0x136   : > { %7211 = vmatpush3.bf16.msra.mxu0 %v7480_v0 }
 0x137   : > { %7212 = vmatprep.subr.bf16.mxu0 %v7481_v21 }
 0x138   : > { %2611 = vmatmul.mubr.bf16.gmra.mrb[76].mxu0 %v8201_v20  ;;  %v9842_v20 = vld [vmem:[#allocation15_spill] sm:$0xff] }
 0x139   : > { %2772 = vmatmul.mubr.bf16.gmra.mrb[76].mxu1 %v8203_v23  ;;  %2618 = vmatprep.mubr.bf16.mxu0 %v8213_v57  ;;  %v9843_v23 = vld [vmem:[#allocation17_spill] sm:$0xff] }
 0x13a   : > { %2779 = vmatprep.mubr.bf16.mxu1 %v8248_v55  ;;  %7213 = vmatpush3.bf16.msra.mxu0 %v7481_v21 }
 0x13b   : > { %7214 = vmatprep.subr.bf16.mxu0 %v7482_v16 }
 0x13e   : > { %7215 = vmatpush3.bf16.msra.mxu0 %v7482_v16  ;;  %v1130_v16 = vld [vmem:[#allocation2 + $0xc0] sm:$0xe] }
 0x140   : > { %2619 = vmatmul.mubr.bf16.gmra.mrb[80].mxu0 %v8226_v9  ;;  %v9844_v9 = vld [vmem:[#allocation18_spill] sm:$0xff] }
 0x141   : > { %2780 = vmatmul.mubr.bf16.gmra.mrb[80].mxu1 %v8218_v1  ;;  %2626 = vmatprep.mubr.bf16.mxu0 %v8236_v35 }
 0x142   : > { %2787 = vmatprep.mubr.bf16.mxu1 %v8291_v17 }
 0x148   : > { %2627 = vmatmul.mubr.bf16.gmra.mrb[84].mxu0 %v8248_v55 }
 0x149   : > { %2788 = vmatmul.mubr.bf16.gmra.mrb[84].mxu1 %v8258_v12  ;;  %2634 = vmatprep.mubr.bf16.mxu0 %v8266_v18 }
 0x14a   : > { %2795 = vmatprep.mubr.bf16.mxu1 %v8313_v13 }
 0x150   : > { %2635 = vmatmul.mubr.bf16.gmra.mrb[88].mxu0 %v8291_v17 }
 0x151   : > { %2796 = vmatmul.mubr.bf16.gmra.mrb[88].mxu1 %v8285_v10  ;;  %2642 = vmatprep.mubr.bf16.mxu0 %v8301_v43 }
 0x152   : > { %2803 = vmatprep.mubr.bf16.mxu1 %v8345_v37 }
 0x158   : > { %2643 = vmatmul.mubr.bf16.gmra.mrb[92].mxu0 %v8313_v13 }
 0x159   : > { %2804 = vmatmul.mubr.bf16.gmra.mrb[92].mxu1 %v9839_v42  ;;  %2650 = vmatprep.mubr.bf16.mxu0 %v9840_v63 }
 0x15a   : > { %2811 = vmatprep.mubr.bf16.mxu1 %v9841_v25 }
 0x160   : > { %2651 = vmatmul.mubr.bf16.gmra.mrb[96].mxu0 %v8345_v37 }
 0x161   : > { %2812 = vmatmul.mubr.bf16.gmra.mrb[96].mxu1 %v9842_v20  ;;  %2658 = vmatprep.mubr.bf16.mxu0 %v9843_v23  ;;  %v1613_v20 = vor.u32 %v1612_v8, %v1608_v29 }
 0x162   : > { %2819 = vmatprep.mubr.bf16.mxu1 %v9844_v9 }
 0x163   : > { %v6272_v1 = vpop.f32.mrb[0].mxu0 }
 0x164   : > { %v6273_v55 = vpop.f32.mrb[1].mxu0 }
 0x165   : > { %v6274_v12 = vadd.f32 %v6273_v55, %v6272_v1  ;;  %v6275_v10 = vpop.f32.mrb[2].mxu0  ;;  %v1617_v1 = vrot.slane %v1615_v3, 1 }
 0x166   : > { %v6276_v17 = vpop.f32.mrb[3].mxu0 }
 0x167   : > { %v6277_v13 = vadd.f32 %v6276_v17, %v6275_v10 }
 0x168   : > { %2659 = vmatmul.mubr.bf16.gmra.mrb[100].mxu0 %v9841_v25 }
 0x169   : > { %2820 = vmatmul.mubr.bf16.gmra.mrb[100].mxu1 %v8368_v56  ;;  %2666 = vmatprep.mubr.bf16.mxu0 %v8404_v34 }
 0x16a   : > { %2827 = vmatprep.mubr.bf16.mxu1 %v8419_v14 }
 0x170   : > { %2667 = vmatmul.mubr.bf16.gmra.mrb[104].mxu0 %v9844_v9  ;;  %v8566_v9 = vld [vmem:[#allocation2 + $0xd4] ss:$0 sps:$4 sm:$0x11]  }
 0x171   : > { %2828 = vmatmul.mubr.bf16.gmra.mrb[104].mxu1 %v8389_v61  ;;  %2674 = vmatprep.mubr.bf16.mxu0 %v8432_v27  ;;  %v1094_v61 = vld [vmem:[#allocation2 + $0xcc] sm:$0xf]  ;;  %v1644_v59 = vshll.u32 %v8566_v9, 16 }
 0x172   : > { %2835 = vmatprep.mubr.bf16.mxu1 %v8447_v44  ;;  %v8554_v24 = vcombine.low %v1094_v61, %v8546_v15  ;;  %v1618_v61 = vsel %vm1276_vm0, %v1613_v20, %v1617_v1 }
 0x174   : > { %v6384_v7 = vpop.f32.mrb[0].mxu1  ;;  %v1639_v55 = vshll.u32 %v8554_v24, 16 }
 0x175   : > { %v6385_v37 = vpop.f32.mrb[1].mxu1 }
 0x176   : > { %v6386_v2 = vadd.f32 %v6385_v37, %v6384_v7  ;;  %v6387_v50 = vpop.f32.mrb[2].mxu1 }
 0x177   : > { %v6388_v41 = vpop.f32.mrb[3].mxu1 }
 0x178   : > { %v6389_v11 = vadd.f32 %v6388_v41, %v6387_v50  ;;  %2675 = vmatmul.mubr.bf16.gmra.mrb[108].mxu0 %v8419_v14  ;;  %v8541_v56 = vadd.f32 %v6386_v2, %v6274_v12  ;;  %v5949_v2 = vcombine.low %v1130_v16, %v8478_v53  ;;  %v1637_v50 = vshrl.u32 %v8554_v24, 16 }
 0x179   : > { %2836 = vmatmul.mubr.bf16.gmra.mrb[108].mxu1 %v8428_v31  ;;  %2682 = vmatprep.mubr.bf16.mxu0 %v8454_v5 }
 0x17a   : > { %2843 = vmatprep.mubr.bf16.mxu1 %v8463_v26  ;;  %v8548_v45 = vadd.f32 %v6389_v11, %v6277_v13  ;;  %v1623_v53 = vrot.slane %v5949_v2, 1 }
 0x17b   : > { %v6278_v52 = vpop.f32.mrb[4].mxu0 }
 0x17c   : > { %v6390_v28 = vpop.f32.mrb[4].mxu1  ;;  %v6279_v14 = vpop.f32.mrb[5].mxu0 }
 0x17d   : > { %v6280_v33 = vadd.f32 %v6279_v14, %v6278_v52  ;;  %v6391_v60 = vpop.f32.mrb[5].mxu1  ;;  %v6281_v48 = vpop.f32.mrb[6].mxu0  ;;  %v1641_v52 = vrot.slane %v1639_v55, 1  ;;  %v7488_v55 = vld [vmem:[#allocation8 + $0x40] sm:$0xff]  }
 0x17e   : > { %v6392_v31 = vadd.f32 %v6391_v60, %v6390_v28  ;;  %v6393_v40 = vpop.f32.mrb[6].mxu1  ;;  %v6282_v51 = vpop.f32.mrb[7].mxu0  ;;  %6728 = vmatprep.subr.bf16.mxu1 %v7488_v55 }
 0x17f   : > { %v6283_v54 = vadd.f32 %v6282_v51, %v6281_v48  ;;  %v6394_v6 = vpop.f32.mrb[7].mxu1 }
 0x180   : > { %v6395_v0 = vadd.f32 %v6394_v6, %v6393_v40  ;;  %2683 = vmatmul.mubr.bf16.gmra.mrb[112].mxu0 %v8447_v44  ;;  %v8559_v21 = vadd.f32 %v6392_v31, %v6280_v33  ;;  %v1624_v33 = vrot.slane %v8550_v49, 1  ;;  %v1642_v31 = vor.u32 %v1641_v52, %v1637_v50 }
 0x181   : > { %2844 = vmatmul.mubr.bf16.gmra.mrb[112].mxu1 %v8440_v58  ;;  %2690 = vmatprep.mubr.bf16.mxu0 %v8471_v47  ;;  %v1646_v40 = vrot.slane %v1644_v59, 1 }
 0x182   : > { %2851 = vmatprep.mubr.bf16.mxu1 %v8484_v32  ;;  %v8564_v42 = vadd.f32 %v6395_v0, %v6283_v54 }
 0x183   : > { %v6284_v25 = vpop.f32.mrb[8].mxu0  ;;  %v1647_v49 = vsel %vm1276_vm0, %v1642_v31, %v1646_v40 }
 0x184   : > { %v6396_v12 = vpop.f32.mrb[8].mxu1  ;;  %v6285_v44 = vpop.f32.mrb[9].mxu0 }
 0x185   : > { %v6286_v10 = vadd.f32 %v6285_v44, %v6284_v25  ;;  %v6397_v17 = vpop.f32.mrb[9].mxu1  ;;  %v6287_v13 = vpop.f32.mrb[10].mxu0 }
 0x186   : > { %v6398_v58 = vadd.f32 %v6397_v17, %v6396_v12  ;;  %v6399_v7 = vpop.f32.mrb[10].mxu1  ;;  %v6288_v37 = vpop.f32.mrb[11].mxu0 }
 0x187   : > { %v6289_v41 = vadd.f32 %v6288_v37, %v6287_v13  ;;  %v6400_v11 = vpop.f32.mrb[11].mxu1 }
 0x188   : > { %v6401_v28 = vadd.f32 %v6400_v11, %v6399_v7  ;;  %2691 = vmatmul.mubr.bf16.gmra.mrb[116].mxu0 %v8463_v26  ;;  %v8574_v14 = vadd.f32 %v6398_v58, %v6286_v10  ;;  %v7489_v10 = vld [vmem:[#allocation8] sm:$0xff]  }
 0x189   : > { %2852 = vmatmul.mubr.bf16.gmra.mrb[116].mxu1 %v8468_v62  ;;  %2698 = vmatprep.mubr.bf16.mxu0 %v8489_v19  ;;  %v8582_v62 = vsel %vm1533_vm5, %v1623_v53, %v1624_v33 }
 0x18a   : > { %2859 = vmatprep.mubr.bf16.mxu1 %v1618_v61  ;;  %v8579_v60 = vadd.f32 %v6401_v28, %v6289_v41  ;;  %6729 = vmatpush3.bf16.msra.mxu1 %v7489_v10 }
 0x18b   : > { %v6290_v48 = vpop.f32.mrb[12].mxu0 }
 0x18c   : > { %v6402_v51 = vpop.f32.mrb[12].mxu1  ;;  %v6291_v54 = vpop.f32.mrb[13].mxu0 }
 0x18d   : > { %v6292_v6 = vadd.f32 %v6291_v54, %v6290_v48  ;;  %v6403_v29 = vpop.f32.mrb[13].mxu1  ;;  %v6293_v26 = vpop.f32.mrb[14].mxu0 }
 0x18e   : > { %v6404_v8 = vadd.f32 %v6403_v29, %v6402_v51  ;;  %v6405_v3 = vpop.f32.mrb[14].mxu1  ;;  %v6294_v0 = vpop.f32.mrb[15].mxu0 }
 0x18f   : > { %v6295_v16 = vadd.f32 %v6294_v0, %v6293_v26  ;;  %v6406_v25 = vpop.f32.mrb[15].mxu1  ;;  %v7491_v0 = vld [vmem:[#allocation8 + $0x8] sm:$0xff]  }
 0x190   : > { %v6407_v20 = vadd.f32 %v6406_v25, %v6405_v3  ;;  %2699 = vmatmul.mubr.bf16.gmra.mrb[120].mxu0 %v8484_v32  ;;  %v8586_v1 = vadd.f32 %v6404_v8, %v6292_v6 }
 0x191   : > { %2860 = vmatmul.mubr.bf16.gmra.mrb[120].mxu1 %v8481_v39  ;;  %2706 = vmatprep.mubr.bf16.mxu0 %v8582_v62 }
 0x192   : > { %2867 = vmatprep.mubr.bf16.mxu1 %v1647_v49  ;;  %v8590_v12 = vadd.f32 %v6407_v20, %v6295_v16 }
 0x193   : > { %v6296_v44 = vpop.f32.mrb[16].mxu0 }
 0x194   : > { %v6408_v17 = vpop.f32.mrb[16].mxu1  ;;  %v6297_v13 = vpop.f32.mrb[17].mxu0 }
 0x195   : > { %v6298_v58 = vadd.f32 %v6297_v13, %v6296_v44  ;;  %v6409_v7 = vpop.f32.mrb[17].mxu1  ;;  %v6299_v37 = vpop.f32.mrb[18].mxu0 }
 0x196   : > { %v6410_v32 = vadd.f32 %v6409_v7, %v6408_v17  ;;  %v6411_v2 = vpop.f32.mrb[18].mxu1  ;;  %v6300_v50 = vpop.f32.mrb[19].mxu0 }
 0x197   : > { %v6301_v41 = vadd.f32 %v6300_v50, %v6299_v37  ;;  %v6412_v39 = vpop.f32.mrb[19].mxu1 }
 0x198   : > { %v6413_v11 = vadd.f32 %v6412_v39, %v6411_v2  ;;  %2707 = vmatmul.mubr.bf16.gmra.mrb[124].mxu0 %v1618_v61  ;;  %v8592_v52 = vadd.f32 %v6410_v32, %v6298_v58 }
 0x199   : > { %2868 = vmatmul.mubr.bf16.gmra.mrb[124].mxu1 %v8554_v24  ;;  %7216 = vmatprep.mubr.bf16.mxu0 %v8132_v38  ;;  %v7490_v38 = vld [vmem:[#allocation8 + $0x48] sm:$0xff]  }
 0x19a   : > { %v8596_v59 = vadd.f32 %v6413_v11, %v6301_v41  ;;  %6730 = vmatprep.subr.bf16.mxu1 %v7490_v38 }
 0x19b   : > { %v6302_v28 = vpop.f32.mrb[20].mxu0  ;;  %6731 = vmatpush3.bf16.msra.mxu1 %v7491_v0 }
 0x19c   : > { %v6414_v53 = vpop.f32.mrb[20].mxu1  ;;  %v6303_v33 = vpop.f32.mrb[21].mxu0 }
 0x19d   : > { %v6304_v48 = vadd.f32 %v6303_v33, %v6302_v28  ;;  %v6415_v31 = vpop.f32.mrb[21].mxu1  ;;  %v6305_v40 = vpop.f32.mrb[22].mxu0 }
 0x19e   : > { %v6416_v51 = vadd.f32 %v6415_v31, %v6414_v53  ;;  %v6417_v54 = vpop.f32.mrb[22].mxu1  ;;  %v6306_v6 = vpop.f32.mrb[23].mxu0 }
 0x19f   : > { %v6307_v29 = vadd.f32 %v6306_v6, %v6305_v40  ;;  %v6418_v26 = vpop.f32.mrb[23].mxu1 }
 0x1a0   : > { %v6419_v61 = vadd.f32 %v6418_v26, %v6417_v54  ;;  %7217 = vmatmul.mubr.bf16.vlgmr.msra.gmra.mrb[128].mxu0 %v8140_v46  ;;  %v8599_v8 = vadd.f32 %v6416_v51, %v6304_v48  ;;  %v7493_v54 = vld [vmem:[#allocation8 + $0x10] sm:$0xff]  }
 0x1a1   : > { %7220 = vmatprep.mubr.bf16.mxu0 %v8187_v4 }
 0x1a2   : > { %v8602_v24 = vadd.f32 %v6419_v61, %v6307_v29 }
 0x1a3   : > { %v6308_v3 = vpop.f32.mrb[24].mxu0 }
 0x1a4   : > { %v6420_v16 = vpop.f32.mrb[24].mxu1  ;;  %v6309_v25 = vpop.f32.mrb[25].mxu0 }
 0x1a5   : > { %v6310_v49 = vadd.f32 %v6309_v25, %v6308_v3  ;;  %v6421_v20 = vpop.f32.mrb[25].mxu1  ;;  %v6311_v55 = vpop.f32.mrb[26].mxu0 }
 0x1a6   : > { %v6422_v44 = vadd.f32 %v6421_v20, %v6420_v16  ;;  %v6423_v10 = vpop.f32.mrb[26].mxu1  ;;  %v6312_v17 = vpop.f32.mrb[27].mxu0 }
 0x1a7   : > { %v6313_v46 = vadd.f32 %v6312_v17, %v6311_v55  ;;  %v6424_v13 = vpop.f32.mrb[27].mxu1 }
 0x1a8   : > { %v6425_v58 = vadd.f32 %v6424_v13, %v6423_v10  ;;  %7221 = vmatmul.mubr.bf16.gmra.mrb[132].mxu0 %v8213_v57  ;;  %v8605_v4 = vadd.f32 %v6422_v44, %v6310_v49 }
 0x1a9   : > { %7224 = vmatprep.mubr.bf16.mxu0 %v8236_v35  ;;  %v7492_v35 = vld [vmem:[#allocation8 + $0x50] sm:$0xff]  }
 0x1aa   : > { %v8608_v7 = vadd.f32 %v6425_v58, %v6313_v46  ;;  %6732 = vmatprep.subr.bf16.mxu1 %v7492_v35 }
 0x1ab   : > { %v6314_v37 = vpop.f32.mrb[28].mxu0  ;;  %6733 = vmatpush3.bf16.msra.mxu1 %v7493_v54 }
 0x1ac   : > { %v6426_v32 = vpop.f32.mrb[28].mxu1  ;;  %v6315_v2 = vpop.f32.mrb[29].mxu0 }
 0x1ad   : > { %v6316_v50 = vadd.f32 %v6315_v2, %v6314_v37  ;;  %v6427_v41 = vpop.f32.mrb[29].mxu1  ;;  %v6317_v39 = vpop.f32.mrb[30].mxu0 }
 0x1ae   : > { %v6428_v11 = vadd.f32 %v6427_v41, %v6426_v32  ;;  %v6429_v28 = vpop.f32.mrb[30].mxu1  ;;  %v6318_v53 = vpop.f32.mrb[31].mxu0 }
 0x1af   : > { %v6319_v33 = vadd.f32 %v6318_v53, %v6317_v39  ;;  %v6430_v48 = vpop.f32.mrb[31].mxu1 }
 0x1b0   : > { %v6431_v31 = vadd.f32 %v6430_v48, %v6429_v28  ;;  %7225 = vmatmul.mubr.bf16.gmra.mrb[136].mxu0 %v8266_v18  ;;  %v8611_v57 = vadd.f32 %v6428_v11, %v6316_v50  ;;  %v7495_v28 = vld [vmem:[#allocation8 + $0x18] sm:$0xff]  }
 0x1b1   : > { %7228 = vmatprep.mubr.bf16.mxu0 %v8301_v43 }
 0x1b2   : > { %v8614_v40 = vadd.f32 %v6431_v31, %v6319_v33 }
 0x1b3   : > { %v6320_v51 = vpop.f32.mrb[32].mxu0 }
 0x1b4   : > { %v6432_v6 = vpop.f32.mrb[32].mxu1  ;;  %v6321_v29 = vpop.f32.mrb[33].mxu0 }
 0x1b5   : > { %v6322_v26 = vadd.f32 %v6321_v29, %v6320_v51  ;;  %v6433_v61 = vpop.f32.mrb[33].mxu1  ;;  %v6323_v38 = vpop.f32.mrb[34].mxu0 }
 0x1b6   : > { %v6434_v3 = vadd.f32 %v6433_v61, %v6432_v6  ;;  %v6435_v0 = vpop.f32.mrb[34].mxu1  ;;  %v6324_v16 = vpop.f32.mrb[35].mxu0 }
 0x1b7   : > { %v6325_v18 = vadd.f32 %v6324_v16, %v6323_v38  ;;  %v6436_v25 = vpop.f32.mrb[35].mxu1  ;;  %v1131_v38 = vld [vmem:[#allocation2 + $0xcc] sm:$0xe] }
 0x1b8   : > { %v8616_v49 = vadd.f32 %v6434_v3, %v6322_v26  ;;  %v6437_v43 = vadd.f32 %v6436_v25, %v6435_v0  ;;  %7229 = vmatmul.mubr.bf16.gmra.mrb[140].mxu0 %v9840_v63  ;;  %v7494_v63 = vld [vmem:[#allocation8 + $0x58] sm:$0xff]  }
 0x1b9   : > { %7232 = vmatprep.mubr.bf16.mxu0 %v9843_v23  ;;  %6734 = vmatprep.subr.bf16.mxu1 %v7494_v63 }
 0x1ba   : > { %v8620_v20 = vadd.f32 %v6437_v43, %v6325_v18  ;;  %6735 = vmatpush3.bf16.msra.mxu1 %v7495_v28 }
 0x1bb   : > { %v6326_v55 = vpop.f32.mrb[36].mxu0 }
 0x1bc   : > { %v6438_v44 = vpop.f32.mrb[36].mxu1  ;;  %v6327_v10 = vpop.f32.mrb[37].mxu0 }
 0x1bd   : > { %v6328_v17 = vadd.f32 %v6327_v10, %v6326_v55  ;;  %v6439_v46 = vpop.f32.mrb[37].mxu1  ;;  %v6329_v13 = vpop.f32.mrb[38].mxu0  ;;  %v5952_v55 = vcombine.low %v1131_v38, %v8546_v15  ;;  %v7497_v15 = vld [vmem:[#allocation8 + $0x20] sm:$0xff]  }
 0x1be   : > { %v6440_v58 = vadd.f32 %v6439_v46, %v6438_v44  ;;  %v6441_v37 = vpop.f32.mrb[38].mxu1  ;;  %v6330_v32 = vpop.f32.mrb[39].mxu0 }
 0x1bf   : > { %v6331_v2 = vadd.f32 %v6330_v32, %v6329_v13  ;;  %v6442_v50 = vpop.f32.mrb[39].mxu1  ;;  %v7496_v32 = vld [vmem:[#allocation8 + $0x60] sm:$0xff]  }
 0x1c0   : > { %v8622_v41 = vadd.f32 %v6440_v58, %v6328_v17  ;;  %v6443_v39 = vadd.f32 %v6442_v50, %v6441_v37  ;;  %7233 = vmatmul.mubr.bf16.gmra.mrb[144].mxu0 %v8404_v34  ;;  %v1653_v37 = vrot.slane %v8566_v9, 1  ;;  %6736 = vmatprep.subr.bf16.mxu1 %v7496_v32 }
 0x1c1   : > { %7236 = vmatprep.mubr.bf16.mxu0 %v8432_v27  ;;  %6737 = vmatpush3.bf16.msra.mxu1 %v7497_v15 }
 0x1c2   : > { %v8626_v23 = vadd.f32 %v6443_v39, %v6331_v2 }
 0x1c3   : > { %v6332_v11 = vpop.f32.mrb[40].mxu0 }
 0x1c4   : > { %v6444_v53 = vpop.f32.mrb[40].mxu1  ;;  %v6333_v33 = vpop.f32.mrb[41].mxu0 }
 0x1c5   : > { %v6334_v48 = vadd.f32 %v6333_v33, %v6332_v11  ;;  %v6445_v31 = vpop.f32.mrb[41].mxu1  ;;  %v6335_v35 = vpop.f32.mrb[42].mxu0 }
 0x1c6   : > { %v6446_v51 = vadd.f32 %v6445_v31, %v6444_v53  ;;  %v6447_v54 = vpop.f32.mrb[42].mxu1  ;;  %v6336_v6 = vpop.f32.mrb[43].mxu0 }
 0x1c7   : > { %v6337_v29 = vadd.f32 %v6336_v6, %v6335_v35  ;;  %v6448_v26 = vpop.f32.mrb[43].mxu1 }
 0x1c8   : > { %v8628_v34 = vadd.f32 %v6446_v51, %v6334_v48  ;;  %v6449_v27 = vadd.f32 %v6448_v26, %v6447_v54  ;;  %7237 = vmatmul.mubr.bf16.gmra.mrb[148].mxu0 %v8454_v5 }
 0x1c9   : > { %7240 = vmatprep.mubr.bf16.mxu0 %v8471_v47  ;;  %v1652_v47 = vrot.slane %v5952_v55, 1 }
 0x1ca   : > { %v8632_v61 = vadd.f32 %v6449_v27, %v6337_v29 }
 0x1cb   : > { %v6338_v3 = vpop.f32.mrb[44].mxu0  ;;  %v1654_v33 = vsel %vm1533_vm5, %v1652_v47, %v1653_v37 }
 0x1cc   : > { %v6450_v0 = vpop.f32.mrb[44].mxu1  ;;  %v6339_v16 = vpop.f32.mrb[45].mxu0 }
 0x1cd   : > { %v6340_v18 = vadd.f32 %v6339_v16, %v6338_v3  ;;  %v6451_v25 = vpop.f32.mrb[45].mxu1  ;;  %v6341_v43 = vpop.f32.mrb[46].mxu0 }
 0x1ce   : > { %v6452_v44 = vadd.f32 %v6451_v25, %v6450_v0  ;;  %v6453_v10 = vpop.f32.mrb[46].mxu1  ;;  %v6342_v17 = vpop.f32.mrb[47].mxu0 }
 0x1cf   : > { %v6343_v46 = vadd.f32 %v6342_v17, %v6341_v43  ;;  %v6454_v13 = vpop.f32.mrb[47].mxu1 }
 0x1d0   : > { %v8635_v58 = vadd.f32 %v6452_v44, %v6340_v18  ;;  %v6455_v5 = vadd.f32 %v6454_v13, %v6453_v10  ;;  %7241 = vmatmul.mubr.bf16.gmra.mrb[152].mxu0 %v8489_v19  ;;  %v7498_v10 = vld [vmem:[#allocation8 + $0x68] sm:$0xff]  }
 0x1d1   : > { %7244 = vmatprep.mubr.bf16.mxu0 %v8582_v62  ;;  %6738 = vmatprep.subr.bf16.mxu1 %v7498_v10  ;;  %v7499_v13 = vld [vmem:[#allocation8 + $0x28] sm:$0xff]   ;;  %v7503_v10 = vld [vmem:[#allocation8 + $0x80] sm:$0xff]  }
 0x1d2   : > { %v8640_v2 = vadd.f32 %v6455_v5, %v6343_v46  ;;  %6739 = vmatpush3.bf16.msra.mxu1 %v7499_v13 }
 0x1d3   : > { %v6344_v50 = vpop.f32.mrb[48].mxu0 }
 0x1d4   : > { %v6456_v39 = vpop.f32.mrb[48].mxu1  ;;  %v6345_v63 = vpop.f32.mrb[49].mxu0 }
 0x1d5   : > { %v6346_v11 = vadd.f32 %v6345_v63, %v6344_v50  ;;  %v6457_v28 = vpop.f32.mrb[49].mxu1  ;;  %v6347_v53 = vpop.f32.mrb[50].mxu0 }
 0x1d6   : > { %v6458_v19 = vadd.f32 %v6457_v28, %v6456_v39  ;;  %v6459_v48 = vpop.f32.mrb[50].mxu1  ;;  %v6348_v62 = vpop.f32.mrb[51].mxu0 }
 0x1d7   : > { %v6349_v31 = vadd.f32 %v6348_v62, %v6347_v53  ;;  %v6460_v35 = vpop.f32.mrb[51].mxu1 }
 0x1d8   : > { %v8643_v9 = vadd.f32 %v6458_v19, %v6346_v11  ;;  %v6461_v51 = vadd.f32 %v6460_v35, %v6459_v48  ;;  %7245 = vmatmul.mubr.bf16.gmra.mrb[156].mxu0 %v1654_v33 }
 0x1da   : > { %v8645_v54 = vadd.f32 %v6461_v51, %v6349_v31 }
 0x1db   : > { %v6350_v6 = vpop.f32.mrb[52].mxu0 }
 0x1dc   : > { %v6462_v29 = vpop.f32.mrb[52].mxu1  ;;  %v6351_v26 = vpop.f32.mrb[53].mxu0 }
 0x1dd   : > { %v6352_v27 = vadd.f32 %v6351_v26, %v6350_v6  ;;  %v6463_v38 = vpop.f32.mrb[53].mxu1  ;;  %v6353_v3 = vpop.f32.mrb[54].mxu0 }
 0x1de   : > { %v6464_v0 = vadd.f32 %v6463_v38, %v6462_v29  ;;  %v6465_v16 = vpop.f32.mrb[54].mxu1  ;;  %v6354_v18 = vpop.f32.mrb[55].mxu0 }
 0x1df   : > { %v6355_v25 = vadd.f32 %v6354_v18, %v6353_v3  ;;  %v6466_v43 = vpop.f32.mrb[55].mxu1  ;;  %v7500_v18 = vld [vmem:[#allocation8 + $0x70] sm:$0xff]  }
 0x1e0   : > { %v8647_v55 = vadd.f32 %v6464_v0, %v6352_v27  ;;  %v6467_v44 = vadd.f32 %v6466_v43, %v6465_v16  ;;  %v7502_v43 = vld [vmem:[#allocation8 + $0xc0] sm:$0xff]   ;;  %6740 = vmatprep.subr.bf16.mxu1 %v7500_v18 }
 0x1e1   : > { %6840 = vmatprep.subr.bf16.mxu0 %v7502_v43 }
 0x1e2   : > { %v8649_v17 = vadd.f32 %v6467_v44, %v6355_v25  ;;  %6841 = vmatpush3.bf16.msra.mxu0 %v7503_v10 }
 0x1e3   : > { %v6356_v46 = vpop.f32.mrb[56].mxu0 }
 0x1e4   : > { %v6468_v5 = vpop.f32.mrb[56].mxu1  ;;  %v6357_v47 = vpop.f32.mrb[57].mxu0 }
 0x1e5   : > { %v6358_v37 = vadd.f32 %v6357_v47, %v6356_v46  ;;  %v6469_v32 = vpop.f32.mrb[57].mxu1  ;;  %v6359_v50 = vpop.f32.mrb[58].mxu0 }
 0x1e6   : > { %v6470_v15 = vadd.f32 %v6469_v32, %v6468_v5  ;;  %v6471_v39 = vpop.f32.mrb[58].mxu1  ;;  %v6360_v63 = vpop.f32.mrb[59].mxu0 }
 0x1e7   : > { %v6361_v11 = vadd.f32 %v6360_v63, %v6359_v50  ;;  %v6472_v28 = vpop.f32.mrb[59].mxu1 }
 0x1e8   : > { %v8651_v53 = vadd.f32 %v6470_v15, %v6358_v37  ;;  %v6473_v33 = vadd.f32 %v6472_v28, %v6471_v39  ;;  %v7504_v39 = vld [vmem:[#allocation8 + $0xc8] sm:$0xff]  }
 0x1e9   : > { %6842 = vmatprep.subr.bf16.mxu0 %v7504_v39 }
 0x1ea   : > { %v8653_v19 = vadd.f32 %v6473_v33, %v6361_v11  ;;  %v7505_v33 = vld [vmem:[#allocation8 + $0x88] sm:$0xff]  }
 0x1eb   : > { %v6362_v48 = vpop.f32.mrb[60].mxu0  ;;  %6843 = vmatpush3.bf16.msra.mxu0 %v7505_v33 }
 0x1ec   : > { %v6474_v62 = vpop.f32.mrb[60].mxu1  ;;  %v6363_v31 = vpop.f32.mrb[61].mxu0 }
 0x1ed   : > { %v6364_v35 = vadd.f32 %v6363_v31, %v6362_v48  ;;  %v6475_v51 = vpop.f32.mrb[61].mxu1  ;;  %v6365_v6 = vpop.f32.mrb[62].mxu0 }
 0x1ee   : > { %v6476_v29 = vadd.f32 %v6475_v51, %v6474_v62  ;;  %v6477_v26 = vpop.f32.mrb[62].mxu1  ;;  %v6366_v27 = vpop.f32.mrb[63].mxu0 }
 0x1ef   : > { %v6367_v38 = vadd.f32 %v6366_v27, %v6365_v6  ;;  %v6478_v3 = vpop.f32.mrb[63].mxu1 }
 0x1f0   : > { %v8655_v0 = vadd.f32 %v6476_v29, %v6364_v35  ;;  %v6479_v16 = vadd.f32 %v6478_v3, %v6477_v26  ;;  %v7506_v35 = vld [vmem:[#allocation8 + $0xd0] sm:$0xff]  }
 0x1f1   : > { %v7507_v29 = vld [vmem:[#allocation8 + $0x90] sm:$0xff]   ;;  %6844 = vmatprep.subr.bf16.mxu0 %v7506_v35 }
 0x1f2   : > { %v8657_v25 = vadd.f32 %v6479_v16, %v6367_v38  ;;  %6845 = vmatpush3.bf16.msra.mxu0 %v7507_v29  ;;  %v7509_v29 = vld [vmem:[#allocation8 + $0x98] sm:$0xff]  }
 0x1f3   : > { %v6496_v44 = vpop.f32.mrb[64].mxu0 }
 0x1f4   : > { %v6497_v46 = vpop.f32.mrb[65].mxu0  ;;  %v6608_v13 = vpop.f32.mrb[64].mxu1 }
 0x1f5   : > { %v6498_v5 = vadd.f32 %v6497_v46, %v6496_v44  ;;  %v6499_v47 = vpop.f32.mrb[66].mxu0  ;;  %v6609_v37 = vpop.f32.mrb[65].mxu1 }
 0x1f6   : > { %v6500_v32 = vpop.f32.mrb[67].mxu0  ;;  %v6610_v50 = vadd.f32 %v6609_v37, %v6608_v13  ;;  %v6611_v15 = vpop.f32.mrb[66].mxu1 }
 0x1f7   : > { %v2589_v63 = vadd.f32 %v6498_v5, %v8541_v56  ;;  %v6501_v11 = vadd.f32 %v6500_v32, %v6499_v47  ;;  %v6612_v28 = vpop.f32.mrb[67].mxu1 }
 0x1f8   : > { %v6613_v48 = vadd.f32 %v6612_v28, %v6611_v15 }
 0x1f9   : > { %v2592_v62 = vadd.f32 %v6501_v11, %v8548_v45  ;;  %v8661_v31 = vadd.f32 %v6610_v50, %v2589_v63  ;;  %v7501_v11 = vld [vmem:[#allocation8 + $0x30] sm:$0xff]  }
 0x1fa   : > { %6741 = vmatpush3.bf16.msra.mxu1 %v7501_v11 }
 0x1fb   : > { %v6502_v51 = vpop.f32.mrb[68].mxu0  ;;  %v8663_v6 = vadd.f32 %v6613_v48, %v2592_v62 }
 0x1fc   : > { %v6503_v26 = vpop.f32.mrb[69].mxu0  ;;  %v6614_v27 = vpop.f32.mrb[68].mxu1 }
 0x1fd   : > { %v6504_v38 = vadd.f32 %v6503_v26, %v6502_v51  ;;  %v6505_v56 = vpop.f32.mrb[70].mxu0  ;;  %v6615_v3 = vpop.f32.mrb[69].mxu1 }
 0x1fe   : > { %v6506_v16 = vpop.f32.mrb[71].mxu0  ;;  %v6616_v18 = vadd.f32 %v6615_v3, %v6614_v27  ;;  %v6617_v43 = vpop.f32.mrb[70].mxu1  ;;  %v7512_v3 = vld [vmem:[#allocation8 + $0xe0] sm:$0xff]  }
 0x1ff   : > { %v2597_v45 = vadd.f32 %v6504_v38, %v8559_v21  ;;  %v6507_v44 = vadd.f32 %v6506_v16, %v6505_v56  ;;  %v6618_v10 = vpop.f32.mrb[71].mxu1 }
 0x200   : > { %v6619_v46 = vadd.f32 %v6618_v10, %v6617_v43  ;;  %v7513_v43 = vld [vmem:[#allocation8 + $0xa0] sm:$0xff]  }
 0x201   : > { %v2600_v13 = vadd.f32 %v6507_v44, %v8564_v42  ;;  %v8667_v5 = vadd.f32 %v6616_v18, %v2597_v45  ;;  %v7508_v42 = vld [vmem:[#allocation8 + $0xd8] sm:$0xff]  }
 0x202   : > { %6846 = vmatprep.subr.bf16.mxu0 %v7508_v42 }
 0x203   : > { %v6508_v47 = vpop.f32.mrb[72].mxu0  ;;  %v8669_v37 = vadd.f32 %v6619_v46, %v2600_v13  ;;  %6847 = vmatpush3.bf16.msra.mxu0 %v7509_v29  ;;  %v7511_v29 = vld [vmem:[#allocation8 + $0x38] sm:$0xff]  }
 0x204   : > { %v6509_v32 = vpop.f32.mrb[73].mxu0  ;;  %v6620_v50 = vpop.f32.mrb[72].mxu1  ;;  %6848 = vmatprep.subr.bf16.mxu0 %v7512_v3 }
 0x205   : > { %v6510_v15 = vadd.f32 %v6509_v32, %v6508_v47  ;;  %v6511_v39 = vpop.f32.mrb[74].mxu0  ;;  %v6621_v63 = vpop.f32.mrb[73].mxu1 }
 0x206   : > { %v6512_v28 = vpop.f32.mrb[75].mxu0  ;;  %v6622_v33 = vadd.f32 %v6621_v63, %v6620_v50  ;;  %v6623_v48 = vpop.f32.mrb[74].mxu1  ;;  %v7514_v50 = vld [vmem:[#allocation8 + $0xe8] sm:$0xff]  }
 0x207   : > { %v2605_v21 = vadd.f32 %v6510_v15, %v8574_v14  ;;  %v6513_v62 = vadd.f32 %v6512_v28, %v6511_v39  ;;  %v6624_v35 = vpop.f32.mrb[75].mxu1  ;;  %6849 = vmatpush3.bf16.msra.mxu0 %v7513_v43  ;;  %v7515_v39 = vld [vmem:[#allocation8 + $0xa8] sm:$0xff]  }
 0x208   : > { %v6625_v51 = vadd.f32 %v6624_v35, %v6623_v48  ;;  %6850 = vmatprep.subr.bf16.mxu0 %v7514_v50  ;;  %v3675_v28 = vld [vmem:[#allocation2] sm:$0xf]  ;;  %v7516_v35 = vld [vmem:[#allocation8 + $0xf0] sm:$0xff]  }
 0x209   : > { %v2608_v26 = vadd.f32 %v6513_v62, %v8579_v60  ;;  %v8673_v27 = vadd.f32 %v6622_v33, %v2605_v21  ;;  %v3676_v33 = vld [vmem:[#allocation2 + $0x4] sm:$0xf]  ;;  %v7510_v62 = vld [vmem:[#allocation8 + $0x78] sm:$0xff]  }
 0x20a   : > { %v6059_v42 = vcombine.low %v3675_v28, %v3676_v33  ;;  %6742 = vmatprep.subr.bf16.mxu1 %v7510_v62  ;;  %v7520_v62 = vld [vmem:[#allocation8 + $0xf8] sm:$0xff]  }
 0x20b   : > { %v6514_v38 = vpop.f32.mrb[76].mxu0  ;;  %v8675_v56 = vadd.f32 %v6625_v51, %v2608_v26  ;;  %6851 = vmatpush3.bf16.msra.mxu0 %v7515_v39  ;;  %v7517_v26 = vld [vmem:[#allocation8 + $0xb0] sm:$0xff]   ;;  %6743 = vmatpush3.bf16.msra.mxu1 %v7511_v29  ;;  %v7521_v29 = vld [vmem:[#allocation8 + $0xb8] sm:$0xff]  }
 0x20c   : > { %v6515_v16 = vpop.f32.mrb[77].mxu0  ;;  %v6626_v18 = vpop.f32.mrb[76].mxu1  ;;  %6852 = vmatprep.subr.bf16.mxu0 %v7516_v35  ;;  %v3729_v35 = vld [vmem:[#allocation2] sm:$0xe] }
 0x20d   : > { %v6516_v14 = vadd.f32 %v6515_v16, %v6514_v38  ;;  %v6517_v45 = vpop.f32.mrb[78].mxu0  ;;  %v6627_v44 = vpop.f32.mrb[77].mxu1 }
 0x20e   : > { %v6518_v10 = vpop.f32.mrb[79].mxu0  ;;  %v6628_v46 = vadd.f32 %v6627_v44, %v6626_v18  ;;  %v6629_v13 = vpop.f32.mrb[78].mxu1  ;;  %v3894_v18 = vshll.u32 %v6059_v42, 16 }
 0x20f   : > { %v2613_v60 = vadd.f32 %v6516_v14, %v8586_v1  ;;  %v6519_v47 = vadd.f32 %v6518_v10, %v6517_v45  ;;  %v6630_v32 = vpop.f32.mrb[79].mxu1  ;;  %6853 = vmatpush3.bf16.msra.mxu0 %v7517_v26  ;;  %v6091_v26 = vcombine.low %v3729_v35, %v3676_v33 }
 0x210   : > { %v6631_v15 = vadd.f32 %v6630_v32, %v6629_v13  ;;  %v3892_v13 = vshrl.u32 %v6059_v42, 16  ;;  %6854 = vmatprep.subr.bf16.mxu0 %v7520_v62 }
 0x211   : > { %v2616_v63 = vadd.f32 %v6519_v47, %v8590_v12  ;;  %v8679_v11 = vadd.f32 %v6628_v46, %v2613_v60  ;;  %v7519_v12 = vld [vmem:[#allocation2 + $0x8] ss:$0 sps:$4 sm:$0x11]   ;;  %v3896_v60 = vrot.slane %v3894_v18, 1 }
 0x212   : > { %v3899_v32 = vshll.u32 %v7519_v12, 16 }
 0x213   : > { %v6520_v48 = vpop.f32.mrb[80].mxu0  ;;  %v8681_v21 = vadd.f32 %v6631_v15, %v2616_v63  ;;  %v3897_v39 = vor.u32 %v3896_v60, %v3892_v13  ;;  %6855 = vmatpush3.bf16.msra.mxu0 %v7521_v29 }
 0x214   : > { %v6521_v1 = vpop.f32.mrb[81].mxu0  ;;  %v6632_v51 = vpop.f32.mrb[80].mxu1  ;;  %v3901_v63 = vrot.slane %v3899_v32, 1 }
 0x215   : > { %v6522_v38 = vadd.f32 %v6521_v1, %v6520_v48  ;;  %v6523_v3 = vpop.f32.mrb[82].mxu0  ;;  %v6633_v16 = vpop.f32.mrb[81].mxu1 }
 0x216   : > { %v6524_v43 = vpop.f32.mrb[83].mxu0  ;;  %v6634_v14 = vadd.f32 %v6633_v16, %v6632_v51  ;;  %v6635_v45 = vpop.f32.mrb[82].mxu1 }
 0x217   : > { %v2621_v44 = vadd.f32 %v6522_v38, %v8592_v52  ;;  %v6525_v10 = vadd.f32 %v6524_v43, %v6523_v3  ;;  %v6636_v46 = vpop.f32.mrb[83].mxu1  ;;  %v3902_v52 = vsel %vm1276_vm0, %v3897_v39, %v3901_v63 }
 0x218   : > { %v6637_v47 = vadd.f32 %v6636_v46, %v6635_v45  ;;  %4877 = vmatprep.mubr.bf16.mxu1 %v3902_v52  ;;  %v4148_v45 = vrot.slane %v7519_v12, 1 }
 0x219   : > { %v2624_v50 = vadd.f32 %v6525_v10, %v8596_v59  ;;  %v8685_v15 = vadd.f32 %v6634_v14, %v2621_v44  ;;  %4878 = vmatmul.mubr.bf16.vlgmr.msra.gmra.mrb[128].mxu1 %v6059_v42  ;;  %v4147_v14 = vrot.slane %v6091_v26, 1 }
 0x21b   : > { %v6526_v28 = vpop.f32.mrb[84].mxu0  ;;  %v8687_v48 = vadd.f32 %v6637_v47, %v2624_v50  ;;  %v8692_v60 = vsel %vm1533_vm5, %v4147_v14, %v4148_v45 }
 0x21c   : > { %v6527_v1 = vpop.f32.mrb[85].mxu0  ;;  %v6638_v51 = vpop.f32.mrb[84].mxu1 }
 0x21d   : > { %v6528_v38 = vadd.f32 %v6527_v1, %v6526_v28  ;;  %v6529_v3 = vpop.f32.mrb[86].mxu0  ;;  %v6639_v16 = vpop.f32.mrb[85].mxu1 }
 0x21e   : > { %v6530_v59 = vpop.f32.mrb[87].mxu0  ;;  %v6640_v18 = vadd.f32 %v6639_v16, %v6638_v51  ;;  %v6641_v43 = vpop.f32.mrb[86].mxu1 }
 0x21f   : > { %v2629_v44 = vadd.f32 %v6528_v38, %v8599_v8  ;;  %v6531_v10 = vadd.f32 %v6530_v59, %v6529_v3  ;;  %v6642_v46 = vpop.f32.mrb[87].mxu1 }
 0x220   : > { %v6643_v13 = vadd.f32 %v6642_v46, %v6641_v43  ;;  %v7523_v46 = vld [vmem:[#allocation8 + $0x140] sm:$0xff]  }
 0x221   : > { %v2632_v33 = vadd.f32 %v6531_v10, %v8602_v24  ;;  %v8695_v47 = vadd.f32 %v6640_v18, %v2629_v44  ;;  %6952 = vmatprep.subr.bf16.mxu1 %v7523_v46 }
 0x223   : > { %v6532_v32 = vpop.f32.mrb[88].mxu0  ;;  %v8697_v50 = vadd.f32 %v6643_v13, %v2632_v33 }
 0x224   : > { %v6533_v39 = vpop.f32.mrb[89].mxu0  ;;  %v6644_v42 = vpop.f32.mrb[88].mxu1 }
 0x225   : > { %v6534_v63 = vadd.f32 %v6533_v39, %v6532_v32  ;;  %v6535_v28 = vpop.f32.mrb[90].mxu0  ;;  %v6645_v12 = vpop.f32.mrb[89].mxu1 }
 0x226   : > { %v6536_v62 = vpop.f32.mrb[91].mxu0  ;;  %v6646_v8 = vadd.f32 %v6645_v12, %v6644_v42  ;;  %v6647_v35 = vpop.f32.mrb[90].mxu1 }
 0x227   : > { %v2637_v1 = vadd.f32 %v6534_v63, %v8605_v4  ;;  %v6537_v51 = vadd.f32 %v6536_v62, %v6535_v28  ;;  %v6648_v52 = vpop.f32.mrb[91].mxu1 }
 0x228   : > { %v6649_v29 = vadd.f32 %v6648_v52, %v6647_v35 }
 0x229   : > { %v2640_v24 = vadd.f32 %v6537_v51, %v8608_v7  ;;  %v8701_v26 = vadd.f32 %v6646_v8, %v2637_v1  ;;  %v7525_v7 = vld [vmem:[#allocation8 + $0x100] sm:$0xff]  }
 0x22a   : > { %6953 = vmatpush3.bf16.msra.mxu1 %v7525_v7 }
 0x22b   : > { %v6538_v38 = vpop.f32.mrb[92].mxu0  ;;  %v8703_v3 = vadd.f32 %v6649_v29, %v2640_v24 }
 0x22c   : > { %v6539_v16 = vpop.f32.mrb[93].mxu0  ;;  %v6650_v59 = vpop.f32.mrb[92].mxu1 }
 0x22d   : > { %v6540_v18 = vadd.f32 %v6539_v16, %v6538_v38  ;;  %v6541_v43 = vpop.f32.mrb[94].mxu0  ;;  %v6651_v14 = vpop.f32.mrb[93].mxu1 }
 0x22e   : > { %v6542_v45 = vpop.f32.mrb[95].mxu0  ;;  %v6652_v44 = vadd.f32 %v6651_v14, %v6650_v59  ;;  %v6653_v10 = vpop.f32.mrb[94].mxu1 }
 0x22f   : > { %v2645_v4 = vadd.f32 %v6540_v18, %v8611_v57  ;;  %v6543_v13 = vadd.f32 %v6542_v45, %v6541_v43  ;;  %v6654_v33 = vpop.f32.mrb[95].mxu1 }
 0x230   : > { %v6655_v32 = vadd.f32 %v6654_v33, %v6653_v10 }
 0x231   : > { %v2648_v39 = vadd.f32 %v6543_v13, %v8614_v40  ;;  %v8707_v42 = vadd.f32 %v6652_v44, %v2645_v4 }
 0x233   : > { %v6544_v63 = vpop.f32.mrb[96].mxu0  ;;  %v8709_v28 = vadd.f32 %v6655_v32, %v2648_v39 }
 0x234   : > { %v6545_v12 = vpop.f32.mrb[97].mxu0  ;;  %v6656_v62 = vpop.f32.mrb[96].mxu1 }
 0x235   : > { %v6546_v8 = vadd.f32 %v6545_v12, %v6544_v63  ;;  %v6547_v35 = vpop.f32.mrb[98].mxu0  ;;  %v6657_v1 = vpop.f32.mrb[97].mxu1 }
 0x236   : > { %v6548_v51 = vpop.f32.mrb[99].mxu0  ;;  %v6658_v57 = vadd.f32 %v6657_v1, %v6656_v62  ;;  %v6659_v52 = vpop.f32.mrb[98].mxu1 }
 0x237   : > { %v2653_v29 = vadd.f32 %v6546_v8, %v8616_v49  ;;  %v6549_v24 = vadd.f32 %v6548_v51, %v6547_v35  ;;  %v6660_v38 = vpop.f32.mrb[99].mxu1 }
 0x238   : > { %v6661_v16 = vadd.f32 %v6660_v38, %v6659_v52 }
 0x239   : > { %v2656_v40 = vadd.f32 %v6549_v24, %v8620_v20  ;;  %v8713_v59 = vadd.f32 %v6658_v57, %v2653_v29 }
 0x23b   : > { %v6550_v18 = vpop.f32.mrb[100].mxu0  ;;  %v8715_v43 = vadd.f32 %v6661_v16, %v2656_v40 }
 0x23c   : > { %v6551_v14 = vpop.f32.mrb[101].mxu0  ;;  %v6662_v45 = vpop.f32.mrb[100].mxu1 }
 0x23d   : > { %v6552_v44 = vadd.f32 %v6551_v14, %v6550_v18  ;;  %v6553_v10 = vpop.f32.mrb[102].mxu0  ;;  %v6663_v46 = vpop.f32.mrb[101].mxu1  ;;  %v7531_v14 = vld [vmem:[#allocation8 + $0x148] sm:$0xff]  }
 0x23e   : > { %v6554_v4 = vpop.f32.mrb[103].mxu0  ;;  %v6664_v13 = vadd.f32 %v6663_v46, %v6662_v45  ;;  %v6665_v33 = vpop.f32.mrb[102].mxu1  ;;  %6954 = vmatprep.subr.bf16.mxu1 %v7531_v14 }
 0x23f   : > { %v2661_v49 = vadd.f32 %v6552_v44, %v8622_v41  ;;  %v6555_v32 = vadd.f32 %v6554_v4, %v6553_v10  ;;  %v6666_v7 = vpop.f32.mrb[103].mxu1  ;;  %v7534_v10 = vld [vmem:[#allocation8 + $0x108] sm:$0xff]  }
 0x240   : > { %v6667_v39 = vadd.f32 %v6666_v7, %v6665_v33  ;;  %6955 = vmatpush3.bf16.msra.mxu1 %v7534_v10 }
 0x241   : > { %v2664_v20 = vadd.f32 %v6555_v32, %v8626_v23  ;;  %v8719_v63 = vadd.f32 %v6664_v13, %v2661_v49 }
 0x243   : > { %v6556_v12 = vpop.f32.mrb[104].mxu0  ;;  %v8721_v62 = vadd.f32 %v6667_v39, %v2664_v20 }
 0x244   : > { %v6557_v8 = vpop.f32.mrb[105].mxu0  ;;  %v6668_v35 = vpop.f32.mrb[104].mxu1 }
 0x245   : > { %v6558_v1 = vadd.f32 %v6557_v8, %v6556_v12  ;;  %v6559_v51 = vpop.f32.mrb[106].mxu0  ;;  %v6669_v57 = vpop.f32.mrb[105].mxu1 }
 0x246   : > { %v6560_v52 = vpop.f32.mrb[107].mxu0  ;;  %v6670_v29 = vadd.f32 %v6669_v57, %v6668_v35  ;;  %v6671_v24 = vpop.f32.mrb[106].mxu1 }
 0x247   : > { %v2669_v41 = vadd.f32 %v6558_v1, %v8628_v34  ;;  %v6561_v38 = vadd.f32 %v6560_v52, %v6559_v51  ;;  %v6672_v16 = vpop.f32.mrb[107].mxu1 }
 0x248   : > { %v6673_v40 = vadd.f32 %v6672_v16, %v6671_v24 }
 0x249   : > { %v2672_v23 = vadd.f32 %v6561_v38, %v8632_v61  ;;  %v8725_v18 = vadd.f32 %v6670_v29, %v2669_v41 }
 0x24b   : > { %v6562_v45 = vpop.f32.mrb[108].mxu0  ;;  %v8727_v44 = vadd.f32 %v6673_v40, %v2672_v23 }
 0x24c   : > { %v6563_v46 = vpop.f32.mrb[109].mxu0  ;;  %v6674_v4 = vpop.f32.mrb[108].mxu1 }
 0x24d   : > { %v6564_v13 = vadd.f32 %v6563_v46, %v6562_v45  ;;  %v6565_v33 = vpop.f32.mrb[110].mxu0  ;;  %v6675_v49 = vpop.f32.mrb[109].mxu1 }
 0x24e   : > { %v6566_v34 = vpop.f32.mrb[111].mxu0  ;;  %v6676_v32 = vadd.f32 %v6675_v49, %v6674_v4  ;;  %v6677_v7 = vpop.f32.mrb[110].mxu1 }
 0x24f   : > { %v2677_v39 = vadd.f32 %v6564_v13, %v8635_v58  ;;  %v6567_v61 = vadd.f32 %v6566_v34, %v6565_v33  ;;  %v6678_v20 = vpop.f32.mrb[111].mxu1 }
 0x250   : > { %v6679_v12 = vadd.f32 %v6678_v20, %v6677_v7 }
 0x251   : > { %v2680_v8 = vadd.f32 %v6567_v61, %v8640_v2  ;;  %v8731_v35 = vadd.f32 %v6676_v32, %v2677_v39 }
 0x253   : > { %v6568_v1 = vpop.f32.mrb[112].mxu0  ;;  %v8733_v51 = vadd.f32 %v6679_v12, %v2680_v8 }
 0x254   : > { %v6569_v57 = vpop.f32.mrb[113].mxu0  ;;  %v6680_v52 = vpop.f32.mrb[112].mxu1 }
 0x255   : > { %v6570_v29 = vadd.f32 %v6569_v57, %v6568_v1  ;;  %v6571_v24 = vpop.f32.mrb[114].mxu0  ;;  %v6681_v41 = vpop.f32.mrb[113].mxu1 }
 0x256   : > { %v6572_v38 = vpop.f32.mrb[115].mxu0  ;;  %v6682_v16 = vadd.f32 %v6681_v41, %v6680_v52  ;;  %v6683_v40 = vpop.f32.mrb[114].mxu1 }
 0x257   : > { %v2685_v58 = vadd.f32 %v6570_v29, %v8643_v9  ;;  %v6573_v23 = vadd.f32 %v6572_v38, %v6571_v24  ;;  %v6684_v14 = vpop.f32.mrb[115].mxu1 }
 0x258   : > { %v6685_v45 = vadd.f32 %v6684_v14, %v6683_v40 }
 0x259   : > { %v2688_v2 = vadd.f32 %v6573_v23, %v8645_v54  ;;  %v8737_v10 = vadd.f32 %v6682_v16, %v2685_v58 }
 0x25b   : > { %v6574_v46 = vpop.f32.mrb[116].mxu0  ;;  %v8739_v4 = vadd.f32 %v6685_v45, %v2688_v2  ;;  %v7539_v2 = vld [vmem:[#allocation8 + $0x150] sm:$0xff]  }
 0x25c   : > { %v6575_v13 = vpop.f32.mrb[117].mxu0  ;;  %v6686_v33 = vpop.f32.mrb[116].mxu1  ;;  %6956 = vmatprep.subr.bf16.mxu1 %v7539_v2 }
 0x25d   : > { %v6576_v49 = vadd.f32 %v6575_v13, %v6574_v46  ;;  %v6577_v34 = vpop.f32.mrb[118].mxu0  ;;  %v6687_v32 = vpop.f32.mrb[117].mxu1  ;;  %v7542_v46 = vld [vmem:[#allocation8 + $0x110] sm:$0xff]  }
 0x25e   : > { %v6578_v7 = vpop.f32.mrb[119].mxu0  ;;  %v6688_v39 = vadd.f32 %v6687_v32, %v6686_v33  ;;  %v6689_v61 = vpop.f32.mrb[118].mxu1  ;;  %6957 = vmatpush3.bf16.msra.mxu1 %v7542_v46  ;;  %v7547_v32 = vld [vmem:[#allocation8 + $0x158] sm:$0xff]  }
 0x25f   : > { %v2693_v9 = vadd.f32 %v6576_v49, %v8647_v55  ;;  %v6579_v20 = vadd.f32 %v6578_v7, %v6577_v34  ;;  %v6690_v12 = vpop.f32.mrb[119].mxu1  ;;  %6958 = vmatprep.subr.bf16.mxu1 %v7547_v32 }
 0x260   : > { %v6691_v8 = vadd.f32 %v6690_v12, %v6689_v61 }
 0x261   : > { %v2696_v54 = vadd.f32 %v6579_v20, %v8649_v17  ;;  %v8743_v1 = vadd.f32 %v6688_v39, %v2693_v9 }
 0x263   : > { %v6580_v57 = vpop.f32.mrb[120].mxu0  ;;  %v8745_v52 = vadd.f32 %v6691_v8, %v2696_v54 }
 0x264   : > { %v6581_v29 = vpop.f32.mrb[121].mxu0  ;;  %v6692_v24 = vpop.f32.mrb[120].mxu1 }
 0x265   : > { %v6582_v41 = vadd.f32 %v6581_v29, %v6580_v57  ;;  %v6583_v38 = vpop.f32.mrb[122].mxu0  ;;  %v6693_v16 = vpop.f32.mrb[121].mxu1 }
 0x266   : > { %v6584_v40 = vpop.f32.mrb[123].mxu0  ;;  %v6694_v58 = vadd.f32 %v6693_v16, %v6692_v24  ;;  %v6695_v23 = vpop.f32.mrb[122].mxu1 }
 0x267   : > { %v2701_v55 = vadd.f32 %v6582_v41, %v8651_v53  ;;  %v6585_v14 = vadd.f32 %v6584_v40, %v6583_v38  ;;  %v6696_v45 = vpop.f32.mrb[123].mxu1  ;;  %v7550_v38 = vld [vmem:[#allocation8 + $0x118] sm:$0xff]   ;;  %v8760_v40 = vld [vmem:[%s9800_s4] ss:$0 sm:$0xff] }
 0x268   : > { %v6697_v17 = vadd.f32 %v6696_v45, %v6695_v23  ;;  %6959 = vmatpush3.bf16.msra.mxu1 %v7550_v38 }
 0x269   : > { %v2704_v13 = vadd.f32 %v6585_v14, %v8653_v19  ;;  %v8749_v33 = vadd.f32 %v6694_v58, %v2701_v55  ;;  %v8768_v55 = vld [vmem:[%s9801_s5] ss:$0 sm:$0xff] }
 0x26b   : > { %v6586_v49 = vpop.f32.mrb[124].mxu0  ;;  %v8751_v34 = vadd.f32 %v6697_v17, %v2704_v13 }
 0x26c   : > { %v6587_v7 = vpop.f32.mrb[125].mxu0  ;;  %v6698_v39 = vpop.f32.mrb[124].mxu1 }
 0x26d   : > { %v6588_v61 = vadd.f32 %v6587_v7, %v6586_v49  ;;  %v6589_v9 = vpop.f32.mrb[126].mxu0  ;;  %v6699_v53 = vpop.f32.mrb[125].mxu1 }
 0x26e   : > { %v6590_v20 = vpop.f32.mrb[127].mxu0  ;;  %v6700_v12 = vadd.f32 %v6699_v53, %v6698_v39  ;;  %v6701_v8 = vpop.f32.mrb[126].mxu1 }
 0x26f   : > { %v2709_v54 = vadd.f32 %v6588_v61, %v8655_v0  ;;  %v6591_v19 = vadd.f32 %v6590_v20, %v6589_v9  ;;  %v6702_v57 = vpop.f32.mrb[127].mxu1  ;;  %v7555_v61 = vld [vmem:[#allocation8 + $0x1c0] sm:$0xff]  }
 0x270   : > { %v6703_v29 = vadd.f32 %v6702_v57, %v6701_v8  ;;  %v7557_v20 = vld [vmem:[#allocation8 + $0x160] sm:$0xff]   ;;  %7064 = vmatprep.subr.bf16.mxu0 %v7555_v61 }
 0x271   : > { %v2712_v24 = vadd.f32 %v6591_v19, %v8657_v25  ;;  %v8755_v41 = vadd.f32 %v6700_v12, %v2709_v54  ;;  %6960 = vmatprep.subr.bf16.mxu1 %v7557_v20 }
 0x273   : > { %v7218_v16 = vpop.f32.mrb[128].mxu0  ;;  %v8762_v58 = vadd.f32 %v6703_v29, %v2712_v24 }
 0x274   : > { %v2919_v23 = vadd.f32 %v7218_v16, %v8667_v5  ;;  %v2910_v0 = vpop.f32.mrb[129].mxu0 }
 0x275   : > { %v2911_v25 = vadd.f32 %v2910_v0, %v8661_v31  ;;  %v7219_v14 = vpop.f32.mrb[130].mxu0 }
 0x276   : > { %v3046_v45 = vmul.f32 %v8760_v40, %v2919_v23  ;;  %v2922_v2 = vadd.f32 %v7219_v14, %v8669_v37  ;;  %v2913_v46 = vpop.f32.mrb[131].mxu0 }
 0x277   : > { %v3044_v17 = vmul.f32 %v8760_v40, %v2911_v25  ;;  %v2914_v13 = vadd.f32 %v2913_v46, %v8663_v6 }
 0x278   : > { %v3085_v5 = vadd.f32 %v8768_v55, %v3046_v45  ;;  %v3047_v49 = vmul.f32 %v8760_v40, %v2922_v2 }
 0x279   : > { %v3083_v32 = vadd.f32 %v8768_v55, %v3044_v17  ;;  %v3045_v7 = vmul.f32 %v8760_v40, %v2914_v13 }
 0x27a   : > { %v3117_v39 = vmax.f32 %v3085_v5, 0.0  ;;  %v3086_v31 = vadd.f32 %v8768_v55, %v3047_v49  ;;  %v3570_v49 = vld [vmem:[#allocation2 + $0x18] sm:$0xf] }
 0x27b   : > { %v3115_v9 = vmax.f32 %v3083_v32, 0.0  ;;  %v3084_v37 = vadd.f32 %v8768_v55, %v3045_v7  ;;  %v7222_v53 = vpop.f32.mrb[132].mxu0 }
 0x27c   : > { %v6225_v12 = vpack.c.bf16 %v3117_v39, %v3117_v39  ;;  %v3118_v8 = vmax.f32 %v3086_v31, 0.0  ;;  %v2935_v6 = vadd.f32 %v7222_v53, %v8679_v11  ;;  %v2926_v54 = vpop.f32.mrb[133].mxu0  ;;  %v7560_v31 = vld [vmem:[#allocation8 + $0x120] sm:$0xff]  }
 0x27d   : > { %v6223_v19 = vpack.c.bf16 %v3115_v9, %v3115_v9  ;;  %v3116_v57 = vmax.f32 %v3084_v37, 0.0  ;;  %v2927_v29 = vadd.f32 %v2926_v54, %v8673_v27  ;;  %v7223_v24 = vpop.f32.mrb[134].mxu0  ;;  %v3563_v37 = vld [vmem:[#allocation2 + $0xc] sm:$0xf]  ;;  %6961 = vmatpush3.bf16.msra.mxu1 %v7560_v31 }
 0x27e   : > { %v3261_v38 = vshrl.u32 %v6225_v12, 16  ;;  %v3264_v16 = vshll.u32 %v6225_v12, 16  ;;  %v6226_v23 = vpack.c.bf16 %v3118_v8, %v3118_v8  ;;  %v3050_v0 = vmul.f32 %v8760_v40, %v2935_v6  ;;  %v2929_v25 = vpop.f32.mrb[135].mxu0  ;;  %v3574_v6 = vld [vmem:[#allocation2 + $0x20] sm:$0x1] }
 0x27f   : > { %v3244_v14 = vshrl.u32 %v6223_v19, 16  ;;  %v3247_v45 = vshll.u32 %v6223_v19, 16  ;;  %v6224_v2 = vpack.c.bf16 %v3116_v57, %v3116_v57  ;;  %v3048_v46 = vmul.f32 %v8760_v40, %v2927_v29 }
 0x280   : > { %v3263_v11 = vrot.slane %v3261_v38, 7  ;;  %v3269_v17 = vshrl.u32 %v6226_v23, 16  ;;  %v3272_v13 = vshll.u32 %v6226_v23, 16  ;;  %v3089_v5 = vadd.f32 %v8768_v55, %v3050_v0  ;;  %v3567_v0 = vld [vmem:[#allocation2 + $0x14] sm:$0x1] }
 0x281   : > { %v3246_v27 = vrot.slane %v3244_v14, 7  ;;  %v3252_v32 = vshrl.u32 %v6224_v2, 16  ;;  %v3255_v7 = vshll.u32 %v6224_v2, 16  ;;  %v3087_v39 = vadd.f32 %v8768_v55, %v3048_v46 }
 0x282   : > { %v3266_v61 = vor.u32 %v3264_v16, %v3263_v11  ;;  %v3267_v9 = vrot.slane %v3263_v11, 4  ;;  %v3271_v53 = vrot.slane %v3269_v17, 7  ;;  %v3121_v20 = vmax.f32 %v3089_v5, 0.0 }
 0x283   : > { %v3249_v12 = vor.u32 %v3247_v45, %v3246_v27  ;;  %v3250_v8 = vrot.slane %v3246_v27, 4  ;;  %v3254_v54 = vrot.slane %v3252_v32, 7  ;;  %v3119_v19 = vmax.f32 %v3087_v39, 0.0  ;;  %v7226_v57 = vpop.f32.mrb[136].mxu0 }
 0x284   : > { %v3571_v29 = vsel %vm8058_vm8, %v3266_v61, %v3570_v49  ;;  %v3274_v38 = vor.u32 %v3272_v13, %v3271_v53  ;;  %v3276_v23 = vrot.slane %v3271_v53, 4  ;;  %v6229_v14 = vpack.c.bf16 %v3121_v20, %v3121_v20  ;;  %v2942_v2 = vpop.f32.mrb[137].mxu0 }
 0x285   : > { %3572 = vst [vmem:[#allocation2 + $0x18] sm:$0xf] %v3571_v29  ;;  %v3564_v16 = vsel %vm8058_vm8, %v3249_v12, %v3563_v37  ;;  %v3257_v46 = vor.u32 %v3255_v7, %v3254_v54  ;;  %v3259_v45 = vrot.slane %v3254_v54, 4  ;;  %v6227_v11 = vpack.c.bf16 %v3119_v19, %v3119_v19  ;;  %v7227_v17 = vpop.f32.mrb[138].mxu0  ;;  %v3584_v12 = vld [vmem:[#allocation2 + $0x30] sm:$0xf] }
 0x286   : > { %3565 = vst [vmem:[#allocation2 + $0xc] sm:$0xf] %v3564_v16  ;;  %v3275_v5 = vsel %vm8051_vm7, %v3267_v9, %v3274_v38  ;;  %v3575_v49 = vsel %vm8065_vm9, %v3276_v23, %v3574_v6  ;;  %v3295_v13 = vshrl.u32 %v6229_v14, 16  ;;  %v3298_v27 = vshll.u32 %v6229_v14, 16  ;;  %v2945_v32 = vpop.f32.mrb[139].mxu0 }
 0x287   : > { %3573 = vst [vmem:[#allocation2 + $0x1c] sm:$0xf] %v3275_v5  ;;  %3576 = vst [vmem:[#allocation2 + $0x20] sm:$0x1] %v3575_v49  ;;  %v3258_v39 = vsel %vm8051_vm7, %v3250_v8, %v3257_v46  ;;  %v3568_v7 = vsel %vm8065_vm9, %v3259_v45, %v3567_v0  ;;  %v3278_v31 = vshrl.u32 %v6227_v11, 16  ;;  %v3281_v61 = vshll.u32 %v6227_v11, 16 }
 0x288   : > { %3566 = vst [vmem:[#allocation2 + $0x10] sm:$0xf] %v3258_v39  ;;  %3569 = vst [vmem:[#allocation2 + $0x14] sm:$0x1] %v3568_v7  ;;  %v8799_v37 = vrot.slane %v3295_v13, 7  ;;  %v2938_v9 = vadd.f32 %v7223_v24, %v8681_v21  ;;  %v2930_v53 = vadd.f32 %v2929_v25, %v8675_v56  ;;  %v2951_v20 = vadd.f32 %v7226_v57, %v8695_v47  ;;  %v7567_v57 = vld [vmem:[#allocation8 + $0x168] sm:$0xff]  }
 0x289   : > { %v8804_v6 = vrot.slane %v3278_v31, 7  ;;  %v2943_v8 = vadd.f32 %v2942_v2, %v8685_v15  ;;  %v2954_v54 = vadd.f32 %v7227_v17, %v8697_v50  ;;  %v2946_v19 = vadd.f32 %v2945_v32, %v8687_v48  ;;  %v3577_v23 = vld [vmem:[#allocation2 + $0x24] sm:$0xf]  ;;  %6962 = vmatprep.subr.bf16.mxu1 %v7567_v57 }
 0x28a   : > { %v3300_v29 = vor.u32 %v3298_v27, %v8799_v37  ;;  %v3301_v38 = vrot.slane %v8799_v37, 4  ;;  %v3051_v21 = vmul.f32 %v8760_v40, %v2938_v9  ;;  %v3049_v56 = vmul.f32 %v8760_v40, %v2930_v53 }
 0x28b   : > { %v3283_v47 = vor.u32 %v3281_v61, %v8804_v6  ;;  %v3284_v24 = vrot.slane %v8804_v6, 4  ;;  %v3054_v25 = vmul.f32 %v8760_v40, %v2951_v20  ;;  %v3052_v15 = vmul.f32 %v8760_v40, %v2943_v8  ;;  %v7230_v50 = vpop.f32.mrb[140].mxu0 }
 0x28c   : > { %v3585_v48 = vsel %vm8058_vm8, %v3300_v29, %v3584_v12  ;;  %v3090_v0 = vadd.f32 %v8768_v55, %v3051_v21  ;;  %v3088_v14 = vadd.f32 %v8768_v55, %v3049_v56  ;;  %v3055_v2 = vmul.f32 %v8760_v40, %v2954_v54  ;;  %v2958_v16 = vpop.f32.mrb[141].mxu0  ;;  %v7570_v21 = vld [vmem:[#allocation8 + $0x128] sm:$0xff]  }
 0x28d   : > { %3586 = vst [vmem:[#allocation2 + $0x30] sm:$0xf] %v3585_v48  ;;  %v3578_v46 = vsel %vm8058_vm8, %v3283_v47, %v3577_v23  ;;  %v3093_v45 = vadd.f32 %v8768_v55, %v3054_v25  ;;  %v3091_v11 = vadd.f32 %v8768_v55, %v3052_v15  ;;  %v3053_v17 = vmul.f32 %v8760_v40, %v2946_v19  ;;  %v8827_v5 = vpop.f32.mrb[142].mxu0  ;;  %v3588_v15 = vld [vmem:[#allocation2 + $0x38] sm:$0x1] }
 0x28e   : > { %3579 = vst [vmem:[#allocation2 + $0x24] sm:$0xf] %v3578_v46  ;;  %v3122_v49 = vmax.f32 %v3090_v0, 0.0  ;;  %v3120_v13 = vmax.f32 %v3088_v14, 0.0  ;;  %v3094_v27 = vadd.f32 %v8768_v55, %v3055_v2  ;;  %v2967_v32 = vadd.f32 %v7230_v50, %v8707_v42  ;;  %v8831_v39 = vpop.f32.mrb[143].mxu0  ;;  %6963 = vmatpush3.bf16.msra.mxu1 %v7570_v21 }
 0x28f   : > { %v3125_v7 = vmax.f32 %v3093_v45, 0.0  ;;  %v3123_v31 = vmax.f32 %v3091_v11, 0.0  ;;  %v3092_v61 = vadd.f32 %v8768_v55, %v3053_v17  ;;  %v2959_v9 = vadd.f32 %v2958_v16, %v8701_v26  ;;  %v3581_v16 = vld [vmem:[#allocation2 + $0x2c] sm:$0x1] }
 0x290   : > { %v6230_v53 = vpack.c.bf16 %v3122_v49, %v3122_v49  ;;  %v6228_v20 = vpack.c.bf16 %v3120_v13, %v3120_v13  ;;  %v3126_v12 = vmax.f32 %v3094_v27, 0.0  ;;  %v3058_v8 = vmul.f32 %v8760_v40, %v2967_v32  ;;  %v3598_v49 = vld [vmem:[#allocation2 + $0x48] sm:$0xf] }
 0x291   : > { %v6233_v54 = vpack.c.bf16 %v3125_v7, %v3125_v7  ;;  %v6231_v19 = vpack.c.bf16 %v3123_v31, %v3123_v31  ;;  %v3124_v29 = vmax.f32 %v3092_v61, 0.0  ;;  %v3056_v23 = vmul.f32 %v8760_v40, %v2959_v9 }
 0x292   : > { %v3303_v42 = vshrl.u32 %v6230_v53, 16  ;;  %v3306_v56 = vshll.u32 %v6230_v53, 16  ;;  %v3286_v47 = vshrl.u32 %v6228_v20, 16  ;;  %v3289_v25 = vshll.u32 %v6228_v20, 16  ;;  %v3591_v20 = vld [vmem:[#allocation2 + $0x3c] sm:$0xf] }
 0x293   : > { %v3329_v50 = vshrl.u32 %v6233_v54, 16  ;;  %v3332_v57 = vshll.u32 %v6233_v54, 16  ;;  %v3312_v48 = vshrl.u32 %v6231_v19, 16  ;;  %v3315_v26 = vshll.u32 %v6231_v19, 16  ;;  %v7234_v0 = vpop.f32.mrb[144].mxu0 }
 0x294   : > { %v3305_v14 = vrot.slane %v3303_v42, 7  ;;  %v3288_v2 = vrot.slane %v3286_v47, 7  ;;  %v6234_v46 = vpack.c.bf16 %v3126_v12, %v3126_v12  ;;  %v6232_v45 = vpack.c.bf16 %v3124_v29, %v3124_v29  ;;  %v8837_v11 = vpop.f32.mrb[145].mxu0  ;;  %v8865_v47 = vld [vmem:[#allocation2 + $0x10] sm:$0xf] }
 0x295   : > { %v8839_v17 = vrot.slane %v3329_v50, 7  ;;  %v8841_v13 = vrot.slane %v3312_v48, 7  ;;  %v3097_v27 = vadd.f32 %v8768_v55, %v3058_v8  ;;  %v3095_v32 = vadd.f32 %v8768_v55, %v3056_v23  ;;  %v8845_v7 = vpop.f32.mrb[146].mxu0  ;;  %v3677_v48 = vld [vmem:[#allocation2 + $0xc] sm:$0xf] }
 0x296   : > { %v3308_v31 = vor.u32 %v3306_v56, %v3305_v14  ;;  %v3310_v61 = vrot.slane %v3305_v14, 4  ;;  %v3291_v9 = vor.u32 %v3289_v25, %v3288_v2  ;;  %v3293_v53 = vrot.slane %v3288_v2, 4  ;;  %v8847_v12 = vpop.f32.mrb[147].mxu0 }
 0x297   : > { %v3334_v54 = vor.u32 %v3332_v57, %v8839_v17  ;;  %v3335_v19 = vrot.slane %v8839_v17, 4  ;;  %v3317_v29 = vor.u32 %v3315_v26, %v8841_v13  ;;  %v3318_v21 = vrot.slane %v8841_v13, 4  ;;  %v3602_v13 = vld [vmem:[#allocation2 + $0x50] sm:$0x1] }
 0x298   : > { %v3309_v8 = vsel %vm8051_vm7, %v3301_v38, %v3308_v31  ;;  %v3589_v23 = vsel %vm8065_vm9, %v3310_v61, %v3588_v15  ;;  %v3292_v42 = vsel %vm8051_vm7, %v3284_v24, %v3291_v9  ;;  %v3582_v56 = vsel %vm8065_vm9, %v3293_v53, %v3581_v16  ;;  %v7565_v9 = vld [vmem:[#allocation8 + $0x1c8] sm:$0xff]  }
 0x299   : > { %3587 = vst [vmem:[#allocation2 + $0x34] sm:$0xf] %v3309_v8  ;;  %3590 = vst [vmem:[#allocation2 + $0x38] sm:$0x1] %v3589_v23  ;;  %v3599_v37 = vsel %vm8058_vm8, %v3334_v54, %v3598_v49  ;;  %v3592_v38 = vsel %vm8058_vm8, %v3317_v29, %v3591_v20  ;;  %v3337_v25 = vshrl.u32 %v6234_v46, 16  ;;  %v3340_v6 = vshll.u32 %v6234_v46, 16 }
 0x29a   : > { %3580 = vst [vmem:[#allocation2 + $0x28] sm:$0xf] %v3292_v42  ;;  %3583 = vst [vmem:[#allocation2 + $0x2c] sm:$0x1] %v3582_v56  ;;  %v3320_v24 = vshrl.u32 %v6232_v45, 16  ;;  %v3323_v15 = vshll.u32 %v6232_v45, 16  ;;  %v2970_v14 = vadd.f32 %v8827_v5, %v8709_v28  ;;  %v2962_v2 = vadd.f32 %v8831_v39, %v8703_v3 }
 0x29b   : > { %3600 = vst [vmem:[#allocation2 + $0x48] sm:$0xf] %v3599_v37  ;;  %3593 = vst [vmem:[#allocation2 + $0x3c] sm:$0xf] %v3592_v38  ;;  %v3129_v50 = vmax.f32 %v3097_v27, 0.0  ;;  %v3127_v57 = vmax.f32 %v3095_v32, 0.0  ;;  %v8876_v16 = vcombine.low %v3677_v48, %v8865_v47  ;;  %v2983_v32 = vadd.f32 %v7234_v0, %v8719_v63 }
 0x29c   : > { %v3339_v26 = vrot.slane %v3337_v25, 7  ;;  %v8878_v17 = vpop.f32.mrb[148].mxu0  ;;  %v7556_v46 = vld [vmem:[#allocation8 + $0x180] sm:$0xff]   ;;  %v7577_v49 = vld [vmem:[#allocation8 + $0x170] sm:$0xff]   ;;  %v3322_v31 = vrot.slane %v3320_v24, 7  ;;  %v3059_v3 = vmul.f32 %v8760_v40, %v2970_v14  ;;  %v3057_v39 = vmul.f32 %v8760_v40, %v2962_v2  ;;  %v7566_v25 = vld [vmem:[#allocation8 + $0x188] sm:$0xff]  }
 0x29d   : > { %v6237_v45 = vpack.c.bf16 %v3129_v50, %v3129_v50  ;;  %v6235_v27 = vpack.c.bf16 %v3127_v57, %v3127_v57  ;;  %v8881_v61 = vpop.f32.mrb[149].mxu0  ;;  %v3595_v53 = vld [vmem:[#allocation2 + $0x44] sm:$0x1]  ;;  %5038 = vmatprep.mubr.bf16.mxu0 %v8876_v16  ;;  %6964 = vmatprep.subr.bf16.mxu1 %v7577_v49  ;;  %v8895_v38 = vld [vmem:[#allocation2 + $0x1c] sm:$0xf]  ;;  %v3062_v48 = vmul.f32 %v8760_v40, %v2983_v32  ;;  %v7575_v14 = vld [vmem:[#allocation8 + $0x1d0] sm:$0xff]  }
 0x29e   : > { %v3342_v28 = vor.u32 %v3340_v6, %v3339_v26  ;;  %v3344_v5 = vrot.slane %v3339_v26, 4  ;;  %v8886_v20 = vpop.f32.mrb[150].mxu0  ;;  %v3325_v54 = vor.u32 %v3323_v15, %v3322_v31  ;;  %v3327_v29 = vrot.slane %v3322_v31, 4  ;;  %5039 = vmatmul.mubr.bf16.vlgmr.msra.gmra.mrb[160].mxu0 %v8692_v60  ;;  %v3612_v15 = vld [vmem:[#allocation2 + $0x60] sm:$0xf] }
 0x29f   : > { %v3363_v8 = vshrl.u32 %v6237_v45, 16  ;;  %v3366_v23 = vshll.u32 %v6237_v45, 16  ;;  %v8889_v63 = vpop.f32.mrb[151].mxu0  ;;  %v3346_v56 = vshrl.u32 %v6235_v27, 16  ;;  %v3349_v37 = vshll.u32 %v6235_v27, 16  ;;  %7065 = vmatpush3.bf16.msra.mxu0 %v7556_v46 }
 0x2a0   : > { %v3343_v0 = vsel %vm8051_vm7, %v3335_v19, %v3342_v28  ;;  %v3603_v42 = vsel %vm8065_vm9, %v3344_v5, %v3602_v13  ;;  %v3326_v6 = vsel %vm8051_vm7, %v3318_v21, %v3325_v54  ;;  %v3596_v60 = vsel %vm8065_vm9, %v3327_v29, %v3595_v53  ;;  %7066 = vmatprep.subr.bf16.mxu0 %v7565_v9  ;;  %v3679_v26 = vld [vmem:[#allocation2 + $0x18] sm:$0xf]  ;;  %v3605_v49 = vld [vmem:[#allocation2 + $0x54] sm:$0xf]  ;;  %v7580_v54 = vld [vmem:[#allocation8 + $0x130] sm:$0xff]  }
 0x2a1   : > { %3601 = vst [vmem:[#allocation2 + $0x4c] sm:$0xf] %v3343_v0  ;;  %3604 = vst [vmem:[#allocation2 + $0x50] sm:$0x1] %v3603_v42  ;;  %v8901_v24 = vrot.slane %v3363_v8, 7  ;;  %v3098_v19 = vadd.f32 %v8768_v55, %v3059_v3  ;;  %v8904_v50 = vrot.slane %v3346_v56, 7  ;;  %v3096_v57 = vadd.f32 %v8768_v55, %v3057_v39  ;;  %6965 = vmatpush3.bf16.msra.mxu1 %v7580_v54 }
 0x2a2   : > { %3594 = vst [vmem:[#allocation2 + $0x40] sm:$0xf] %v3326_v6  ;;  %3597 = vst [vmem:[#allocation2 + $0x44] sm:$0x1] %v3596_v60  ;;  %v2975_v21 = vadd.f32 %v8837_v11, %v8713_v59  ;;  %v8913_v31 = vcombine.low %v3679_v26, %v8895_v38  ;;  %v3101_v32 = vadd.f32 %v8768_v55, %v3062_v48  ;;  %v7576_v59 = vld [vmem:[#allocation8 + $0x190] sm:$0xff]  }
 0x2a3   : > { %v3368_v2 = vor.u32 %v3366_v23, %v8901_v24  ;;  %v3369_v46 = vrot.slane %v8901_v24, 4  ;;  %v3130_v13 = vmax.f32 %v3098_v19, 0.0  ;;  %v3351_v45 = vor.u32 %v3349_v37, %v8904_v50  ;;  %v8918_v28 = vpop.f32.mrb[152].mxu0  ;;  %7067 = vmatpush3.bf16.msra.mxu0 %v7566_v25  ;;  %v3616_v6 = vld [vmem:[#allocation2 + $0x68] sm:$0x1] }
 0x2a4   : > { %v3352_v27 = vrot.slane %v8904_v50, 4  ;;  %v3128_v9 = vmax.f32 %v3096_v57, 0.0  ;;  %v3060_v53 = vmul.f32 %v8760_v40, %v2975_v21  ;;  %5046 = vmatprep.mubr.bf16.mxu0 %v8913_v31  ;;  %v2986_v3 = vadd.f32 %v8845_v7, %v8721_v62  ;;  %v8926_v39 = vpop.f32.mrb[153].mxu0  ;;  %7068 = vmatprep.subr.bf16.mxu0 %v7575_v14 }
 0x2a5   : > { %v3613_v11 = vsel %vm8058_vm8, %v3368_v2, %v3612_v15  ;;  %v6238_v5 = vpack.c.bf16 %v3130_v13, %v3130_v13  ;;  %v3606_v29 = vsel %vm8058_vm8, %v3351_v45, %v3605_v49  ;;  %v3133_v23 = vmax.f32 %v3101_v32, 0.0  ;;  %v8932_v42 = vpop.f32.mrb[154].mxu0 }
 0x2a6   : > { %3614 = vst [vmem:[#allocation2 + $0x60] sm:$0xf] %v3613_v11  ;;  %v6236_v8 = vpack.c.bf16 %v3128_v9, %v3128_v9  ;;  %v2978_v0 = vadd.f32 %v8847_v12, %v8715_v43  ;;  %3607 = vst [vmem:[#allocation2 + $0x54] sm:$0xf] %v3606_v29  ;;  %v3099_v62 = vadd.f32 %v8768_v55, %v3060_v53  ;;  %v8936_v25 = vpop.f32.mrb[155].mxu0  ;;  %v3904_v21 = vshrl.u32 %v8876_v16, 16 }
 0x2a7   : > { %v3371_v56 = vshrl.u32 %v6238_v5, 16  ;;  %v3374_v37 = vshll.u32 %v6238_v5, 16  ;;  %v3063_v7 = vmul.f32 %v8760_v40, %v2986_v3  ;;  %v6241_v19 = vpack.c.bf16 %v3133_v23, %v3133_v23  ;;  %7069 = vmatpush3.bf16.msra.mxu0 %v7576_v59  ;;  %v3609_v12 = vld [vmem:[#allocation2 + $0x5c] sm:$0x1]  ;;  %v7585_v5 = vld [vmem:[#allocation8 + $0x1d8] sm:$0xff]  }
 0x2a8   : > { %v3354_v60 = vshrl.u32 %v6236_v8, 16  ;;  %v3357_v24 = vshll.u32 %v6236_v8, 16  ;;  %v3061_v15 = vmul.f32 %v8760_v40, %v2978_v0  ;;  %v3131_v57 = vmax.f32 %v3099_v62, 0.0  ;;  %v8942_v11 = vld [vmem:[#allocation2 + $0x14] ss:$0 sps:$4 sm:$0x11]   ;;  %7070 = vmatprep.subr.bf16.mxu0 %v7585_v5 }
 0x2a9   : > { %v3373_v43 = vrot.slane %v3371_v56, 7  ;;  %v3102_v48 = vadd.f32 %v8768_v55, %v3063_v7  ;;  %v3397_v14 = vshrl.u32 %v6241_v19, 16  ;;  %v3400_v2 = vshll.u32 %v6241_v19, 16  ;;  %v7586_v8 = vld [vmem:[#allocation8 + $0x198] sm:$0xff]  }
 0x2aa   : > { %v3356_v26 = vrot.slane %v3354_v60, 7  ;;  %v3100_v49 = vadd.f32 %v8768_v55, %v3061_v15  ;;  %v6239_v9 = vpack.c.bf16 %v3131_v57, %v3131_v57  ;;  %v7587_v23 = vld [vmem:[#allocation8 + $0x178] sm:$0xff]   ;;  %v3619_v57 = vld [vmem:[#allocation2 + $0x6c] sm:$0xf] }
 0x2ab   : > { %v3376_v13 = vor.u32 %v3374_v37, %v3373_v43  ;;  %v3378_v45 = vrot.slane %v3373_v43, 4  ;;  %v3134_v32 = vmax.f32 %v3102_v48, 0.0  ;;  %v8944_v3 = vrot.slane %v3397_v14, 7  ;;  %v8946_v29 = vpop.f32.mrb[156].mxu0  ;;  %v3626_v37 = vld [vmem:[#allocation2 + $0x78] sm:$0xf]  ;;  %7071 = vmatpush3.bf16.msra.mxu0 %v7586_v8  ;;  %6966 = vmatprep.subr.bf16.mxu1 %v7587_v23 }
 0x2ac   : > { %v3359_v59 = vor.u32 %v3357_v24, %v3356_v26  ;;  %v3361_v53 = vrot.slane %v3356_v26, 4  ;;  %v3132_v54 = vmax.f32 %v3100_v49, 0.0  ;;  %v3380_v62 = vshrl.u32 %v6239_v9, 16  ;;  %v8952_v60 = vpop.f32.mrb[157].mxu0  ;;  %v7590_v8 = vld [vmem:[#allocation8 + $0x138] sm:$0xff]   ;;  %v7591_v23 = vld [vmem:[#allocation8 + $0x1e0] sm:$0xff]  }
 0x2ad   : > { %v3377_v0 = vsel %vm8051_vm7, %v3369_v46, %v3376_v13  ;;  %v3617_v56 = vsel %vm8065_vm9, %v3378_v45, %v3616_v6  ;;  %v3383_v7 = vshll.u32 %v6239_v9, 16  ;;  %v3402_v46 = vor.u32 %v3400_v2, %v8944_v3  ;;  %v8962_v15 = vpop.f32.mrb[158].mxu0  ;;  %v8972_v49 = vld [vmem:[#allocation2 + $0x20] ss:$0 sps:$4 sm:$0x11]   ;;  %6967 = vmatpush3.bf16.msra.mxu1 %v7590_v8  ;;  %7072 = vmatprep.subr.bf16.mxu0 %v7591_v23 }
 0x2ae   : > { %3615 = vst [vmem:[#allocation2 + $0x64] sm:$0xf] %v3377_v0  ;;  %3618 = vst [vmem:[#allocation2 + $0x68] sm:$0x1] %v3617_v56  ;;  %v3360_v24 = vsel %vm8051_vm7, %v3352_v27, %v3359_v59  ;;  %v3610_v19 = vsel %vm8065_vm9, %v3361_v53, %v3609_v12  ;;  %v3403_v6 = vrot.slane %v8944_v3, 4  ;;  %v3382_v43 = vrot.slane %v3380_v62, 7 }
 0x2af   : > { %3608 = vst [vmem:[#allocation2 + $0x58] sm:$0xf] %v3360_v24  ;;  %3611 = vst [vmem:[#allocation2 + $0x5c] sm:$0x1] %v3610_v19  ;;  %v6242_v48 = vpack.c.bf16 %v3134_v32, %v3134_v32  ;;  %v6240_v50 = vpack.c.bf16 %v3132_v54, %v3132_v54  ;;  %v3906_v26 = vshll.u32 %v8876_v16, 16  ;;  %v8965_v27 = vpop.f32.mrb[159].mxu0  ;;  %v3627_v12 = vsel %vm8058_vm8, %v3402_v46, %v3626_v37 }
 0x2b0   : > { %v3911_v14 = vshll.u32 %v8942_v11, 16  ;;  %v2999_v2 = vadd.f32 %v8878_v17, %v8731_v35  ;;  %v3916_v13 = vshrl.u32 %v8913_v31, 16  ;;  %3628 = vst [vmem:[#allocation2 + $0x78] sm:$0xf] %v3627_v12  ;;  %v3385_v45 = vor.u32 %v3383_v7, %v3382_v43  ;;  %v3730_v37 = vld [vmem:[#allocation2 + $0xc] sm:$0xe] }
 0x2b1   : > { %v3386_v9 = vrot.slane %v3382_v43, 4  ;;  %v3405_v32 = vshrl.u32 %v6242_v48, 16  ;;  %v3408_v5 = vshll.u32 %v6242_v48, 16  ;;  %v3388_v59 = vshrl.u32 %v6240_v50, 16  ;;  %v7593_v62 = vld [vmem:[#allocation8 + $0x1a0] sm:$0xff]   ;;  %v7594_v7 = vld [vmem:[#allocation8 + $0x1e8] sm:$0xff]  }
 0x2b2   : > { %v3391_v53 = vshll.u32 %v6240_v50, 16  ;;  %v3908_v3 = vrot.slane %v3906_v26, 1  ;;  %v3913_v54 = vrot.slane %v3911_v14, 1  ;;  %v3620_v0 = vsel %vm8058_vm8, %v3385_v45, %v3619_v57  ;;  %v3630_v24 = vld [vmem:[#allocation2 + $0x80] sm:$0x1]  ;;  %7073 = vmatpush3.bf16.msra.mxu0 %v7593_v62 }
 0x2b3   : > { %v3407_v56 = vrot.slane %v3405_v32, 7  ;;  %v3066_v35 = vmul.f32 %v8760_v40, %v2999_v2  ;;  %v3918_v17 = vshll.u32 %v8913_v31, 16  ;;  %3621 = vst [vmem:[#allocation2 + $0x6c] sm:$0xf] %v3620_v0  ;;  %v3390_v19 = vrot.slane %v3388_v59, 7  ;;  %v7595_v2 = vld [vmem:[#allocation8 + $0x1a8] sm:$0xff]   ;;  %7074 = vmatprep.subr.bf16.mxu0 %v7594_v7 }
 0x2b4   : > { %v3623_v46 = vld [vmem:[#allocation2 + $0x74] sm:$0x1]  ;;  %v3909_v43 = vor.u32 %v3908_v3, %v3904_v21  ;;  %v3923_v48 = vshll.u32 %v8972_v49, 16  ;;  %v6092_v50 = vcombine.low %v3730_v37, %v8865_v47  ;;  %v8987_v21 = vld [vmem:[#allocation2 + $0x28] sm:$0xf]  ;;  %v2994_v62 = vadd.f32 %v8889_v63, %v8727_v44 }
 0x2b5   : > { %v3410_v57 = vor.u32 %v3408_v5, %v3407_v56  ;;  %v3412_v26 = vrot.slane %v3407_v56, 4  ;;  %v3105_v12 = vadd.f32 %v8768_v55, %v3066_v35  ;;  %v3920_v14 = vrot.slane %v3918_v17, 1  ;;  %v3681_v56 = vld [vmem:[#allocation2 + $0x24] sm:$0xf]  ;;  %v7598_v7 = vld [vmem:[#allocation8 + $0x1b0] sm:$0xff]  }
 0x2b6   : > { %v3393_v45 = vor.u32 %v3391_v53, %v3390_v19  ;;  %v3395_v32 = vrot.slane %v3390_v19, 4  ;;  %v8985_v59 = vsel %vm1276_vm0, %v3909_v43, %v3913_v54  ;;  %v3925_v0 = vrot.slane %v3923_v48, 1  ;;  %v9008_v37 = vld [vmem:[#allocation2 + $0x2c] ss:$0 sps:$4 sm:$0x11]   ;;  %7075 = vmatpush3.bf16.msra.mxu0 %v7595_v2  ;;  %v7599_v48 = vld [vmem:[#allocation8 + $0x1f8] sm:$0xff]  }
 0x2b7   : > { %v3411_v47 = vsel %vm8051_vm7, %v3403_v6, %v3410_v57  ;;  %v3631_v5 = vsel %vm8065_vm9, %v3412_v26, %v3630_v24  ;;  %4885 = vmatprep.mubr.bf16.mxu1 %v8985_v59  ;;  %v3137_v3 = vmax.f32 %v3105_v12, 0.0  ;;  %v3921_v8 = vor.u32 %v3920_v14, %v3916_v13  ;;  %v3731_v63 = vld [vmem:[#allocation2 + $0x18] sm:$0xe]  ;;  %v7600_v14 = vld [vmem:[#allocation8 + $0x1b8] sm:$0xff]  }
 0x2b8   : > { %3629 = vst [vmem:[#allocation2 + $0x7c] sm:$0xf] %v3411_v47  ;;  %3632 = vst [vmem:[#allocation2 + $0x80] sm:$0x1] %v3631_v5  ;;  %v3394_v53 = vsel %vm8051_vm7, %v3386_v9, %v3393_v45  ;;  %v3624_v54 = vsel %vm8065_vm9, %v3395_v32, %v3623_v46  ;;  %4886 = vmatmul.mubr.bf16.gmra.mrb[132].mxu1 %v8876_v16  ;;  %v4150_v23 = vrot.slane %v6092_v50, 1  ;;  %v4151_v6 = vrot.slane %v8942_v11, 1 }
 0x2b9   : > { %3622 = vst [vmem:[#allocation2 + $0x70] sm:$0xf] %v3394_v53  ;;  %3625 = vst [vmem:[#allocation2 + $0x74] sm:$0x1] %v3624_v54  ;;  %v6245_v35 = vpack.c.bf16 %v3137_v3, %v3137_v3  ;;  %v9001_v17 = vsel %vm1276_vm0, %v3921_v8, %v3925_v0  ;;  %v2991_v13 = vadd.f32 %v8881_v61, %v8725_v18  ;;  %v7597_v61 = vld [vmem:[#allocation8 + $0x1f0] sm:$0xff]   ;;  %v3935_v26 = vshll.u32 %v9008_v37, 16 }
 0x2ba   : > { %v9006_v9 = vcombine.low %v3681_v56, %v8987_v21  ;;  %4893 = vmatprep.mubr.bf16.mxu1 %v9001_v17  ;;  %v9012_v16 = vsel %vm1533_vm5, %v4150_v23, %v4151_v6  ;;  %v3002_v11 = vadd.f32 %v8886_v20, %v8733_v51  ;;  %v3015_v18 = vadd.f32 %v8918_v28, %v8743_v1  ;;  %v9028_v28 = vld [vmem:[#allocation8 + $0x200] sm:$0xff]   ;;  %v3640_v2 = vld [vmem:[#allocation2 + $0x90] sm:$0xf] }
 0x2bb   : > { %v3431_v24 = vshrl.u32 %v6245_v35, 16  ;;  %v3434_v19 = vshll.u32 %v6245_v35, 16  ;;  %5047 = vmatmul.mubr.bf16.gmra.mrb[164].mxu0 %v9012_v16  ;;  %v3064_v46 = vmul.f32 %v8760_v40, %v2991_v13  ;;  %v3065_v44 = vmul.f32 %v8760_v40, %v2994_v62  ;;  %7076 = vmatprep.subr.bf16.mxu0 %v7597_v61 }
 0x2bc   : > { %v3928_v43 = vshrl.u32 %v9006_v9, 16  ;;  %5054 = vmatprep.mubr.bf16.mxu0 %v9006_v9  ;;  %v3067_v51 = vmul.f32 %v8760_v40, %v3002_v11  ;;  %v3070_v20 = vmul.f32 %v8760_v40, %v3015_v18  ;;  %v3930_v1 = vshll.u32 %v9006_v9, 16  ;;  %7077 = vmatpush3.bf16.msra.mxu0 %v7598_v7 }
 0x2bd   : > { %v9030_v50 = vrot.slane %v3431_v24, 7  ;;  %v3103_v57 = vadd.f32 %v8768_v55, %v3064_v46  ;;  %v6093_v12 = vcombine.low %v3731_v63, %v8895_v38  ;;  %v3104_v32 = vadd.f32 %v8768_v55, %v3065_v44  ;;  %7078 = vmatprep.subr.bf16.mxu0 %v7599_v48  ;;  %7248 = vmatprep.subr.bf16.mxu1 %v9028_v28  ;;  %v9054_v48 = vld [vmem:[#allocation2 + $0x34] sm:$0xf] }
 0x2be   : > { %v3106_v45 = vadd.f32 %v8768_v55, %v3067_v51  ;;  %v3109_v0 = vadd.f32 %v8768_v55, %v3070_v20  ;;  %v3932_v47 = vrot.slane %v3930_v1, 1  ;;  %v3937_v53 = vrot.slane %v3935_v26, 1  ;;  %v3683_v26 = vld [vmem:[#allocation2 + $0x30] sm:$0xf] }
 0x2bf   : > { %v3436_v5 = vor.u32 %v3434_v19, %v9030_v50  ;;  %v3437_v3 = vrot.slane %v9030_v50, 4  ;;  %v3135_v8 = vmax.f32 %v3103_v57, 0.0  ;;  %v3136_v54 = vmax.f32 %v3104_v32, 0.0 }
 0x2c0   : > { %v3138_v38 = vmax.f32 %v3106_v45, 0.0  ;;  %4894 = vmatmul.mubr.bf16.gmra.mrb[136].mxu1 %v8913_v31  ;;  %v3141_v23 = vmax.f32 %v3109_v0, 0.0  ;;  %v3933_v6 = vor.u32 %v3932_v47, %v3928_v43  ;;  %v4153_v13 = vrot.slane %v6093_v12, 1  ;;  %7079 = vmatpush3.bf16.msra.mxu0 %v7600_v14  ;;  %v3633_v12 = vld [vmem:[#allocation2 + $0x84] sm:$0xf] }
 0x2c1   : > { %v3641_v56 = vsel %vm8058_vm8, %v3436_v5, %v3640_v2  ;;  %v6243_v35 = vpack.c.bf16 %v3135_v8, %v3135_v8  ;;  %v4154_v11 = vrot.slane %v8972_v49, 1  ;;  %v6244_v18 = vpack.c.bf16 %v3136_v54, %v3136_v54  ;;  %v3644_v2 = vld [vmem:[#allocation2 + $0x98] sm:$0x1]  ;;  %v3637_v47 = vld [vmem:[#allocation2 + $0x8c] sm:$0x1] }
 0x2c2   : > { %3642 = vst [vmem:[#allocation2 + $0x90] sm:$0xf] %v3641_v56  ;;  %v6246_v62 = vpack.c.bf16 %v3138_v38, %v3138_v38  ;;  %v6249_v61 = vpack.c.bf16 %v3141_v23, %v3141_v23  ;;  %v9046_v7 = vsel %vm1276_vm0, %v3933_v6, %v3937_v53  ;;  %v3007_v43 = vadd.f32 %v8926_v39, %v8737_v10  ;;  %v3654_v8 = vld [vmem:[#allocation2 + $0xa8] sm:$0xf] }
 0x2c3   : > { %v3414_v24 = vshrl.u32 %v6243_v35, 16  ;;  %v3417_v19 = vshll.u32 %v6243_v35, 16  ;;  %4901 = vmatprep.mubr.bf16.mxu1 %v9046_v7  ;;  %v9050_v46 = vsel %vm1533_vm5, %v4153_v13, %v4154_v11  ;;  %v3422_v44 = vshrl.u32 %v6244_v18, 16  ;;  %v9068_v56 = vld [vmem:[#allocation2 + $0x38] ss:$0 sps:$4 sm:$0x11]  }
 0x2c4   : > { %v3439_v49 = vshrl.u32 %v6246_v62, 16  ;;  %v3442_v51 = vshll.u32 %v6246_v62, 16  ;;  %v3425_v20 = vshll.u32 %v6244_v18, 16  ;;  %5055 = vmatmul.mubr.bf16.gmra.mrb[168].mxu0 %v9050_v46  ;;  %v3465_v63 = vshrl.u32 %v6249_v61, 16 }
 0x2c5   : > { %v3416_v1 = vrot.slane %v3414_v24, 7  ;;  %v3468_v50 = vshll.u32 %v6249_v61, 16  ;;  %v3068_v57 = vmul.f32 %v8760_v40, %v3007_v43  ;;  %v3424_v45 = vrot.slane %v3422_v44, 7 }
 0x2c6   : > { %v3441_v14 = vrot.slane %v3439_v49, 7  ;;  %v9059_v10 = vcombine.low %v3683_v26, %v9054_v48  ;;  %v3018_v39 = vadd.f32 %v8932_v42, %v8745_v52  ;;  %v9063_v5 = vrot.slane %v3465_v63, 7 }
 0x2c7   : > { %v3419_v32 = vor.u32 %v3417_v19, %v3416_v1  ;;  %v3420_v0 = vrot.slane %v3416_v1, 4  ;;  %v3107_v53 = vadd.f32 %v8768_v55, %v3068_v57  ;;  %v3427_v23 = vor.u32 %v3425_v20, %v3424_v45  ;;  %v9094_v1 = vld [vmem:[%s9801_s5] ss:$0 sm:$0xff] }
 0x2c8   : > { %v3444_v38 = vor.u32 %v3442_v51, %v3441_v14  ;;  %v3446_v54 = vrot.slane %v3441_v14, 4  ;;  %v3429_v6 = vrot.slane %v3424_v45, 4  ;;  %5062 = vmatprep.mubr.bf16.mxu0 %v9059_v10  ;;  %4902 = vmatmul.mubr.bf16.gmra.mrb[140].mxu1 %v9006_v9  ;;  %v3470_v42 = vor.u32 %v3468_v50, %v9063_v5  ;;  %v3647_v45 = vld [vmem:[#allocation2 + $0x9c] sm:$0xf] }
 0x2c9   : > { %v3634_v52 = vsel %vm8058_vm8, %v3419_v32, %v3633_v12  ;;  %v3139_v35 = vmax.f32 %v3107_v53, 0.0  ;;  %v3428_v11 = vsel %vm8051_vm7, %v3420_v0, %v3427_v23  ;;  %v3071_v24 = vmul.f32 %v8760_v40, %v3018_v39 }
 0x2ca   : > { %3635 = vst [vmem:[#allocation2 + $0x84] sm:$0xf] %v3634_v52  ;;  %v3445_v55 = vsel %vm8051_vm7, %v3437_v3, %v3444_v38  ;;  %v3645_v13 = vsel %vm8065_vm9, %v3446_v54, %v3644_v2  ;;  %v3638_v62 = vsel %vm8065_vm9, %v3429_v6, %v3637_v47  ;;  %3636 = vst [vmem:[#allocation2 + $0x88] sm:$0xf] %v3428_v11  ;;  %v3940_v43 = vshrl.u32 %v9059_v10, 16 }
 0x2cb   : > { %3643 = vst [vmem:[#allocation2 + $0x94] sm:$0xf] %v3445_v55  ;;  %3646 = vst [vmem:[#allocation2 + $0x98] sm:$0x1] %v3645_v13  ;;  %v3655_v18 = vsel %vm8058_vm8, %v3470_v42, %v3654_v8  ;;  %v6247_v61 = vpack.c.bf16 %v3139_v35, %v3139_v35  ;;  %v3010_v3 = vadd.f32 %v8936_v25, %v8739_v4  ;;  %v3942_v49 = vshll.u32 %v9059_v10, 16 }
 0x2cc   : > { %3639 = vst [vmem:[#allocation2 + $0x8c] sm:$0x1] %v3638_v62  ;;  %3656 = vst [vmem:[#allocation2 + $0xa8] sm:$0xf] %v3655_v18  ;;  %v3031_v19 = vadd.f32 %v8946_v29, %v8755_v41  ;;  %v3947_v51 = vshll.u32 %v9068_v56, 16  ;;  %v3110_v40 = vadd.f32 %v9094_v1, %v3071_v24  ;;  %v4157_v2 = vrot.slane %v9008_v37, 1 }
 0x2cd   : > { %v3448_v44 = vshrl.u32 %v6247_v61, 16  ;;  %v3451_v20 = vshll.u32 %v6247_v61, 16  ;;  %v7617_v4 = vld [vmem:[%s9800_s4] ss:$0 sm:$0xff]  ;;  %v3732_v25 = vld [vmem:[#allocation2 + $0x24] sm:$0xe]  ;;  %v3023_v47 = vadd.f32 %v8952_v60, %v8749_v33  ;;  %v3034_v62 = vadd.f32 %v8962_v15, %v8762_v58 }
 0x2ce   : > { %v3069_v41 = vmul.f32 %v7617_v4, %v3010_v3  ;;  %v3074_v29 = vmul.f32 %v7617_v4, %v3031_v19  ;;  %v3944_v63 = vrot.slane %v3942_v49, 1  ;;  %v3949_v50 = vrot.slane %v3947_v51, 1  ;;  %v9110_v54 = vld [vmem:[#allocation2 + $0x40] sm:$0xf]  ;;  %v3685_v35 = vld [vmem:[#allocation2 + $0x3c] sm:$0xf] }
 0x2cf   : > { %v6094_v57 = vcombine.low %v3732_v25, %v8987_v21  ;;  %v9101_v26 = vrot.slane %v3448_v44, 7  ;;  %v3142_v12 = vmax.f32 %v3110_v40, 0.0  ;;  %v3471_v8 = vrot.slane %v9063_v5, 4  ;;  %v3658_v19 = vld [vmem:[#allocation2 + $0xb0] sm:$0x1] }
 0x2d0   : > { %v3108_v14 = vadd.f32 %v9094_v1, %v3069_v41  ;;  %v3113_v39 = vadd.f32 %v9094_v1, %v3074_v29  ;;  %v3945_v32 = vor.u32 %v3944_v63, %v3940_v43  ;;  %v3072_v52 = vmul.f32 %v7617_v4, %v3023_v47  ;;  %v3651_v25 = vld [vmem:[#allocation2 + $0xa4] sm:$0x1] }
 0x2d1   : > { %v4156_v0 = vrot.slane %v6094_v57, 1  ;;  %v3453_v53 = vor.u32 %v3451_v20, %v9101_v26  ;;  %v6250_v21 = vpack.c.bf16 %v3142_v12, %v3142_v12  ;;  %v3454_v42 = vrot.slane %v9101_v26, 4  ;;  %v9136_v57 = vld [vmem:[#allocation2 + $0x44] ss:$0 sps:$4 sm:$0x11]  }
 0x2d2   : > { %v3140_v38 = vmax.f32 %v3108_v14, 0.0  ;;  %v3145_v23 = vmax.f32 %v3113_v39, 0.0  ;;  %v9113_v6 = vsel %vm1276_vm0, %v3945_v32, %v3949_v50  ;;  %v3111_v13 = vadd.f32 %v9094_v1, %v3072_v52  ;;  %v3668_v14 = vld [vmem:[#allocation2 + $0xc0] sm:$0xf] }
 0x2d3   : > { %v9116_v37 = vsel %vm1533_vm5, %v4156_v0, %v4157_v2  ;;  %v3648_v33 = vsel %vm8058_vm8, %v3453_v53, %v3647_v45  ;;  %v3473_v60 = vshrl.u32 %v6250_v21, 16  ;;  %4909 = vmatprep.mubr.bf16.mxu1 %v9113_v6  ;;  %v9125_v11 = vcombine.low %v3685_v35, %v9110_v54  ;;  %v3733_v53 = vld [vmem:[#allocation2 + $0x30] sm:$0xe] }
 0x2d4   : > { %v6248_v5 = vpack.c.bf16 %v3140_v38, %v3140_v38  ;;  %5063 = vmatmul.mubr.bf16.gmra.mrb[172].mxu0 %v9116_v37  ;;  %3649 = vst [vmem:[#allocation2 + $0x9c] sm:$0xf] %v3648_v33  ;;  %v6253_v55 = vpack.c.bf16 %v3145_v23, %v3145_v23  ;;  %4910 = vmatmul.mubr.bf16.gmra.mrb[144].mxu1 %v9059_v10  ;;  %v3476_v61 = vshll.u32 %v6250_v21, 16  ;;  %v3143_v51 = vmax.f32 %v3111_v13, 0.0 }
 0x2d5   : > { %v3475_v18 = vrot.slane %v3473_v60, 7  ;;  %v3026_v3 = vadd.f32 %v8965_v27, %v8751_v34  ;;  %5070 = vmatprep.mubr.bf16.mxu0 %v9125_v11  ;;  %v3075_v44 = vmul.f32 %v7617_v4, %v3034_v62  ;;  %v3952_v39 = vshrl.u32 %v9125_v11, 16  ;;  %v9155_v33 = vld [vmem:[#allocation2 + $0x50] ss:$0 sps:$4 sm:$0x11]  }
 0x2d6   : > { %v3456_v24 = vshrl.u32 %v6248_v5, 16  ;;  %v3459_v43 = vshll.u32 %v6248_v5, 16  ;;  %v3499_v49 = vshrl.u32 %v6253_v55, 16  ;;  %v3502_v29 = vshll.u32 %v6253_v55, 16  ;;  %v9159_v55 = vld [vmem:[#allocation2 + $0x4c] sm:$0xf] }
 0x2d7   : > { %v3478_v20 = vor.u32 %v3476_v61, %v3475_v18  ;;  %v3480_v40 = vrot.slane %v3475_v18, 4  ;;  %v3073_v58 = vmul.f32 %v7617_v4, %v3026_v3  ;;  %v6251_v63 = vpack.c.bf16 %v3143_v51, %v3143_v51 }
 0x2d8   : > { %v3458_v41 = vrot.slane %v3456_v24, 7  ;;  %v9133_v15 = vrot.slane %v3499_v49, 7  ;;  %v3114_v50 = vadd.f32 %v9094_v1, %v3075_v44  ;;  %v3954_v23 = vshll.u32 %v9125_v11, 16  ;;  %v3687_v49 = vld [vmem:[#allocation2 + $0x48] sm:$0xf] }
 0x2d9   : > { %v3479_v34 = vsel %vm8051_vm7, %v3471_v8, %v3478_v20  ;;  %v3659_v27 = vsel %vm8065_vm9, %v3480_v40, %v3658_v19  ;;  %v3482_v2 = vshrl.u32 %v6251_v63, 16  ;;  %v3485_v45 = vshll.u32 %v6251_v63, 16  ;;  %v3734_v40 = vld [vmem:[#allocation2 + $0x3c] sm:$0xe] }
 0x2da   : > { %v3461_v26 = vor.u32 %v3459_v43, %v3458_v41  ;;  %v3463_v12 = vrot.slane %v3458_v41, 4  ;;  %3657 = vst [vmem:[#allocation2 + $0xac] sm:$0xf] %v3479_v34  ;;  %3660 = vst [vmem:[#allocation2 + $0xb0] sm:$0x1] %v3659_v27  ;;  %v3504_v4 = vor.u32 %v3502_v29, %v9133_v15  ;;  %v3146_v47 = vmax.f32 %v3114_v50, 0.0 }
 0x2db   : > { %v3112_v8 = vadd.f32 %v9094_v1, %v3073_v58  ;;  %v9151_v38 = vrot.slane %v3482_v2, 7  ;;  %v3959_v52 = vshll.u32 %v9136_v57, 16  ;;  %v6095_v1 = vcombine.low %v3733_v53, %v9054_v48  ;;  %v3672_v48 = vld [vmem:[#allocation2 + $0xc8] sm:$0x1]  ;;  %v9170_v41 = vld [vmem:[#allocation2 + $0x58] sm:$0xf] }
 0x2dc   : > { %v3462_v32 = vsel %vm8051_vm7, %v3454_v42, %v3461_v26  ;;  %v3652_v0 = vsel %vm8065_vm9, %v3463_v12, %v3651_v25  ;;  %v3669_v21 = vsel %vm8058_vm8, %v3504_v4, %v3668_v14  ;;  %v3661_v42 = vld [vmem:[#allocation2 + $0xb4] sm:$0xf]  ;;  %v6254_v60 = vpack.c.bf16 %v3146_v47, %v3146_v47  ;;  %v9175_v63 = vld [vmem:[#allocation2 + $0x5c] ss:$0 sps:$4 sm:$0x11]  }
 0x2dd   : > { %3650 = vst [vmem:[#allocation2 + $0xa0] sm:$0xf] %v3462_v32  ;;  %3653 = vst [vmem:[#allocation2 + $0xa4] sm:$0x1] %v3652_v0  ;;  %v3144_v5 = vmax.f32 %v3112_v8, 0.0  ;;  %v4160_v35 = vrot.slane %v9068_v56, 1  ;;  %v3487_v62 = vor.u32 %v3485_v45, %v9151_v38  ;;  %v9167_v56 = vcombine.low %v3687_v49, %v9159_v55 }
 0x2de   : > { %3670 = vst [vmem:[#allocation2 + $0xc0] sm:$0xf] %v3669_v21  ;;  %v3505_v13 = vrot.slane %v9133_v15, 4  ;;  %v3488_v18 = vrot.slane %v9151_v38, 4  ;;  %v3956_v61 = vrot.slane %v3954_v23, 1  ;;  %v3507_v24 = vshrl.u32 %v6254_v60, 16 }
 0x2df   : > { %v6252_v3 = vpack.c.bf16 %v3144_v5, %v3144_v5  ;;  %v3961_v19 = vrot.slane %v3959_v52, 1  ;;  %v4159_v43 = vrot.slane %v6095_v1, 1  ;;  %v3662_v51 = vsel %vm8058_vm8, %v3487_v62, %v3661_v42  ;;  %v3689_v2 = vld [vmem:[#allocation2 + $0x54] sm:$0xf]  ;;  %v3665_v45 = vld [vmem:[#allocation2 + $0xbc] sm:$0x1] }
 0x2e0   : > { %v3957_v44 = vor.u32 %v3956_v61, %v3952_v39  ;;  %v3971_v20 = vshll.u32 %v9155_v33, 16  ;;  %3663 = vst [vmem:[#allocation2 + $0xb4] sm:$0xf] %v3662_v51  ;;  %v3509_v25 = vrot.slane %v3507_v24, 7  ;;  %v3510_v58 = vshll.u32 %v6254_v60, 16 }
 0x2e1   : > { %v3490_v15 = vshrl.u32 %v6252_v3, 16  ;;  %v9173_v29 = vsel %vm1533_vm5, %v4159_v43, %v4160_v35  ;;  %v3493_v30 = vshll.u32 %v6252_v3, 16  ;;  %v3964_v34 = vshrl.u32 %v9167_v56, 16  ;;  %v3735_v62 = vld [vmem:[#allocation2 + $0x48] sm:$0xe] }
 0x2e2   : > { %v9178_v50 = vsel %vm1276_vm0, %v3957_v44, %v3961_v19  ;;  %5071 = vmatmul.mubr.bf16.gmra.mrb[176].mxu0 %v9173_v29  ;;  %v3966_v27 = vshll.u32 %v9167_v56, 16  ;;  %v3512_v26 = vor.u32 %v3510_v58, %v3509_v25  ;;  %v3514_v12 = vrot.slane %v3509_v25, 4  ;;  %v3691_v61 = vld [vmem:[#allocation2 + $0x60] sm:$0xf]  ;;  %v3693_v51 = vld [vmem:[#allocation2 + $0x6c] sm:$0xf] }
 0x2e3   : > { %v3492_v14 = vrot.slane %v3490_v15, 7  ;;  %4917 = vmatprep.mubr.bf16.mxu1 %v9178_v50  ;;  %5078 = vmatprep.mubr.bf16.mxu0 %v9167_v56  ;;  %v6096_v4 = vcombine.low %v3734_v40, %v9110_v54  ;;  %v3973_v32 = vrot.slane %v3971_v20, 1  ;;  %v4163_v0 = vrot.slane %v9136_v57, 1  ;;  %v9197_v57 = vld [vmem:[#allocation2 + $0x64] sm:$0xf] }
 0x2e4   : > { %4918 = vmatmul.mubr.bf16.gmra.mrb[148].mxu1 %v9125_v11  ;;  %v3968_v39 = vrot.slane %v3966_v27, 1  ;;  %v9189_v47 = vcombine.low %v3689_v2, %v9170_v41  ;;  %v3513_v8 = vsel %vm8051_vm7, %v3505_v13, %v3512_v26  ;;  %v3673_v53 = vsel %vm8065_vm9, %v3514_v12, %v3672_v48  ;;  %v7552_v43 = vld [vmem:[#allocation2 + $0x68] ss:$0 sps:$4 sm:$0x11]   ;;  %v9235_v12 = vld [vmem:[#allocation2 + $0x7c] sm:$0xf] }
 0x2e5   : > { %v3495_v21 = vor.u32 %v3493_v30, %v3492_v14  ;;  %v3497_v38 = vrot.slane %v3492_v14, 4  ;;  %3671 = vst [vmem:[#allocation2 + $0xc4] sm:$0xf] %v3513_v8  ;;  %3674 = vst [vmem:[#allocation2 + $0xc8] sm:$0x1] %v3673_v53  ;;  %v4162_v23 = vrot.slane %v6096_v4, 1  ;;  %v6097_v22 = vcombine.low %v3735_v62, %v9159_v55 }
 0x2e6   : > { %v3969_v54 = vor.u32 %v3968_v39, %v3964_v34  ;;  %v3978_v52 = vshll.u32 %v9189_v47, 16  ;;  %v3983_v42 = vshll.u32 %v9175_v63, 16  ;;  %v3976_v35 = vshrl.u32 %v9189_v47, 16  ;;  %v3736_v30 = vld [vmem:[#allocation2 + $0x54] sm:$0xe] }
 0x2e7   : > { %v3496_v60 = vsel %vm8051_vm7, %v3488_v18, %v3495_v21  ;;  %v3666_v5 = vsel %vm8065_vm9, %v3497_v38, %v3665_v45  ;;  %v9209_v24 = vsel %vm1533_vm5, %v4162_v23, %v4163_v0  ;;  %v9213_v36 = vcombine.low %v3691_v61, %v9197_v57  ;;  %v9215_v18 = vld [vmem:[#allocation2 + $0x70] sm:$0xf]  ;;  %v7558_v4 = vld [vmem:[#allocation2 + $0x74] ss:$0 sps:$4 sm:$0x11]  }
 0x2e8   : > { %3664 = vst [vmem:[#allocation2 + $0xb8] sm:$0xf] %v3496_v60  ;;  %3667 = vst [vmem:[#allocation2 + $0xbc] sm:$0x1] %v3666_v5  ;;  %v9204_v1 = vsel %vm1276_vm0, %v3969_v54, %v3973_v32  ;;  %v3980_v13 = vrot.slane %v3978_v52, 1  ;;  %v3985_v19 = vrot.slane %v3983_v42, 1  ;;  %v9225_v55 = vcombine.low %v3693_v51, %v9215_v18 }
 0x2e9   : > { %4925 = vmatprep.mubr.bf16.mxu1 %v9204_v1  ;;  %v3990_v49 = vshll.u32 %v9213_v36, 16  ;;  %v4165_v44 = vrot.slane %v6097_v22, 1  ;;  %v4166_v20 = vrot.slane %v9155_v33, 1  ;;  %v3988_v25 = vshrl.u32 %v9213_v36, 16  ;;  %v3695_v33 = vld [vmem:[#allocation2 + $0x78] sm:$0xf] }
 0x2ea   : > { %5079 = vmatmul.mubr.bf16.gmra.mrb[180].mxu0 %v9209_v24  ;;  %v3981_v3 = vor.u32 %v3980_v13, %v3976_v35  ;;  %v3995_v58 = vshll.u32 %v7552_v43, 16  ;;  %v4002_v34 = vshll.u32 %v9225_v55, 16  ;;  %v6098_v26 = vcombine.low %v3736_v30, %v9170_v41  ;;  %v3737_v21 = vld [vmem:[#allocation2 + $0x60] sm:$0xe]  ;;  %v9254_v52 = vld [vmem:[#allocation2 + $0x88] sm:$0xf] }
 0x2eb   : > { %5086 = vmatprep.mubr.bf16.mxu0 %v9189_v47  ;;  %v3992_v40 = vrot.slane %v3990_v49, 1  ;;  %v9232_v27 = vsel %vm1533_vm5, %v4165_v44, %v4166_v20  ;;  %v9244_v39 = vcombine.low %v3695_v33, %v9235_v12  ;;  %v4169_v32 = vrot.slane %v9175_v63, 1  ;;  %v7562_v60 = vld [vmem:[#allocation2 + $0x80] ss:$0 sps:$4 sm:$0x11]  }
 0x2ec   : > { %4926 = vmatmul.mubr.bf16.gmra.mrb[152].mxu1 %v9167_v56  ;;  %v9222_v48 = vsel %vm1276_vm0, %v3981_v3, %v3985_v19  ;;  %v3997_v14 = vrot.slane %v3995_v58, 1  ;;  %v4004_v45 = vrot.slane %v4002_v34, 1  ;;  %v4168_v41 = vrot.slane %v6098_v26, 1  ;;  %v3697_v63 = vld [vmem:[#allocation2 + $0x84] sm:$0xf] }
 0x2ed   : > { %4933 = vmatprep.mubr.bf16.mxu1 %v9222_v48  ;;  %v3993_v15 = vor.u32 %v3992_v40, %v3988_v25  ;;  %v4000_v0 = vshrl.u32 %v9225_v55, 16  ;;  %v4007_v8 = vshll.u32 %v7558_v4, 16  ;;  %v4014_v38 = vshll.u32 %v9244_v39, 16  ;;  %v3738_v19 = vld [vmem:[#allocation2 + $0x6c] sm:$0xe] }
 0x2ee   : > { %v9251_v54 = vsel %vm1533_vm5, %v4168_v41, %v4169_v32  ;;  %v6099_v23 = vcombine.low %v3737_v21, %v9197_v57  ;;  %v9263_v13 = vcombine.low %v3697_v63, %v9254_v52  ;;  %v4172_v62 = vrot.slane %v7552_v43, 1  ;;  %v9272_v20 = vld [vmem:[#allocation2 + $0x94] sm:$0xf]  ;;  %v9275_v25 = vld [vmem:[#allocation2 + $0x8c] ss:$0 sps:$4 sm:$0x11]  }
 0x2ef   : > { %v9241_v2 = vsel %vm1276_vm0, %v3993_v15, %v3997_v14  ;;  %v4005_v53 = vor.u32 %v4004_v45, %v4000_v0  ;;  %v4009_v42 = vrot.slane %v4007_v8, 1  ;;  %v4016_v35 = vrot.slane %v4014_v38, 1  ;;  %v3699_v43 = vld [vmem:[#allocation2 + $0x90] sm:$0xf]  ;;  %v3739_v45 = vld [vmem:[#allocation2 + $0x78] sm:$0xe] }
 0x2f0   : > { %v4171_v57 = vrot.slane %v6099_v23, 1  ;;  %v4012_v61 = vshrl.u32 %v9244_v39, 16  ;;  %v4019_v22 = vshll.u32 %v7562_v60, 16  ;;  %v4026_v49 = vshll.u32 %v9263_v13, 16  ;;  %v9293_v8 = vld [vmem:[#allocation2 + $0xa0] sm:$0xf] }
 0x2f1   : > { %v9260_v5 = vsel %vm1276_vm0, %v4005_v53, %v4009_v42  ;;  %v6100_v44 = vcombine.low %v3738_v19, %v9215_v18  ;;  %v9283_v30 = vcombine.low %v3699_v43, %v9272_v20  ;;  %v4175_v34 = vrot.slane %v7558_v4, 1  ;;  %v9296_v21 = vld [vmem:[#allocation2 + $0x98] ss:$0 sps:$4 sm:$0x11]   ;;  %v3701_v4 = vld [vmem:[#allocation2 + $0x9c] sm:$0xf] }
 0x2f2   : > { %5087 = vmatmul.mubr.bf16.gmra.mrb[184].mxu0 %v9232_v27  ;;  %v4017_v3 = vor.u32 %v4016_v35, %v4012_v61  ;;  %v9269_v51 = vsel %vm1533_vm5, %v4171_v57, %v4172_v62  ;;  %v4021_v40 = vrot.slane %v4019_v22, 1  ;;  %v4028_v15 = vrot.slane %v4026_v49, 1  ;;  %v3740_v22 = vld [vmem:[#allocation2 + $0x84] sm:$0xe] }
 0x2f3   : > { %5094 = vmatprep.mubr.bf16.mxu0 %v9213_v36  ;;  %v4174_v18 = vrot.slane %v6100_v44, 1  ;;  %v4024_v26 = vshrl.u32 %v9263_v13, 16  ;;  %v4031_v14 = vshll.u32 %v9275_v25, 16  ;;  %v4038_v41 = vshll.u32 %v9283_v30, 16  ;;  %v9314_v44 = vld [vmem:[#allocation2 + $0xac] sm:$0xf] }
 0x2f4   : > { %4934 = vmatmul.mubr.bf16.gmra.mrb[156].mxu1 %v9189_v47  ;;  %v9280_v58 = vsel %vm1276_vm0, %v4017_v3, %v4021_v40  ;;  %v6101_v0 = vcombine.low %v3739_v45, %v9235_v12  ;;  %v9304_v42 = vcombine.low %v3701_v4, %v9293_v8  ;;  %v6744_v12 = vpop.f32.mrb[128].mxu1  ;;  %v4178_v35 = vrot.slane %v7562_v60, 1  ;;  %v7578_v43 = vld [vmem:[#allocation2 + $0xa4] ss:$0 sps:$4 sm:$0x11]  }
 0x2f5   : > { %4941 = vmatprep.mubr.bf16.mxu1 %v9241_v2  ;;  %v4029_v33 = vor.u32 %v4028_v15, %v4024_v26  ;;  %v9290_v32 = vsel %vm1533_vm5, %v4174_v18, %v4175_v34  ;;  %v4033_v53 = vrot.slane %v4031_v14, 1  ;;  %v4040_v23 = vrot.slane %v4038_v41, 1  ;;  %v6745_v60 = vpop.f32.mrb[129].mxu1  ;;  %v3703_v15 = vld [vmem:[#allocation2 + $0xa8] sm:$0xf] }
 0x2f6   : > { %v4177_v63 = vrot.slane %v6101_v0, 1  ;;  %v4036_v57 = vshrl.u32 %v9283_v30, 16  ;;  %v4043_v62 = vshll.u32 %v9296_v21, 16  ;;  %v4050_v3 = vshll.u32 %v9304_v42, 16  ;;  %v6747_v34 = vpop.f32.mrb[130].mxu1 }
 0x2f7   : > { %v9301_v38 = vsel %vm1276_vm0, %v4029_v33, %v4033_v53  ;;  %v6102_v49 = vcombine.low %v3740_v22, %v9254_v52  ;;  %v9318_v18 = vadd.f32 %v6745_v60, %v6744_v12  ;;  %v9325_v52 = vcombine.low %v3703_v15, %v9314_v44  ;;  %v6748_v33 = vpop.f32.mrb[131].mxu1  ;;  %v3741_v12 = vld [vmem:[#allocation2 + $0x90] sm:$0xe]  ;;  %v7582_v22 = vld [vmem:[#allocation2 + $0xb0] ss:$0 sps:$4 sm:$0x11]  }
 0x2f8   : > { %v4041_v61 = vor.u32 %v4040_v23, %v4036_v57  ;;  %v9311_v19 = vsel %vm1533_vm5, %v4177_v63, %v4178_v35  ;;  %v4045_v40 = vrot.slane %v4043_v62, 1  ;;  %v4052_v14 = vrot.slane %v4050_v3, 1  ;;  %v3706_v62 = vld [vmem:[#allocation2 + $0xb8] sm:$0xf] }
 0x2f9   : > { %v4180_v45 = vrot.slane %v6102_v49, 1  ;;  %v4181_v41 = vrot.slane %v9275_v25, 1  ;;  %v9329_v0 = vadd.f32 %v6748_v33, %v6747_v34  ;;  %v4048_v53 = vshrl.u32 %v9304_v42, 16  ;;  %v3705_v25 = vld [vmem:[#allocation2 + $0xb4] sm:$0xf] }
 0x2fa   : > { %5095 = vmatmul.mubr.bf16.gmra.mrb[188].mxu0 %v9251_v54  ;;  %v9322_v26 = vsel %vm1276_vm0, %v4041_v61, %v4045_v40  ;;  %v4055_v4 = vshll.u32 %v7578_v43, 16  ;;  %v4062_v63 = vshll.u32 %v9325_v52, 16  ;;  %v6103_v57 = vcombine.low %v3741_v12, %v9272_v20  ;;  %v3742_v33 = vld [vmem:[#allocation2 + $0x9c] sm:$0xe] }
 0x2fb   : > { %5102 = vmatprep.mubr.bf16.mxu0 %v9225_v55  ;;  %v4053_v23 = vor.u32 %v4052_v14, %v4048_v53  ;;  %v9334_v35 = vsel %vm1533_vm5, %v4180_v45, %v4181_v41  ;;  %v9343_v40 = vcombine.low %v3705_v25, %v3706_v62  ;;  %v4184_v20 = vrot.slane %v9296_v21, 1 }
 0x2fc   : > { %4942 = vmatmul.mubr.bf16.gmra.mrb[160].mxu1 %v9213_v36  ;;  %v4057_v61 = vrot.slane %v4055_v4, 1  ;;  %v4064_v49 = vrot.slane %v4062_v63, 1  ;;  %v4183_v60 = vrot.slane %v6103_v57, 1  ;;  %v4060_v15 = vshrl.u32 %v9325_v52, 16 }
 0x2fd   : > { %4949 = vmatprep.mubr.bf16.mxu1 %v9260_v5  ;;  %v4067_v34 = vshll.u32 %v7582_v22, 16  ;;  %v4074_v45 = vshll.u32 %v9343_v40, 16  ;;  %v6104_v53 = vcombine.low %v3742_v33, %v9293_v8  ;;  %v4187_v57 = vrot.slane %v7578_v43, 1  ;;  %v9372_v33 = vld [vmem:[#allocation2 + $0xc4] sm:$0xf] }
 0x2fe   : > { %v9341_v3 = vsel %vm1276_vm0, %v4053_v23, %v4057_v61  ;;  %v4065_v14 = vor.u32 %v4064_v49, %v4060_v15  ;;  %v9350_v41 = vsel %vm1533_vm5, %v4183_v60, %v4184_v20  ;;  %v7588_v23 = vld [vmem:[#allocation2 + $0xbc] ss:$0 sps:$4 sm:$0x11]   ;;  %v4072_v61 = vshrl.u32 %v9343_v40, 16  ;;  %v3743_v49 = vld [vmem:[#allocation2 + $0xa8] sm:$0xe] }
 0x2ff   : > { %v4069_v4 = vrot.slane %v4067_v34, 1  ;;  %v4076_v12 = vrot.slane %v4074_v45, 1  ;;  %v4186_v63 = vrot.slane %v6104_v53, 1  ;;  %v4079_v25 = vshll.u32 %v7588_v23, 16  ;;  %v3707_v45 = vld [vmem:[#allocation2 + $0xc0] sm:$0xf] }
 0x300   : > { %v6105_v20 = vcombine.low %v3743_v49, %v9314_v44  ;;  %v3744_v53 = vld [vmem:[#allocation2 + $0xb4] sm:$0xe] }
 0x301   : > { %v9357_v21 = vsel %vm1276_vm0, %v4065_v14, %v4069_v4  ;;  %v4077_v8 = vor.u32 %v4076_v12, %v4072_v61  ;;  %v9362_v60 = vsel %vm1533_vm5, %v4186_v63, %v4187_v57  ;;  %v4081_v15 = vrot.slane %v4079_v25, 1  ;;  %v7602_v61 = vld [vmem:[#allocation8 + $0x208] sm:$0xff]  }
 0x302   : > { %5103 = vmatmul.mubr.bf16.gmra.mrb[192].mxu0 %v9269_v51  ;;  %v4189_v43 = vrot.slane %v6105_v20, 1  ;;  %v4190_v14 = vrot.slane %v7582_v22, 1  ;;  %v9378_v4 = vcombine.low %v3707_v45, %v9372_v33  ;;  %v6106_v12 = vcombine.low %v3744_v53, %v3706_v62  ;;  %v7603_v62 = vld [vmem:[#allocation8 + $0x210] sm:$0xff]  }
 0x303   : > { %5110 = vmatprep.mubr.bf16.mxu0 %v9244_v39  ;;  %v9369_v34 = vsel %vm1276_vm0, %v4077_v8, %v4081_v15  ;;  %v4193_v57 = vrot.slane %v7588_v23, 1 }
 0x304   : > { %4950 = vmatmul.mubr.bf16.gmra.mrb[164].mxu1 %v9225_v55  ;;  %v9375_v44 = vsel %vm1533_vm5, %v4189_v43, %v4190_v14  ;;  %v4192_v63 = vrot.slane %v6106_v12, 1 }
 0x305   : > { %4957 = vmatprep.mubr.bf16.mxu1 %v9280_v58 }
 0x306   : > { %v9385_v22 = vsel %vm1533_vm5, %v4192_v63, %v4193_v57 }
 0x30a   : > { %5111 = vmatmul.mubr.bf16.gmra.mrb[196].mxu0 %v9290_v32 }
 0x30b   : > { %5118 = vmatprep.mubr.bf16.mxu0 %v9263_v13 }
 0x30c   : > { %4958 = vmatmul.mubr.bf16.gmra.mrb[168].mxu1 %v9244_v39 }
 0x30d   : > { %4965 = vmatprep.mubr.bf16.mxu1 %v9301_v38 }
 0x312   : > { %5119 = vmatmul.mubr.bf16.gmra.mrb[200].mxu0 %v9311_v19 }
 0x313   : > { %5126 = vmatprep.mubr.bf16.mxu0 %v9283_v30 }
 0x314   : > { %4966 = vmatmul.mubr.bf16.gmra.mrb[172].mxu1 %v9263_v13 }
 0x315   : > { %4973 = vmatprep.mubr.bf16.mxu1 %v9322_v26 }
 0x31a   : > { %5127 = vmatmul.mubr.bf16.gmra.mrb[204].mxu0 %v9334_v35 }
 0x31b   : > { %5134 = vmatprep.mubr.bf16.mxu0 %v9304_v42 }
 0x31c   : > { %4974 = vmatmul.mubr.bf16.gmra.mrb[176].mxu1 %v9283_v30 }
 0x31d   : > { %4981 = vmatprep.mubr.bf16.mxu1 %v9341_v3 }
 0x322   : > { %5135 = vmatmul.mubr.bf16.gmra.mrb[208].mxu0 %v9350_v41 }
 0x323   : > { %5142 = vmatprep.mubr.bf16.mxu0 %v9325_v52 }
 0x324   : > { %4982 = vmatmul.mubr.bf16.gmra.mrb[180].mxu1 %v9304_v42 }
 0x325   : > { %4989 = vmatprep.mubr.bf16.mxu1 %v9357_v21 }
 0x32a   : > { %5143 = vmatmul.mubr.bf16.gmra.mrb[212].mxu0 %v9362_v60 }
 0x32b   : > { %5150 = vmatprep.mubr.bf16.mxu0 %v9343_v40 }
 0x32c   : > { %4990 = vmatmul.mubr.bf16.gmra.mrb[184].mxu1 %v9325_v52 }
 0x32d   : > { %4997 = vmatprep.mubr.bf16.mxu1 %v9369_v34 }
 0x332   : > { %5151 = vmatmul.mubr.bf16.gmra.mrb[216].mxu0 %v9375_v44 }
 0x333   : > { %5158 = vmatprep.mubr.bf16.mxu0 %v9378_v4 }
 0x334   : > { %4998 = vmatmul.mubr.bf16.gmra.mrb[188].mxu1 %v9343_v40 }
 0x335   : > { %5199 = vmatprep.mubr.bf16.mxu1 %v9012_v16  ;;  %v7604_v16 = vld [vmem:[#allocation8 + $0x218] sm:$0xff]  }
 0x33a   : > { %5159 = vmatmul.mubr.bf16.gmra.mrb[220].mxu0 %v9385_v22 }
 0x33b   : > { %5360 = vmatprep.mubr.bf16.mxu0 %v9001_v17 }
 0x33c   : > { %5200 = vmatmul.mubr.bf16.vlgmr.msra.gmra.mrb[192].mxu1 %v8985_v59  ;;  %v7605_v59 = vld [vmem:[#allocation8 + $0x220] sm:$0xff]  }
 0x33d   : > { %5207 = vmatprep.mubr.bf16.mxu1 %v9050_v46  ;;  %7249 = vmatpush3.bf16.msra.mxu1 %v9028_v28  ;;  %v7606_v28 = vld [vmem:[#allocation8 + $0x228] sm:$0xff]  }
 0x33e   : > { %7250 = vmatprep.subr.bf16.mxu1 %v7602_v61 }
 0x341   : > { %7251 = vmatpush3.bf16.msra.mxu1 %v7602_v61 }
 0x342   : > { %5361 = vmatmul.mubr.bf16.vlgmr.msra.gmra.mrb[224].mxu0 %v8913_v31  ;;  %7252 = vmatprep.subr.bf16.mxu1 %v7603_v62  ;;  %v7607_v31 = vld [vmem:[#allocation8 + $0x230] sm:$0xff]  }
 0x343   : > { %5368 = vmatprep.mubr.bf16.mxu0 %v9046_v7 }
 0x344   : > { %5208 = vmatmul.mubr.bf16.gmra.mrb[196].mxu1 %v9001_v17  ;;  %v7609_v17 = vld [vmem:[#allocation8 + $0x238] sm:$0xff]  }
 0x345   : > { %5215 = vmatprep.mubr.bf16.mxu1 %v9116_v37  ;;  %7253 = vmatpush3.bf16.msra.mxu1 %v7603_v62 }
 0x346   : > { %7254 = vmatprep.subr.bf16.mxu1 %v7604_v16 }
 0x349   : > { %7255 = vmatpush3.bf16.msra.mxu1 %v7604_v16 }
 0x34a   : > { %5369 = vmatmul.mubr.bf16.gmra.mrb[228].mxu0 %v9006_v9  ;;  %7256 = vmatprep.subr.bf16.mxu1 %v7605_v59  ;;  %v3746_v9 = vld [vmem:[#allocation2 + $0xcc] sm:$0xe] }
 0x34b   : > { %5376 = vmatprep.mubr.bf16.mxu0 %v9113_v6 }
 0x34c   : > { %5216 = vmatmul.mubr.bf16.gmra.mrb[200].mxu1 %v9046_v7 }
 0x34d   : > { %5223 = vmatprep.mubr.bf16.mxu1 %v9173_v29  ;;  %7257 = vmatpush3.bf16.msra.mxu1 %v7605_v59 }
 0x34e   : > { %7258 = vmatprep.subr.bf16.mxu1 %v7606_v28 }
 0x351   : > { %7259 = vmatpush3.bf16.msra.mxu1 %v7606_v28 }
 0x352   : > { %5377 = vmatmul.mubr.bf16.gmra.mrb[232].mxu0 %v9059_v10  ;;  %7260 = vmatprep.subr.bf16.mxu1 %v7607_v31  ;;  %v9417_v10 = vld [vmem:[#allocation2 + $0xd0] sm:$0xf] }
 0x353   : > { %5384 = vmatprep.mubr.bf16.mxu0 %v9178_v50 }
 0x354   : > { %5224 = vmatmul.mubr.bf16.gmra.mrb[204].mxu1 %v9113_v6 }
 0x355   : > { %5231 = vmatprep.mubr.bf16.mxu1 %v9209_v24  ;;  %7261 = vmatpush3.bf16.msra.mxu1 %v7607_v31 }
 0x356   : > { %7262 = vmatprep.subr.bf16.mxu1 %v7609_v17 }
 0x359   : > { %7263 = vmatpush3.bf16.msra.mxu1 %v7609_v17 }
 0x35a   : > { %5385 = vmatmul.mubr.bf16.gmra.mrb[236].mxu0 %v9125_v11  ;;  %v6112_v11 = vcombine.low %v3746_v9, %v9417_v10 }
 0x35b   : > { %5392 = vmatprep.mubr.bf16.mxu0 %v9204_v1 }
 0x35c   : > { %5232 = vmatmul.mubr.bf16.gmra.mrb[208].mxu1 %v9178_v50  ;;  %v4265_v23 = vrot.slane %v6112_v11, 1 }
 0x35d   : > { %5239 = vmatprep.mubr.bf16.mxu1 %v9232_v27 }
 0x362   : > { %5393 = vmatmul.mubr.bf16.gmra.mrb[240].mxu0 %v9167_v56 }
 0x363   : > { %5400 = vmatprep.mubr.bf16.mxu0 %v9222_v48 }
 0x364   : > { %5240 = vmatmul.mubr.bf16.gmra.mrb[212].mxu1 %v9204_v1  ;;  %v9423_v1 = vld [vmem:[#allocation2 + $0xd4] ss:$0 sps:$4 sm:$0x11]  }
 0x365   : > { %5247 = vmatprep.mubr.bf16.mxu1 %v9251_v54  ;;  %v4266_v25 = vrot.slane %v9423_v1, 1 }
 0x36a   : > { %5401 = vmatmul.mubr.bf16.gmra.mrb[244].mxu0 %v9189_v47 }
 0x36b   : > { %5408 = vmatprep.mubr.bf16.mxu0 %v9241_v2 }
 0x36c   : > { %5248 = vmatmul.mubr.bf16.gmra.mrb[216].mxu1 %v9222_v48 }
 0x36d   : > { %5255 = vmatprep.mubr.bf16.mxu1 %v9269_v51 }
 0x371   : > { %v6856_v7 = vpop.f32.mrb[160].mxu0 }
 0x372   : > { %5409 = vmatmul.mubr.bf16.gmra.mrb[248].mxu0 %v9213_v36  ;;  %v6857_v6 = vpop.f32.mrb[161].mxu0 }
 0x373   : > { %5416 = vmatprep.mubr.bf16.mxu0 %v9260_v5  ;;  %v6858_v56 = vadd.f32 %v6857_v6, %v6856_v7  ;;  %v6859_v50 = vpop.f32.mrb[162].mxu0 }
 0x374   : > { %5256 = vmatmul.mubr.bf16.gmra.mrb[220].mxu1 %v9241_v2  ;;  %v6860_v47 = vpop.f32.mrb[163].mxu0  ;;  %v9435_v2 = vsel %vm1533_vm5, %v4265_v23, %v4266_v25 }
 0x375   : > { %5263 = vmatprep.mubr.bf16.mxu1 %v9290_v32  ;;  %v9426_v48 = vadd.f32 %v6858_v56, %v9318_v18  ;;  %v6861_v36 = vadd.f32 %v6860_v47, %v6859_v50  ;;  %v3709_v50 = vld [vmem:[#allocation2 + $0xcc] sm:$0xf]  ;;  %v4223_v47 = vshll.u32 %v9378_v4, 16 }
 0x376   : > { %v6110_v25 = vcombine.low %v3709_v50, %v9417_v10 }
 0x377   : > { %v9430_v8 = vadd.f32 %v6861_v36, %v9329_v0  ;;  %v7608_v36 = vld [vmem:[#allocation2 + $0xc8] ss:$0 sps:$4 sm:$0x11]  }
 0x37a   : > { %5417 = vmatmul.mubr.bf16.gmra.mrb[252].mxu0 %v9225_v55 }
 0x37b   : > { %5424 = vmatprep.mubr.bf16.mxu0 %v9280_v58 }
 0x37c   : > { %5264 = vmatmul.mubr.bf16.gmra.mrb[224].mxu1 %v9260_v5 }
 0x37d   : > { %5271 = vmatprep.mubr.bf16.mxu1 %v9311_v19 }
 0x382   : > { %5425 = vmatmul.mubr.bf16.gmra.mrb[0].mxu0 %v9244_v39 }
 0x383   : > { %5432 = vmatprep.mubr.bf16.mxu0 %v9301_v38 }
 0x384   : > { %5272 = vmatmul.mubr.bf16.gmra.mrb[228].mxu1 %v9280_v58 }
 0x385   : > { %5279 = vmatprep.mubr.bf16.mxu1 %v9334_v35 }
 0x38a   : > { %5433 = vmatmul.mubr.bf16.gmra.mrb[4].mxu0 %v9263_v13 }
 0x38b   : > { %5440 = vmatprep.mubr.bf16.mxu0 %v9322_v26  ;;  %v6750_v55 = vpop.f32.mrb[132].mxu1 }
 0x38c   : > { %5280 = vmatmul.mubr.bf16.gmra.mrb[232].mxu1 %v9301_v38  ;;  %v6751_v18 = vpop.f32.mrb[133].mxu1 }
 0x38d   : > { %5287 = vmatprep.mubr.bf16.mxu1 %v9350_v41  ;;  %v6752_v5 = vadd.f32 %v6751_v18, %v6750_v55  ;;  %v6753_v0 = vpop.f32.mrb[134].mxu1  ;;  %v4225_v55 = vrot.slane %v4223_v47, 1  ;;  %v3745_v18 = vld [vmem:[#allocation2 + $0xc0] sm:$0xe] }
 0x38e   : > { %v6862_v49 = vpop.f32.mrb[164].mxu0  ;;  %v6754_v39 = vpop.f32.mrb[135].mxu1 }
 0x38f   : > { %v6863_v20 = vpop.f32.mrb[165].mxu0  ;;  %v6755_v15 = vadd.f32 %v6754_v39, %v6753_v0  ;;  %v4221_v0 = vshrl.u32 %v9378_v4, 16 }
 0x390   : > { %v6864_v43 = vadd.f32 %v6863_v20, %v6862_v49  ;;  %v6865_v58 = vpop.f32.mrb[166].mxu0  ;;  %v4252_v49 = vshll.u32 %v6110_v25, 16 }
 0x391   : > { %v6866_v14 = vpop.f32.mrb[167].mxu0  ;;  %v4226_v39 = vor.u32 %v4225_v55, %v4221_v0 }
 0x392   : > { %5441 = vmatmul.mubr.bf16.gmra.mrb[8].mxu0 %v9283_v30  ;;  %v9448_v13 = vadd.f32 %v6864_v43, %v6752_v5  ;;  %v6867_v45 = vadd.f32 %v6866_v14, %v6865_v58  ;;  %v6109_v5 = vcombine.low %v3745_v18, %v9372_v33  ;;  %v4257_v33 = vshll.u32 %v9423_v1, 16 }
 0x393   : > { %5448 = vmatprep.mubr.bf16.mxu0 %v9341_v3  ;;  %v6756_v38 = vpop.f32.mrb[136].mxu1 }
 0x394   : > { %5288 = vmatmul.mubr.bf16.gmra.mrb[236].mxu1 %v9322_v26  ;;  %v9452_v53 = vadd.f32 %v6867_v45, %v6755_v15  ;;  %v6757_v12 = vpop.f32.mrb[137].mxu1  ;;  %v4236_v43 = vrot.slane %v6109_v5, 1 }
 0x395   : > { %5295 = vmatprep.mubr.bf16.mxu1 %v9362_v60  ;;  %v6758_v63 = vadd.f32 %v6757_v12, %v6756_v38  ;;  %v6759_v57 = vpop.f32.mrb[138].mxu1  ;;  %v4250_v12 = vshrl.u32 %v6110_v25, 16 }
 0x396   : > { %v6760_v61 = vpop.f32.mrb[139].mxu1 }
 0x397   : > { %v6868_v62 = vpop.f32.mrb[168].mxu0  ;;  %v6761_v16 = vadd.f32 %v6760_v61, %v6759_v57 }
 0x398   : > { %v6869_v59 = vpop.f32.mrb[169].mxu0 }
 0x399   : > { %v6870_v30 = vadd.f32 %v6869_v59, %v6868_v62  ;;  %v6871_v28 = vpop.f32.mrb[170].mxu0 }
 0x39a   : > { %5449 = vmatmul.mubr.bf16.gmra.mrb[12].mxu0 %v9304_v42  ;;  %v6872_v31 = vpop.f32.mrb[171].mxu0 }
 0x39b   : > { %5456 = vmatprep.mubr.bf16.mxu0 %v9357_v21  ;;  %v9457_v17 = vadd.f32 %v6870_v30, %v6758_v63  ;;  %v6873_v26 = vadd.f32 %v6872_v31, %v6871_v28  ;;  %v6762_v9 = vpop.f32.mrb[140].mxu1  ;;  %v4254_v63 = vrot.slane %v4252_v49, 1 }
 0x39c   : > { %5296 = vmatmul.mubr.bf16.gmra.mrb[240].mxu1 %v9341_v3  ;;  %v6763_v7 = vpop.f32.mrb[141].mxu1  ;;  %v4228_v3 = vshll.u32 %v7608_v36, 16 }
 0x39d   : > { %5303 = vmatprep.mubr.bf16.mxu1 %v9375_v44  ;;  %v9461_v6 = vadd.f32 %v6873_v26, %v6761_v16  ;;  %v6764_v11 = vadd.f32 %v6763_v7, %v6762_v9  ;;  %v6765_v56 = vpop.f32.mrb[142].mxu1  ;;  %v4255_v1 = vor.u32 %v4254_v63, %v4250_v12  ;;  %v4259_v9 = vrot.slane %v4257_v33, 1 }
 0x39e   : > { %v6766_v42 = vpop.f32.mrb[143].mxu1  ;;  %v4230_v15 = vrot.slane %v4228_v3, 1 }
 0x39f   : > { %v6767_v23 = vadd.f32 %v6766_v42, %v6765_v56 }
 0x3a0   : > { %v4231_v62 = vsel %vm1276_vm0, %v4226_v39, %v4230_v15 }
 0x3a2   : > { %5457 = vmatmul.mubr.bf16.gmra.mrb[16].mxu0 %v9325_v52  ;;  %v4237_v52 = vrot.slane %v7608_v36, 1 }
 0x3a3   : > { %5464 = vmatprep.mubr.bf16.mxu0 %v9369_v34 }
 0x3a4   : > { %5304 = vmatmul.mubr.bf16.gmra.mrb[244].mxu1 %v9357_v21  ;;  %v9480_v26 = vsel %vm1533_vm5, %v4236_v43, %v4237_v52 }
 0x3a5   : > { %5311 = vmatprep.mubr.bf16.mxu1 %v9385_v22 }
 0x3a7   : > { %v6874_v20 = vpop.f32.mrb[172].mxu0  ;;  %v6768_v58 = vpop.f32.mrb[144].mxu1 }
 0x3a8   : > { %v6875_v10 = vpop.f32.mrb[173].mxu0  ;;  %v6769_v38 = vpop.f32.mrb[145].mxu1 }
 0x3a9   : > { %v6876_v14 = vadd.f32 %v6875_v10, %v6874_v20  ;;  %v6877_v45 = vpop.f32.mrb[174].mxu0  ;;  %v6770_v57 = vadd.f32 %v6769_v38, %v6768_v58  ;;  %v6771_v61 = vpop.f32.mrb[146].mxu1 }
 0x3aa   : > { %v6878_v21 = vpop.f32.mrb[175].mxu0  ;;  %5465 = vmatmul.mubr.bf16.gmra.mrb[20].mxu0 %v9343_v40  ;;  %v6772_v30 = vpop.f32.mrb[147].mxu1  ;;  %v4260_v40 = vsel %vm1276_vm0, %v4255_v1, %v4259_v9 }
 0x3ab   : > { %v9474_v16 = vadd.f32 %v6876_v14, %v6764_v11  ;;  %v6879_v59 = vadd.f32 %v6878_v21, %v6877_v45  ;;  %5472 = vmatprep.mubr.bf16.mxu0 %v4231_v62  ;;  %v6773_v28 = vadd.f32 %v6772_v30, %v6771_v61 }
 0x3ac   : > { %5312 = vmatmul.mubr.bf16.gmra.mrb[248].mxu1 %v9369_v34 }
 0x3ad   : > { %v9476_v31 = vadd.f32 %v6879_v59, %v6767_v23  ;;  %5319 = vmatprep.mubr.bf16.mxu1 %v9480_v26 }
 0x3b2   : > { %5473 = vmatmul.mubr.bf16.gmra.mrb[24].mxu0 %v9378_v4 }
 0x3b3   : > { %5480 = vmatprep.mubr.bf16.mxu0 %v4260_v40 }
 0x3b4   : > { %5320 = vmatmul.mubr.bf16.gmra.mrb[252].mxu1 %v4231_v62 }
 0x3b5   : > { %v6880_v7 = vpop.f32.mrb[176].mxu0  ;;  %7264 = vmatprep.mubr.bf16.mxu1 %v9050_v46 }
 0x3b6   : > { %v6881_v11 = vpop.f32.mrb[177].mxu0 }
 0x3b7   : > { %v6882_v56 = vadd.f32 %v6881_v11, %v6880_v7  ;;  %v6883_v50 = vpop.f32.mrb[178].mxu0  ;;  %v6774_v34 = vpop.f32.mrb[148].mxu1 }
 0x3b8   : > { %v6884_v47 = vpop.f32.mrb[179].mxu0  ;;  %v6775_v42 = vpop.f32.mrb[149].mxu1 }
 0x3b9   : > { %v9486_v36 = vadd.f32 %v6882_v56, %v6770_v57  ;;  %v6885_v23 = vadd.f32 %v6884_v47, %v6883_v50  ;;  %v6776_v55 = vadd.f32 %v6775_v42, %v6774_v34  ;;  %v6777_v18 = vpop.f32.mrb[150].mxu1 }
 0x3ba   : > { %5481 = vmatmul.mubr.bf16.gmra.mrb[28].mxu0 %v6110_v25  ;;  %v6778_v3 = vpop.f32.mrb[151].mxu1 }
 0x3bb   : > { %v9488_v5 = vadd.f32 %v6885_v23, %v6773_v28  ;;  %v6779_v4 = vadd.f32 %v6778_v3, %v6777_v18 }
 0x3bc   : > { %7265 = vmatmul.mubr.bf16.vlgmr.msra.gmra.mrb[0].mxu1 %v9116_v37 }
 0x3bd   : > { %v6886_v0 = vpop.f32.mrb[180].mxu0  ;;  %7268 = vmatprep.mubr.bf16.mxu1 %v9173_v29 }
 0x3be   : > { %v6887_v46 = vpop.f32.mrb[181].mxu0 }
 0x3bf   : > { %v6888_v49 = vadd.f32 %v6887_v46, %v6886_v0  ;;  %v6889_v39 = vpop.f32.mrb[182].mxu0  ;;  %v6780_v20 = vpop.f32.mrb[152].mxu1 }
 0x3c0   : > { %v6890_v15 = vpop.f32.mrb[183].mxu0  ;;  %v6781_v10 = vpop.f32.mrb[153].mxu1 }
 0x3c1   : > { %v9492_v43 = vadd.f32 %v6888_v49, %v6776_v55  ;;  %v6891_v52 = vadd.f32 %v6890_v15, %v6889_v39  ;;  %v6782_v58 = vadd.f32 %v6781_v10, %v6780_v20  ;;  %v6783_v25 = vpop.f32.mrb[154].mxu1 }
 0x3c2   : > { %v6784_v14 = vpop.f32.mrb[155].mxu1 }
 0x3c3   : > { %v9494_v45 = vadd.f32 %v6891_v52, %v6779_v4  ;;  %v6785_v38 = vadd.f32 %v6784_v14, %v6783_v25 }
 0x3c4   : > { %7269 = vmatmul.mubr.bf16.gmra.mrb[4].mxu1 %v9209_v24 }
 0x3c5   : > { %v6892_v37 = vpop.f32.mrb[184].mxu0  ;;  %7272 = vmatprep.mubr.bf16.mxu1 %v9232_v27 }
 0x3c6   : > { %v6893_v29 = vpop.f32.mrb[185].mxu0 }
 0x3c7   : > { %v6894_v12 = vadd.f32 %v6893_v29, %v6892_v37  ;;  %v6895_v63 = vpop.f32.mrb[186].mxu0  ;;  %v6786_v33 = vpop.f32.mrb[156].mxu1 }
 0x3c8   : > { %v6896_v21 = vpop.f32.mrb[187].mxu0  ;;  %v6787_v57 = vpop.f32.mrb[157].mxu1 }
 0x3c9   : > { %v9498_v61 = vadd.f32 %v6894_v12, %v6782_v58  ;;  %v6897_v62 = vadd.f32 %v6896_v21, %v6895_v63  ;;  %v6788_v59 = vadd.f32 %v6787_v57, %v6786_v33  ;;  %v6789_v30 = vpop.f32.mrb[158].mxu1 }
 0x3ca   : > { %v6790_v28 = vpop.f32.mrb[159].mxu1 }
 0x3cb   : > { %v9500_v1 = vadd.f32 %v6897_v62, %v6785_v38  ;;  %v6791_v9 = vadd.f32 %v6790_v28, %v6789_v30 }
 0x3cc   : > { %7273 = vmatmul.mubr.bf16.gmra.mrb[8].mxu1 %v9251_v54 }
 0x3cd   : > { %v6898_v24 = vpop.f32.mrb[188].mxu0  ;;  %7276 = vmatprep.mubr.bf16.mxu1 %v9269_v51 }
 0x3ce   : > { %v6899_v27 = vpop.f32.mrb[189].mxu0 }
 0x3cf   : > { %v6900_v40 = vadd.f32 %v6899_v27, %v6898_v24  ;;  %v6901_v7 = vpop.f32.mrb[190].mxu0  ;;  %v6792_v11 = vpop.f32.mrb[160].mxu1 }
 0x3d0   : > { %v6902_v56 = vpop.f32.mrb[191].mxu0  ;;  %v6793_v50 = vpop.f32.mrb[161].mxu1 }
 0x3d1   : > { %v9504_v34 = vadd.f32 %v6900_v40, %v6788_v59  ;;  %v6903_v47 = vadd.f32 %v6902_v56, %v6901_v7  ;;  %v6794_v42 = vadd.f32 %v6793_v50, %v6792_v11  ;;  %v6795_v23 = vpop.f32.mrb[162].mxu1 }
 0x3d2   : > { %v6796_v55 = vpop.f32.mrb[163].mxu1 }
 0x3d3   : > { %v9506_v18 = vadd.f32 %v6903_v47, %v6791_v9  ;;  %v6797_v3 = vadd.f32 %v6796_v55, %v6795_v23 }
 0x3d4   : > { %7277 = vmatmul.mubr.bf16.gmra.mrb[12].mxu1 %v9290_v32 }
 0x3d5   : > { %v6904_v54 = vpop.f32.mrb[192].mxu0  ;;  %7280 = vmatprep.mubr.bf16.mxu1 %v9311_v19 }
 0x3d6   : > { %v6905_v51 = vpop.f32.mrb[193].mxu0 }
 0x3d7   : > { %v6906_v4 = vadd.f32 %v6905_v51, %v6904_v54  ;;  %v6907_v0 = vpop.f32.mrb[194].mxu0  ;;  %v6798_v46 = vpop.f32.mrb[164].mxu1 }
 0x3d8   : > { %v6908_v49 = vpop.f32.mrb[195].mxu0  ;;  %v6799_v39 = vpop.f32.mrb[165].mxu1 }
 0x3d9   : > { %v9510_v20 = vadd.f32 %v6906_v4, %v6794_v42  ;;  %v6909_v15 = vadd.f32 %v6908_v49, %v6907_v0  ;;  %v6800_v10 = vadd.f32 %v6799_v39, %v6798_v46  ;;  %v6801_v52 = vpop.f32.mrb[166].mxu1 }
 0x3da   : > { %v6802_v58 = vpop.f32.mrb[167].mxu1 }
 0x3db   : > { %v9512_v25 = vadd.f32 %v6909_v15, %v6797_v3  ;;  %v6803_v14 = vadd.f32 %v6802_v58, %v6801_v52 }
 0x3dc   : > { %7281 = vmatmul.mubr.bf16.gmra.mrb[16].mxu1 %v9334_v35 }
 0x3dd   : > { %v6910_v32 = vpop.f32.mrb[196].mxu0  ;;  %7284 = vmatprep.mubr.bf16.mxu1 %v9350_v41 }
 0x3de   : > { %v6911_v19 = vpop.f32.mrb[197].mxu0 }
 0x3df   : > { %v6912_v38 = vadd.f32 %v6911_v19, %v6910_v32  ;;  %v6913_v37 = vpop.f32.mrb[198].mxu0  ;;  %v6804_v29 = vpop.f32.mrb[168].mxu1 }
 0x3e0   : > { %v6914_v12 = vpop.f32.mrb[199].mxu0  ;;  %v6805_v63 = vpop.f32.mrb[169].mxu1 }
 0x3e1   : > { %v9516_v33 = vadd.f32 %v6912_v38, %v6800_v10  ;;  %v6915_v21 = vadd.f32 %v6914_v12, %v6913_v37  ;;  %v6806_v57 = vadd.f32 %v6805_v63, %v6804_v29  ;;  %v6807_v62 = vpop.f32.mrb[170].mxu1 }
 0x3e2   : > { %v6808_v59 = vpop.f32.mrb[171].mxu1 }
 0x3e3   : > { %v9518_v30 = vadd.f32 %v6915_v21, %v6803_v14  ;;  %v6809_v28 = vadd.f32 %v6808_v59, %v6807_v62 }
 0x3e4   : > { %7285 = vmatmul.mubr.bf16.gmra.mrb[20].mxu1 %v9362_v60 }
 0x3e5   : > { %v6916_v35 = vpop.f32.mrb[200].mxu0  ;;  %7288 = vmatprep.mubr.bf16.mxu1 %v9375_v44 }
 0x3e6   : > { %v6917_v41 = vpop.f32.mrb[201].mxu0 }
 0x3e7   : > { %v6918_v9 = vadd.f32 %v6917_v41, %v6916_v35  ;;  %v6919_v24 = vpop.f32.mrb[202].mxu0  ;;  %v6810_v27 = vpop.f32.mrb[172].mxu1 }
 0x3e8   : > { %v6920_v40 = vpop.f32.mrb[203].mxu0  ;;  %v6811_v7 = vpop.f32.mrb[173].mxu1 }
 0x3e9   : > { %v9522_v11 = vadd.f32 %v6918_v9, %v6806_v57  ;;  %v6921_v56 = vadd.f32 %v6920_v40, %v6919_v24  ;;  %v6812_v50 = vadd.f32 %v6811_v7, %v6810_v27  ;;  %v6813_v47 = vpop.f32.mrb[174].mxu1 }
 0x3ea   : > { %v6814_v42 = vpop.f32.mrb[175].mxu1 }
 0x3eb   : > { %v9524_v23 = vadd.f32 %v6921_v56, %v6809_v28  ;;  %v6815_v55 = vadd.f32 %v6814_v42, %v6813_v47 }
 0x3ec   : > { %7289 = vmatmul.mubr.bf16.gmra.mrb[24].mxu1 %v9385_v22 }
 0x3ed   : > { %v6922_v60 = vpop.f32.mrb[204].mxu0  ;;  %7292 = vmatprep.mubr.bf16.mxu1 %v9480_v26 }
 0x3ee   : > { %v6923_v44 = vpop.f32.mrb[205].mxu0 }
 0x3ef   : > { %v6924_v3 = vadd.f32 %v6923_v44, %v6922_v60  ;;  %v6925_v54 = vpop.f32.mrb[206].mxu0  ;;  %v6816_v51 = vpop.f32.mrb[176].mxu1 }
 0x3f0   : > { %v6926_v4 = vpop.f32.mrb[207].mxu0  ;;  %v6817_v0 = vpop.f32.mrb[177].mxu1 }
 0x3f1   : > { %v9528_v46 = vadd.f32 %v6924_v3, %v6812_v50  ;;  %v6927_v49 = vadd.f32 %v6926_v4, %v6925_v54  ;;  %v6818_v39 = vadd.f32 %v6817_v0, %v6816_v51  ;;  %v6819_v15 = vpop.f32.mrb[178].mxu1 }
 0x3f2   : > { %v6820_v10 = vpop.f32.mrb[179].mxu1 }
 0x3f3   : > { %v9530_v52 = vadd.f32 %v6927_v49, %v6815_v55  ;;  %v6821_v58 = vadd.f32 %v6820_v10, %v6819_v15 }
 0x3f4   : > { %7293 = vmatmul.mubr.bf16.gmra.mrb[28].mxu1 %v9435_v2 }
 0x3f5   : > { %v6928_v22 = vpop.f32.mrb[208].mxu0 }
 0x3f6   : > { %v6929_v14 = vpop.f32.mrb[209].mxu0 }
 0x3f7   : > { %v6930_v26 = vadd.f32 %v6929_v14, %v6928_v22  ;;  %v6931_v32 = vpop.f32.mrb[210].mxu0  ;;  %v6822_v19 = vpop.f32.mrb[180].mxu1 }
 0x3f8   : > { %v6932_v38 = vpop.f32.mrb[211].mxu0  ;;  %v6823_v37 = vpop.f32.mrb[181].mxu1 }
 0x3f9   : > { %v9533_v29 = vadd.f32 %v6930_v26, %v6818_v39  ;;  %v6933_v12 = vadd.f32 %v6932_v38, %v6931_v32  ;;  %v6824_v63 = vadd.f32 %v6823_v37, %v6822_v19  ;;  %v6825_v21 = vpop.f32.mrb[182].mxu1 }
 0x3fa   : > { %v6826_v57 = vpop.f32.mrb[183].mxu1 }
 0x3fb   : > { %v9535_v62 = vadd.f32 %v6933_v12, %v6821_v58  ;;  %v6827_v59 = vadd.f32 %v6826_v57, %v6825_v21 }
 0x3fd   : > { %v6934_v28 = vpop.f32.mrb[212].mxu0 }
 0x3fe   : > { %v6935_v35 = vpop.f32.mrb[213].mxu0 }
 0x3ff   : > { %v6936_v41 = vadd.f32 %v6935_v35, %v6934_v28  ;;  %v6937_v2 = vpop.f32.mrb[214].mxu0  ;;  %v6828_v9 = vpop.f32.mrb[184].mxu1 }
 0x400   : > { %v6938_v24 = vpop.f32.mrb[215].mxu0  ;;  %v6829_v27 = vpop.f32.mrb[185].mxu1 }
 0x401   : > { %v9537_v40 = vadd.f32 %v6936_v41, %v6824_v63  ;;  %v6939_v7 = vadd.f32 %v6938_v24, %v6937_v2  ;;  %v6830_v56 = vadd.f32 %v6829_v27, %v6828_v9  ;;  %v6831_v50 = vpop.f32.mrb[186].mxu1 }
 0x402   : > { %v6832_v47 = vpop.f32.mrb[187].mxu1 }
 0x403   : > { %v9539_v42 = vadd.f32 %v6939_v7, %v6827_v59  ;;  %v6833_v55 = vadd.f32 %v6832_v47, %v6831_v50 }
 0x405   : > { %v6940_v60 = vpop.f32.mrb[216].mxu0 }
 0x406   : > { %v6941_v44 = vpop.f32.mrb[217].mxu0 }
 0x407   : > { %v6942_v3 = vadd.f32 %v6941_v44, %v6940_v60  ;;  %v6943_v54 = vpop.f32.mrb[218].mxu0  ;;  %v6834_v51 = vpop.f32.mrb[188].mxu1 }
 0x408   : > { %v6944_v4 = vpop.f32.mrb[219].mxu0  ;;  %v6835_v0 = vpop.f32.mrb[189].mxu1 }
 0x409   : > { %v9541_v49 = vadd.f32 %v6942_v3, %v6830_v56  ;;  %v6945_v39 = vadd.f32 %v6944_v4, %v6943_v54  ;;  %v6836_v15 = vadd.f32 %v6835_v0, %v6834_v51  ;;  %v6837_v10 = vpop.f32.mrb[190].mxu1 }
 0x40a   : > { %v6838_v58 = vpop.f32.mrb[191].mxu1 }
 0x40b   : > { %v9543_v22 = vadd.f32 %v6945_v39, %v6833_v55  ;;  %v6839_v14 = vadd.f32 %v6838_v58, %v6837_v10 }
 0x40d   : > { %v6946_v26 = vpop.f32.mrb[220].mxu0 }
 0x40e   : > { %v6947_v32 = vpop.f32.mrb[221].mxu0 }
 0x40f   : > { %v6948_v19 = vadd.f32 %v6947_v32, %v6946_v26  ;;  %v6949_v38 = vpop.f32.mrb[222].mxu0  ;;  %v6968_v37 = vpop.f32.mrb[192].mxu1 }
 0x410   : > { %v6950_v12 = vpop.f32.mrb[223].mxu0  ;;  %v6969_v63 = vpop.f32.mrb[193].mxu1 }
 0x411   : > { %v9545_v21 = vadd.f32 %v6948_v19, %v6836_v15  ;;  %v6951_v57 = vadd.f32 %v6950_v12, %v6949_v38  ;;  %v6970_v59 = vadd.f32 %v6969_v63, %v6968_v37  ;;  %v6971_v28 = vpop.f32.mrb[194].mxu1 }
 0x412   : > { %v6972_v35 = vpop.f32.mrb[195].mxu1 }
 0x413   : > { %v9547_v41 = vadd.f32 %v6951_v57, %v6839_v14  ;;  %v5202_v2 = vadd.f32 %v6970_v59, %v9426_v48  ;;  %v6973_v9 = vadd.f32 %v6972_v35, %v6971_v28 }
 0x415   : > { %v7080_v24 = vpop.f32.mrb[224].mxu0  ;;  %v5205_v27 = vadd.f32 %v6973_v9, %v9430_v8 }
 0x416   : > { %v7081_v7 = vpop.f32.mrb[225].mxu0 }
 0x417   : > { %v7082_v56 = vadd.f32 %v7081_v7, %v7080_v24  ;;  %v7083_v50 = vpop.f32.mrb[226].mxu0  ;;  %v6974_v47 = vpop.f32.mrb[196].mxu1 }
 0x418   : > { %v7084_v55 = vpop.f32.mrb[227].mxu0  ;;  %v6975_v60 = vpop.f32.mrb[197].mxu1 }
 0x419   : > { %v7085_v44 = vadd.f32 %v7084_v55, %v7083_v50  ;;  %v6976_v3 = vadd.f32 %v6975_v60, %v6974_v47  ;;  %v6977_v54 = vpop.f32.mrb[198].mxu1  ;;  %v9551_v51 = vadd.f32 %v7082_v56, %v5202_v2 }
 0x41a   : > { %v6978_v4 = vpop.f32.mrb[199].mxu1 }
 0x41b   : > { %v5210_v0 = vadd.f32 %v6976_v3, %v9448_v13  ;;  %v6979_v39 = vadd.f32 %v6978_v4, %v6977_v54  ;;  %v9554_v48 = vadd.f32 %v7085_v44, %v5205_v27 }
 0x41d   : > { %v7086_v15 = vpop.f32.mrb[228].mxu0  ;;  %v5213_v8 = vadd.f32 %v6979_v39, %v9452_v53 }
 0x41e   : > { %v7087_v10 = vpop.f32.mrb[229].mxu0 }
 0x41f   : > { %v7088_v58 = vadd.f32 %v7087_v10, %v7086_v15  ;;  %v7089_v14 = vpop.f32.mrb[230].mxu0  ;;  %v6980_v26 = vpop.f32.mrb[200].mxu1 }
 0x420   : > { %v7090_v32 = vpop.f32.mrb[231].mxu0  ;;  %v6981_v19 = vpop.f32.mrb[201].mxu1 }
 0x421   : > { %v7091_v38 = vadd.f32 %v7090_v32, %v7089_v14  ;;  %v6982_v37 = vadd.f32 %v6981_v19, %v6980_v26  ;;  %v6983_v12 = vpop.f32.mrb[202].mxu1  ;;  %v9557_v63 = vadd.f32 %v7088_v58, %v5210_v0 }
 0x422   : > { %v6984_v57 = vpop.f32.mrb[203].mxu1 }
 0x423   : > { %v5218_v13 = vadd.f32 %v6982_v37, %v9457_v17  ;;  %v6985_v59 = vadd.f32 %v6984_v57, %v6983_v12  ;;  %v9560_v28 = vadd.f32 %v7091_v38, %v5213_v8 }
 0x425   : > { %v7092_v35 = vpop.f32.mrb[232].mxu0  ;;  %v5221_v53 = vadd.f32 %v6985_v59, %v9461_v6 }
 0x426   : > { %v7093_v2 = vpop.f32.mrb[233].mxu0 }
 0x427   : > { %v7094_v9 = vadd.f32 %v7093_v2, %v7092_v35  ;;  %v7095_v24 = vpop.f32.mrb[234].mxu0  ;;  %v6986_v27 = vpop.f32.mrb[204].mxu1 }
 0x428   : > { %v7096_v7 = vpop.f32.mrb[235].mxu0  ;;  %v6987_v56 = vpop.f32.mrb[205].mxu1 }
 0x429   : > { %v7097_v50 = vadd.f32 %v7096_v7, %v7095_v24  ;;  %v6988_v47 = vadd.f32 %v6987_v56, %v6986_v27  ;;  %v6989_v55 = vpop.f32.mrb[206].mxu1  ;;  %v9563_v60 = vadd.f32 %v7094_v9, %v5218_v13 }
 0x42a   : > { %v6990_v44 = vpop.f32.mrb[207].mxu1 }
 0x42b   : > { %v5226_v17 = vadd.f32 %v6988_v47, %v9474_v16  ;;  %v6991_v3 = vadd.f32 %v6990_v44, %v6989_v55  ;;  %v9566_v54 = vadd.f32 %v7097_v50, %v5221_v53 }
 0x42d   : > { %v7098_v4 = vpop.f32.mrb[236].mxu0  ;;  %v5229_v6 = vadd.f32 %v6991_v3, %v9476_v31 }
 0x42e   : > { %v7099_v0 = vpop.f32.mrb[237].mxu0 }
 0x42f   : > { %v7100_v39 = vadd.f32 %v7099_v0, %v7098_v4  ;;  %v7101_v15 = vpop.f32.mrb[238].mxu0  ;;  %v6992_v8 = vpop.f32.mrb[208].mxu1 }
 0x430   : > { %v7102_v10 = vpop.f32.mrb[239].mxu0  ;;  %v6993_v58 = vpop.f32.mrb[209].mxu1 }
 0x431   : > { %v7103_v14 = vadd.f32 %v7102_v10, %v7101_v15  ;;  %v6994_v26 = vadd.f32 %v6993_v58, %v6992_v8  ;;  %v6995_v32 = vpop.f32.mrb[210].mxu1  ;;  %v9569_v19 = vadd.f32 %v7100_v39, %v5226_v17 }
 0x432   : > { %v6996_v38 = vpop.f32.mrb[211].mxu1 }
 0x433   : > { %v5234_v16 = vadd.f32 %v6994_v26, %v9486_v36  ;;  %v6997_v37 = vadd.f32 %v6996_v38, %v6995_v32  ;;  %v9572_v12 = vadd.f32 %v7103_v14, %v5229_v6 }
 0x435   : > { %v7104_v57 = vpop.f32.mrb[240].mxu0  ;;  %v5237_v31 = vadd.f32 %v6997_v37, %v9488_v5 }
 0x436   : > { %v7105_v13 = vpop.f32.mrb[241].mxu0 }
 0x437   : > { %v7106_v59 = vadd.f32 %v7105_v13, %v7104_v57  ;;  %v7107_v35 = vpop.f32.mrb[242].mxu0  ;;  %v6998_v53 = vpop.f32.mrb[212].mxu1 }
 0x438   : > { %v7108_v2 = vpop.f32.mrb[243].mxu0  ;;  %v6999_v9 = vpop.f32.mrb[213].mxu1 }
 0x439   : > { %v7109_v24 = vadd.f32 %v7108_v2, %v7107_v35  ;;  %v7000_v27 = vadd.f32 %v6999_v9, %v6998_v53  ;;  %v7001_v7 = vpop.f32.mrb[214].mxu1  ;;  %v9575_v56 = vadd.f32 %v7106_v59, %v5234_v16 }
 0x43a   : > { %v7002_v50 = vpop.f32.mrb[215].mxu1 }
 0x43b   : > { %v5242_v36 = vadd.f32 %v7000_v27, %v9492_v43  ;;  %v7003_v47 = vadd.f32 %v7002_v50, %v7001_v7  ;;  %v9578_v55 = vadd.f32 %v7109_v24, %v5237_v31 }
 0x43d   : > { %v7110_v44 = vpop.f32.mrb[244].mxu0  ;;  %v5245_v5 = vadd.f32 %v7003_v47, %v9494_v45 }
 0x43e   : > { %v7111_v17 = vpop.f32.mrb[245].mxu0 }
 0x43f   : > { %v7112_v3 = vadd.f32 %v7111_v17, %v7110_v44  ;;  %v7113_v4 = vpop.f32.mrb[246].mxu0  ;;  %v7004_v6 = vpop.f32.mrb[216].mxu1 }
 0x440   : > { %v7114_v0 = vpop.f32.mrb[247].mxu0  ;;  %v7005_v39 = vpop.f32.mrb[217].mxu1 }
 0x441   : > { %v7115_v15 = vadd.f32 %v7114_v0, %v7113_v4  ;;  %v7006_v8 = vadd.f32 %v7005_v39, %v7004_v6  ;;  %v7007_v10 = vpop.f32.mrb[218].mxu1  ;;  %v9581_v58 = vadd.f32 %v7112_v3, %v5242_v36 }
 0x442   : > { %v7008_v14 = vpop.f32.mrb[219].mxu1 }
 0x443   : > { %v5250_v43 = vadd.f32 %v7006_v8, %v9498_v61  ;;  %v7009_v26 = vadd.f32 %v7008_v14, %v7007_v10  ;;  %v9584_v32 = vadd.f32 %v7115_v15, %v5245_v5 }
 0x445   : > { %v7116_v38 = vpop.f32.mrb[248].mxu0  ;;  %v5253_v45 = vadd.f32 %v7009_v26, %v9500_v1 }
 0x446   : > { %v7117_v16 = vpop.f32.mrb[249].mxu0 }
 0x447   : > { %v7118_v37 = vadd.f32 %v7117_v16, %v7116_v38  ;;  %v7119_v57 = vpop.f32.mrb[250].mxu0  ;;  %v7010_v31 = vpop.f32.mrb[220].mxu1 }
 0x448   : > { %v7120_v13 = vpop.f32.mrb[251].mxu0  ;;  %v7011_v59 = vpop.f32.mrb[221].mxu1 }
 0x449   : > { %v7121_v35 = vadd.f32 %v7120_v13, %v7119_v57  ;;  %v7012_v53 = vadd.f32 %v7011_v59, %v7010_v31  ;;  %v7013_v2 = vpop.f32.mrb[222].mxu1  ;;  %v9587_v9 = vadd.f32 %v7118_v37, %v5250_v43 }
 0x44a   : > { %v7014_v24 = vpop.f32.mrb[223].mxu1 }
 0x44b   : > { %v5258_v61 = vadd.f32 %v7012_v53, %v9504_v34  ;;  %v7015_v27 = vadd.f32 %v7014_v24, %v7013_v2  ;;  %v9590_v7 = vadd.f32 %v7121_v35, %v5253_v45 }
 0x44d   : > { %v7122_v50 = vpop.f32.mrb[252].mxu0  ;;  %v5261_v1 = vadd.f32 %v7015_v27, %v9506_v18 }
 0x44e   : > { %v7123_v36 = vpop.f32.mrb[253].mxu0 }
 0x44f   : > { %v7124_v47 = vadd.f32 %v7123_v36, %v7122_v50  ;;  %v7125_v44 = vpop.f32.mrb[254].mxu0  ;;  %v7016_v5 = vpop.f32.mrb[224].mxu1 }
 0x450   : > { %v7126_v17 = vpop.f32.mrb[255].mxu0  ;;  %v7017_v3 = vpop.f32.mrb[225].mxu1 }
 0x451   : > { %v7127_v4 = vadd.f32 %v7126_v17, %v7125_v44  ;;  %v7018_v6 = vadd.f32 %v7017_v3, %v7016_v5  ;;  %v7019_v0 = vpop.f32.mrb[226].mxu1  ;;  %v9593_v39 = vadd.f32 %v7124_v47, %v5258_v61 }
 0x452   : > { %v7020_v15 = vpop.f32.mrb[227].mxu1 }
 0x453   : > { %v5266_v34 = vadd.f32 %v7018_v6, %v9510_v20  ;;  %v7021_v8 = vadd.f32 %v7020_v15, %v7019_v0  ;;  %v9596_v10 = vadd.f32 %v7127_v4, %v5261_v1 }
 0x455   : > { %v7128_v14 = vpop.f32.mrb[0].mxu0  ;;  %v5269_v18 = vadd.f32 %v7021_v8, %v9512_v25 }
 0x456   : > { %v7129_v43 = vpop.f32.mrb[1].mxu0 }
 0x457   : > { %v7130_v26 = vadd.f32 %v7129_v43, %v7128_v14  ;;  %v7131_v38 = vpop.f32.mrb[2].mxu0  ;;  %v7022_v45 = vpop.f32.mrb[228].mxu1 }
 0x458   : > { %v7132_v16 = vpop.f32.mrb[3].mxu0  ;;  %v7023_v37 = vpop.f32.mrb[229].mxu1 }
 0x459   : > { %v7133_v57 = vadd.f32 %v7132_v16, %v7131_v38  ;;  %v7024_v31 = vadd.f32 %v7023_v37, %v7022_v45  ;;  %v7025_v13 = vpop.f32.mrb[230].mxu1  ;;  %v9599_v59 = vadd.f32 %v7130_v26, %v5266_v34 }
 0x45a   : > { %v7026_v35 = vpop.f32.mrb[231].mxu1 }
 0x45b   : > { %v5274_v20 = vadd.f32 %v7024_v31, %v9516_v33  ;;  %v7027_v53 = vadd.f32 %v7026_v35, %v7025_v13  ;;  %v9602_v2 = vadd.f32 %v7133_v57, %v5269_v18 }
 0x45d   : > { %v7134_v24 = vpop.f32.mrb[4].mxu0  ;;  %v5277_v25 = vadd.f32 %v7027_v53, %v9518_v30 }
 0x45e   : > { %v7135_v61 = vpop.f32.mrb[5].mxu0 }
 0x45f   : > { %v7136_v27 = vadd.f32 %v7135_v61, %v7134_v24  ;;  %v7137_v50 = vpop.f32.mrb[6].mxu0  ;;  %v7028_v1 = vpop.f32.mrb[232].mxu1 }
 0x460   : > { %v7138_v36 = vpop.f32.mrb[7].mxu0  ;;  %v7029_v47 = vpop.f32.mrb[233].mxu1 }
 0x461   : > { %v7139_v44 = vadd.f32 %v7138_v36, %v7137_v50  ;;  %v7030_v5 = vadd.f32 %v7029_v47, %v7028_v1  ;;  %v7031_v17 = vpop.f32.mrb[234].mxu1  ;;  %v9605_v3 = vadd.f32 %v7136_v27, %v5274_v20 }
 0x462   : > { %v7032_v4 = vpop.f32.mrb[235].mxu1 }
 0x463   : > { %v5282_v33 = vadd.f32 %v7030_v5, %v9522_v11  ;;  %v7033_v6 = vadd.f32 %v7032_v4, %v7031_v17  ;;  %v9608_v0 = vadd.f32 %v7139_v44, %v5277_v25 }
 0x465   : > { %v7140_v15 = vpop.f32.mrb[8].mxu0  ;;  %v5285_v30 = vadd.f32 %v7033_v6, %v9524_v23 }
 0x466   : > { %v7141_v34 = vpop.f32.mrb[9].mxu0 }
 0x467   : > { %v7142_v8 = vadd.f32 %v7141_v34, %v7140_v15  ;;  %v7143_v14 = vpop.f32.mrb[10].mxu0  ;;  %v7034_v18 = vpop.f32.mrb[236].mxu1 }
 0x468   : > { %v7144_v43 = vpop.f32.mrb[11].mxu0  ;;  %v7035_v26 = vpop.f32.mrb[237].mxu1 }
 0x469   : > { %v7145_v38 = vadd.f32 %v7144_v43, %v7143_v14  ;;  %v7036_v45 = vadd.f32 %v7035_v26, %v7034_v18  ;;  %v7037_v16 = vpop.f32.mrb[238].mxu1  ;;  %v9611_v37 = vadd.f32 %v7142_v8, %v5282_v33 }
 0x46a   : > { %v7038_v57 = vpop.f32.mrb[239].mxu1 }
 0x46b   : > { %v5290_v11 = vadd.f32 %v7036_v45, %v9528_v46  ;;  %v7039_v31 = vadd.f32 %v7038_v57, %v7037_v16  ;;  %v9614_v13 = vadd.f32 %v7145_v38, %v5285_v30 }
 0x46d   : > { %v7146_v35 = vpop.f32.mrb[12].mxu0  ;;  %v5293_v23 = vadd.f32 %v7039_v31, %v9530_v52 }
 0x46e   : > { %v7147_v20 = vpop.f32.mrb[13].mxu0 }
 0x46f   : > { %v7148_v53 = vadd.f32 %v7147_v20, %v7146_v35  ;;  %v7149_v24 = vpop.f32.mrb[14].mxu0  ;;  %v7040_v25 = vpop.f32.mrb[240].mxu1 }
 0x470   : > { %v7150_v61 = vpop.f32.mrb[15].mxu0  ;;  %v7041_v27 = vpop.f32.mrb[241].mxu1 }
 0x471   : > { %v7151_v50 = vadd.f32 %v7150_v61, %v7149_v24  ;;  %v7042_v1 = vadd.f32 %v7041_v27, %v7040_v25  ;;  %v7043_v36 = vpop.f32.mrb[242].mxu1  ;;  %v9617_v47 = vadd.f32 %v7148_v53, %v5290_v11 }
 0x472   : > { %v7044_v44 = vpop.f32.mrb[243].mxu1 }
 0x473   : > { %v5298_v46 = vadd.f32 %v7042_v1, %v9533_v29  ;;  %v7045_v5 = vadd.f32 %v7044_v44, %v7043_v36  ;;  %v9620_v17 = vadd.f32 %v7151_v50, %v5293_v23 }
 0x475   : > { %v7152_v4 = vpop.f32.mrb[16].mxu0  ;;  %v5301_v52 = vadd.f32 %v7045_v5, %v9535_v62 }
 0x476   : > { %v7153_v33 = vpop.f32.mrb[17].mxu0 }
 0x477   : > { %v7154_v6 = vadd.f32 %v7153_v33, %v7152_v4  ;;  %v7155_v15 = vpop.f32.mrb[18].mxu0  ;;  %v7046_v30 = vpop.f32.mrb[244].mxu1 }
 0x478   : > { %v7156_v34 = vpop.f32.mrb[19].mxu0  ;;  %v7047_v8 = vpop.f32.mrb[245].mxu1 }
 0x479   : > { %v7157_v14 = vadd.f32 %v7156_v34, %v7155_v15  ;;  %v7048_v18 = vadd.f32 %v7047_v8, %v7046_v30  ;;  %v7049_v43 = vpop.f32.mrb[246].mxu1  ;;  %v9623_v26 = vadd.f32 %v7154_v6, %v5298_v46 }
 0x47a   : > { %v7050_v38 = vpop.f32.mrb[247].mxu1 }
 0x47b   : > { %v5306_v29 = vadd.f32 %v7048_v18, %v9537_v40  ;;  %v7051_v45 = vadd.f32 %v7050_v38, %v7049_v43  ;;  %v9626_v16 = vadd.f32 %v7157_v14, %v5301_v52 }
 0x47d   : > { %v7158_v57 = vpop.f32.mrb[20].mxu0  ;;  %v5309_v62 = vadd.f32 %v7051_v45, %v9539_v42 }
 0x47e   : > { %v7159_v11 = vpop.f32.mrb[21].mxu0 }
 0x47f   : > { %v7160_v31 = vadd.f32 %v7159_v11, %v7158_v57  ;;  %v7161_v35 = vpop.f32.mrb[22].mxu0  ;;  %v7052_v23 = vpop.f32.mrb[248].mxu1  ;;  %v5652_v11 = vld [vmem:[%s8005_s21 + $0x10] sm:$0xff] }
 0x480   : > { %v7162_v20 = vpop.f32.mrb[23].mxu0  ;;  %v7053_v53 = vpop.f32.mrb[249].mxu1 }
 0x481   : > { %v7163_v24 = vadd.f32 %v7162_v20, %v7161_v35  ;;  %v7054_v25 = vadd.f32 %v7053_v53, %v7052_v23  ;;  %v7055_v61 = vpop.f32.mrb[250].mxu1  ;;  %v9629_v27 = vadd.f32 %v7160_v31, %v5306_v29  ;;  %v5650_v20 = vld [vmem:[%s8005_s21] sm:$0xff] }
 0x482   : > { %v7056_v50 = vpop.f32.mrb[251].mxu1 }
 0x483   : > { %v5314_v40 = vadd.f32 %v7054_v25, %v9541_v49  ;;  %v7057_v1 = vadd.f32 %v7056_v50, %v7055_v61  ;;  %v9632_v36 = vadd.f32 %v7163_v24, %v5309_v62  ;;  %v5653_v25 = vld [vmem:[%s8005_s21 + $0x18] sm:$0xff] }
 0x485   : > { %v7164_v44 = vpop.f32.mrb[24].mxu0  ;;  %v5317_v42 = vadd.f32 %v7057_v1, %v9543_v22  ;;  %v5651_v1 = vld [vmem:[%s8005_s21 + $0x8] sm:$0xff] }
 0x486   : > { %v7165_v46 = vpop.f32.mrb[25].mxu0 }
 0x487   : > { %v7166_v5 = vadd.f32 %v7165_v46, %v7164_v44  ;;  %v7167_v4 = vpop.f32.mrb[26].mxu0  ;;  %v7058_v52 = vpop.f32.mrb[252].mxu1 }
 0x488   : > { %v7168_v33 = vpop.f32.mrb[27].mxu0  ;;  %v7059_v6 = vpop.f32.mrb[253].mxu1 }
 0x489   : > { %v7169_v15 = vadd.f32 %v7168_v33, %v7167_v4  ;;  %v7060_v30 = vadd.f32 %v7059_v6, %v7058_v52  ;;  %v7061_v34 = vpop.f32.mrb[254].mxu1  ;;  %v9635_v8 = vadd.f32 %v7166_v5, %v5314_v40  ;;  %v5654_v52 = vld [vmem:[%s8005_s21 + $0x20] sm:$0xff] }
 0x48a   : > { %v7062_v49 = vpop.f32.mrb[255].mxu1 }
 0x48b   : > { %v5322_v14 = vadd.f32 %v7060_v30, %v9545_v21  ;;  %v7063_v18 = vadd.f32 %v7062_v49, %v7061_v34  ;;  %v9638_v43 = vadd.f32 %v7169_v15, %v5317_v42  ;;  %v5657_v15 = vld [vmem:[%s8005_s21 + $0x38] sm:$0xff] }
 0x48d   : > { %v7170_v22 = vpop.f32.mrb[28].mxu0  ;;  %v5325_v38 = vadd.f32 %v7063_v18, %v9547_v41 }
 0x48e   : > { %v7171_v29 = vpop.f32.mrb[29].mxu0 }
 0x48f   : > { %v7172_v45 = vadd.f32 %v7171_v29, %v7170_v22  ;;  %v7173_v57 = vpop.f32.mrb[30].mxu0  ;;  %v7266_v62 = vpop.f32.mrb[0].mxu1  ;;  %v5660_v29 = vld [vmem:[%s8005_s21 + $0x50] sm:$0xff] }
 0x490   : > { %v7174_v31 = vpop.f32.mrb[31].mxu0  ;;  %v5532_v35 = vadd.f32 %v7266_v62, %v9557_v63  ;;  %v5523_v23 = vpop.f32.mrb[1].mxu1 }
 0x491   : > { %v7175_v21 = vadd.f32 %v7174_v31, %v7173_v57  ;;  %v5524_v53 = vadd.f32 %v5523_v23, %v9551_v51  ;;  %v7267_v24 = vpop.f32.mrb[2].mxu1  ;;  %v9646_v61 = vadd.f32 %v7172_v45, %v5322_v14  ;;  %v5655_v14 = vld [vmem:[%s8005_s21 + $0x28] sm:$0xff]  ;;  %v5658_v57 = vld [vmem:[%s8005_s21 + $0x40] sm:$0xff] }
 0x492   : > { %v5684_v41 = vadd.f32 %v5652_v11, %v5532_v35  ;;  %v5535_v50 = vadd.f32 %v7267_v24, %v9560_v28  ;;  %v5526_v40 = vpop.f32.mrb[3].mxu1  ;;  %v5661_v11 = vld [vmem:[%s8005_s21 + $0x58] sm:$0xff] }
 0x493   : > { %v5682_v44 = vadd.f32 %v5650_v20, %v5524_v53  ;;  %v5527_v42 = vadd.f32 %v5526_v40, %v9554_v48  ;;  %v9651_v63 = vadd.f32 %v7175_v21, %v5325_v38  ;;  %v5656_v48 = vld [vmem:[%s8005_s21 + $0x30] sm:$0xff]  ;;  %v5659_v20 = vld [vmem:[%s8005_s21 + $0x48] sm:$0xff] }
 0x494   : > { %5716 = vst [vmem:[%s9655_s10 + $0x10] sm:$0xff] %v5684_v41  ;;  %v5685_v51 = vadd.f32 %v5653_v25, %v5535_v50  ;;  %v5664_v25 = vld [vmem:[%s8005_s21 + $0x70] sm:$0xff]  ;;  %v5662_v50 = vld [vmem:[%s8005_s21 + $0x60] sm:$0xff] }
 0x495   : > { %5714 = vst [vmem:[%s9655_s10] sm:$0xff] %v5682_v44  ;;  %v5683_v28 = vadd.f32 %v5651_v1, %v5527_v42  ;;  %v5665_v1 = vld [vmem:[%s8005_s21 + $0x78] sm:$0xff] }
 0x496   : > { %5717 = vst [vmem:[%s9655_s10 + $0x18] sm:$0xff] %v5685_v51 }
 0x497   : > { %5715 = vst [vmem:[%s9655_s10 + $0x8] sm:$0xff] %v5683_v28  ;;  %v7270_v46 = vpop.f32.mrb[4].mxu1  ;;  %v5663_v28 = vld [vmem:[%s8005_s21 + $0x68] sm:$0xff] }
 0x498   : > { %v5548_v5 = vadd.f32 %v7270_v46, %v9569_v19  ;;  %v5539_v4 = vpop.f32.mrb[5].mxu1 }
 0x499   : > { %v5540_v33 = vadd.f32 %v5539_v4, %v9563_v60  ;;  %v7271_v6 = vpop.f32.mrb[6].mxu1  ;;  %v5668_v4 = vld [vmem:[%s8005_s21 + $0x90] sm:$0xff] }
 0x49a   : > { %v5688_v30 = vadd.f32 %v5656_v48, %v5548_v5  ;;  %v5551_v34 = vadd.f32 %v7271_v6, %v9572_v12  ;;  %v5542_v49 = vpop.f32.mrb[7].mxu1 }
 0x49b   : > { %v5686_v18 = vadd.f32 %v5654_v52, %v5540_v33  ;;  %v5543_v22 = vadd.f32 %v5542_v49, %v9566_v54  ;;  %v5666_v33 = vld [vmem:[%s8005_s21 + $0x80] sm:$0xff] }
 0x49c   : > { %5720 = vst [vmem:[%s9655_s10 + $0x30] sm:$0xff] %v5688_v30  ;;  %v5689_v19 = vadd.f32 %v5657_v15, %v5551_v34  ;;  %v5669_v15 = vld [vmem:[%s8005_s21 + $0x98] sm:$0xff] }
 0x49d   : > { %5718 = vst [vmem:[%s9655_s10 + $0x20] sm:$0xff] %v5686_v18  ;;  %v5687_v38 = vadd.f32 %v5655_v14, %v5543_v22  ;;  %v5667_v14 = vld [vmem:[%s8005_s21 + $0x88] sm:$0xff] }
 0x49e   : > { %5721 = vst [vmem:[%s9655_s10 + $0x38] sm:$0xff] %v5689_v19 }
 0x49f   : > { %5719 = vst [vmem:[%s9655_s10 + $0x28] sm:$0xff] %v5687_v38  ;;  %v7274_v60 = vpop.f32.mrb[8].mxu1  ;;  %v5672_v38 = vld [vmem:[%s8005_s21 + $0xb0] sm:$0xff] }
 0x4a0   : > { %v5564_v45 = vadd.f32 %v7274_v60, %v9581_v58  ;;  %v5555_v12 = vpop.f32.mrb[9].mxu1 }
 0x4a1   : > { %v5556_v62 = vadd.f32 %v5555_v12, %v9575_v56  ;;  %v7275_v54 = vpop.f32.mrb[10].mxu1  ;;  %v5673_v12 = vld [vmem:[%s8005_s21 + $0xb8] sm:$0xff] }
 0x4a2   : > { %v5692_v31 = vadd.f32 %v5660_v29, %v5564_v45  ;;  %v5567_v35 = vadd.f32 %v7275_v54, %v9584_v32  ;;  %v5558_v23 = vpop.f32.mrb[11].mxu1  ;;  %v5670_v29 = vld [vmem:[%s8005_s21 + $0xa0] sm:$0xff] }
 0x4a3   : > { %v5690_v21 = vadd.f32 %v5658_v57, %v5556_v62  ;;  %v5559_v53 = vadd.f32 %v5558_v23, %v9578_v55 }
 0x4a4   : > { %5724 = vst [vmem:[%s9655_s10 + $0x50] sm:$0xff] %v5692_v31  ;;  %v5693_v58 = vadd.f32 %v5661_v11, %v5567_v35  ;;  %v5671_v11 = vld [vmem:[%s8005_s21 + $0xa8] sm:$0xff] }
 0x4a5   : > { %5722 = vst [vmem:[%s9655_s10 + $0x40] sm:$0xff] %v5690_v21  ;;  %v5691_v24 = vadd.f32 %v5659_v20, %v5559_v53  ;;  %v5676_v20 = vld [vmem:[%s8005_s21 + $0xd0] sm:$0xff]  ;;  %v5674_v53 = vld [vmem:[%s8005_s21 + $0xc0] sm:$0xff] }
 0x4a6   : > { %5725 = vst [vmem:[%s9655_s10 + $0x58] sm:$0xff] %v5693_v58 }
 0x4a7   : > { %5723 = vst [vmem:[%s9655_s10 + $0x48] sm:$0xff] %v5691_v24  ;;  %v7278_v56 = vpop.f32.mrb[12].mxu1  ;;  %v5677_v24 = vld [vmem:[%s8005_s21 + $0xd8] sm:$0xff] }
 0x4a8   : > { %v5580_v41 = vadd.f32 %v7278_v56, %v9593_v39  ;;  %v5571_v32 = vpop.f32.mrb[13].mxu1 }
 0x4a9   : > { %v5572_v40 = vadd.f32 %v5571_v32, %v9587_v9  ;;  %v7279_v55 = vpop.f32.mrb[14].mxu1  ;;  %v5675_v32 = vld [vmem:[%s8005_s21 + $0xc8] sm:$0xff] }
 0x4aa   : > { %v5696_v44 = vadd.f32 %v5664_v25, %v5580_v41  ;;  %v5583_v42 = vadd.f32 %v7279_v55, %v9596_v10  ;;  %v5574_v51 = vpop.f32.mrb[15].mxu1 }
 0x4ab   : > { %v5694_v46 = vadd.f32 %v5662_v50, %v5572_v40  ;;  %v5575_v48 = vadd.f32 %v5574_v51, %v9590_v7 }
 0x4ac   : > { %5728 = vst [vmem:[%s9655_s10 + $0x70] sm:$0xff] %v5696_v44  ;;  %v5697_v39 = vadd.f32 %v5665_v1, %v5583_v42  ;;  %v5680_v1 = vld [vmem:[%s8005_s21 + $0xf0] sm:$0xff]  ;;  %v5678_v42 = vld [vmem:[%s8005_s21 + $0xe0] sm:$0xff] }
 0x4ad   : > { %5726 = vst [vmem:[%s9655_s10 + $0x60] sm:$0xff] %v5694_v46  ;;  %v5695_v5 = vadd.f32 %v5663_v28, %v5575_v48 }
 0x4ae   : > { %5729 = vst [vmem:[%s9655_s10 + $0x78] sm:$0xff] %v5697_v39 }
 0x4af   : > { %5727 = vst [vmem:[%s9655_s10 + $0x68] sm:$0xff] %v5695_v5  ;;  %v7282_v9 = vpop.f32.mrb[16].mxu1  ;;  %v5679_v5 = vld [vmem:[%s8005_s21 + $0xe8] sm:$0xff] }
 0x4b0   : > { %v5596_v52 = vadd.f32 %v7282_v9, %v9605_v3  ;;  %v5587_v10 = vpop.f32.mrb[17].mxu1 }
 0x4b1   : > { %v5588_v6 = vadd.f32 %v5587_v10, %v9599_v59  ;;  %v7283_v7 = vpop.f32.mrb[18].mxu1 }
 0x4b2   : > { %v5700_v30 = vadd.f32 %v5668_v4, %v5596_v52  ;;  %v5599_v34 = vadd.f32 %v7283_v7, %v9608_v0  ;;  %v5590_v49 = vpop.f32.mrb[19].mxu1 }
 0x4b3   : > { %v5698_v18 = vadd.f32 %v5666_v33, %v5588_v6  ;;  %v5591_v22 = vadd.f32 %v5590_v49, %v9602_v2 }
 0x4b4   : > { %5732 = vst [vmem:[%s9655_s10 + $0x90] sm:$0xff] %v5700_v30  ;;  %v5701_v3 = vadd.f32 %v5669_v15, %v5599_v34 }
 0x4b5   : > { %5730 = vst [vmem:[%s9655_s10 + $0x80] sm:$0xff] %v5698_v18  ;;  %v5699_v19 = vadd.f32 %v5667_v14, %v5591_v22 }
 0x4b6   : > { %5733 = vst [vmem:[%s9655_s10 + $0x98] sm:$0xff] %v5701_v3 }
 0x4b7   : > { %5731 = vst [vmem:[%s9655_s10 + $0x88] sm:$0xff] %v5699_v19  ;;  %v7286_v59 = vpop.f32.mrb[20].mxu1 }
 0x4b8   : > { %v5612_v60 = vadd.f32 %v7286_v59, %v9617_v47  ;;  %v5603_v0 = vpop.f32.mrb[21].mxu1 }
 0x4b9   : > { %v5604_v45 = vadd.f32 %v5603_v0, %v9611_v37  ;;  %v7287_v2 = vpop.f32.mrb[22].mxu1 }
 0x4ba   : > { %v5704_v57 = vadd.f32 %v5672_v38, %v5612_v60  ;;  %v5615_v62 = vadd.f32 %v7287_v2, %v9620_v17  ;;  %v5606_v54 = vpop.f32.mrb[23].mxu1 }
 0x4bb   : > { %v5702_v31 = vadd.f32 %v5670_v29, %v5604_v45  ;;  %v5607_v35 = vadd.f32 %v5606_v54, %v9614_v13 }
 0x4bc   : > { %5736 = vst [vmem:[%s9655_s10 + $0xb0] sm:$0xff] %v5704_v57  ;;  %v5705_v47 = vadd.f32 %v5673_v12, %v5615_v62 }
 0x4bd   : > { %5734 = vst [vmem:[%s9655_s10 + $0xa0] sm:$0xff] %v5702_v31  ;;  %v5703_v23 = vadd.f32 %v5671_v11, %v5607_v35 }
 0x4be   : > { %5737 = vst [vmem:[%s9655_s10 + $0xb8] sm:$0xff] %v5705_v47 }
 0x4bf   : > { %5735 = vst [vmem:[%s9655_s10 + $0xa8] sm:$0xff] %v5703_v23  ;;  %v7290_v37 = vpop.f32.mrb[24].mxu1 }
 0x4c0   : > { %v5628_v21 = vadd.f32 %v7290_v37, %v9629_v27  ;;  %v5619_v17 = vpop.f32.mrb[25].mxu1 }
 0x4c1   : > { %v5620_v58 = vadd.f32 %v5619_v17, %v9623_v26  ;;  %v7291_v13 = vpop.f32.mrb[26].mxu1 }
 0x4c2   : > { %v5708_v56 = vadd.f32 %v5676_v20, %v5628_v21  ;;  %v5631_v25 = vadd.f32 %v7291_v13, %v9632_v36  ;;  %v5622_v41 = vpop.f32.mrb[27].mxu1 }
 0x4c3   : > { %v5706_v50 = vadd.f32 %v5674_v53, %v5620_v58  ;;  %v5623_v27 = vadd.f32 %v5622_v41, %v9626_v16  ;;  %v5681_v16 = vld [vmem:[%s8005_s21 + $0xf8] sm:$0xff]  ;;  %s7704_s21 = scalar_lea.vmem %s9749_s15, 4096 }
 0x4c4   : > { %5740 = vst [vmem:[%s9655_s10 + $0xd0] sm:$0xff] %v5708_v56  ;;  %v5709_v40 = vadd.f32 %v5677_v24, %v5631_v25  ;;  %p7705_p11 = scmp.ne.s32.totalorder %s9749_s15, %s7704_s21  ;;  %p7712_p9 = scmp.lt.s32.totalorder %s7710_s9, %s7704_s21 }
 0x4c5   : > { %5738 = vst [vmem:[%s9655_s10 + $0xc0] sm:$0xff] %v5706_v50  ;;  %v5707_v55 = vadd.f32 %v5675_v32, %v5623_v27 }
 0x4c6   : > { %5741 = vst [vmem:[%s9655_s10 + $0xd8] sm:$0xff] %v5709_v40  ;;  %p7706_p1 = pnand %p7705_p11, %p9845_p0  ;;  %p7713_p12 = por %p7712_p9, %p7711_p7 }
 0x4c7   : > { %5739 = vst [vmem:[%s9655_s10 + $0xc8] sm:$0xff] %v5707_v55  ;;  %v7294_v26 = vpop.f32.mrb[28].mxu1 }
 0x4c8   : > { %v5644_v36 = vadd.f32 %v7294_v26, %v9646_v61  ;;  %v5635_v44 = vpop.f32.mrb[29].mxu1  ;;  %p7707_p3 = pneg %p7706_p1 }
 0x4c9   : > { %v5636_v51 = vadd.f32 %v5635_v44, %v9635_v8  ;;  %v7295_v28 = vpop.f32.mrb[30].mxu1 }
 0x4ca   : > { %v5712_v46 = vadd.f32 %v5680_v1, %v5644_v36  ;;  %v5647_v48 = vadd.f32 %v7295_v28, %v9651_v63  ;;  %v5638_v39 = vpop.f32.mrb[31].mxu1  ;;  %p7714_p2 = pnand %p7713_p12, %p7707_p3 }
 0x4cb   : > { %v5710_v9 = vadd.f32 %v5678_v42, %v5636_v51  ;;  %v5639_v61 = vadd.f32 %v5638_v39, %v9638_v43 }
 0x4cc   : > { %5744 = vst [vmem:[%s9655_s10 + $0xf0] sm:$0xff] %v5712_v46  ;;  %v5713_v4 = vadd.f32 %v5681_v16, %v5647_v48 }
 0x4cd   : > { %5742 = vst [vmem:[%s9655_s10 + $0xe0] sm:$0xff] %v5710_v9  ;;  %v5711_v8 = vadd.f32 %v5679_v5, %v5639_v61 }
 0x4ce   : > { %5745 = vst [vmem:[%s9655_s10 + $0xf8] sm:$0xff] %v5713_v4 }
 0x4cf   : > { %5743 = vst [vmem:[%s9655_s10 + $0xe8] sm:$0xff] %v5711_v8 }
 0x4d0   : > { %7717 = shalt.err (!%p7714_p2)
}
 0x4d1   : > { %s7718_s20 = scalar_lea.hbm %s9747_s14, 4096  ;;  %s7722_s10 = scalar_lea.hbm %s9803_s7, 8192 }
 0x4d2   : > { %p7719_p13 = scmp.ne.s32.totalorder %s9747_s14, %s7718_s20  ;;  %p7723_p4 = scmp.lt.u32.totalorder %s9747_s14, %s9803_s7 }
 0x4d3   : > { %p7724_p5 = scmp.lt.u32.totalorder %s7722_s10, %s7718_s20  ;;  %p7726_p11 = scmp.lt.u32.totalorder %s7718_s20, %s9747_s14 }
 0x4d4   : > { %p7720_p6 = pnand %p7719_p13, %p9845_p0 }
 0x4d5   : > { %p7725_p8 = por %p7724_p5, %p7723_p4 }
 0x4d6   : > { %p7721_p10 = pneg %p7720_p6 }
 0x4d7   : > { %p7727_p1 = por %p7726_p11, %p7725_p8 }
 0x4d9   : > { %p7728_p3 = pnand %p7727_p1, %p7721_p10 }
 0x4db   : > { %7731 = shalt.err (!%p7728_p3)
}
 0x4dc   : > { %s7785_s12 = smov 128   ;;  %s7786_s21 = smov 8  }
 0x4dd   : > { %7306 = dma.vmem_to_hbm [thread:$0]  (%p9845_p0), %s9749_s15, 4096, %s9747_s14, %s5747_s28, %s7785_s12, %s7785_s12, %s7786_s21  }
 0x4de PF: > { %s5775_s18 = sand.u32 1, %s7762_s24   ;;  %p9846_p7 = scmp.ne.s32.totalorder %s9818_s8, 0 }
 0x4df   : > { %p9847_p9 = scmp.ge.s32.totalorder %s7774_s27, 2  ;;  %s5776_s30 = scalar_lea.sflag [#allocation5], %s5775_s18 }
 0x4e1   : > { %p7320_p12 = pnand %p9847_p9, %p9846_p7 }
 0x4e3   : > { %7757 = dma.done.wait (!%p7320_p12), %s5776_s30, 4096  }
 0x4e4   : > { %7759 = vsyncadd (!%p7320_p12), %s5776_s30, 4294963200  ;;  %p21_p2 = scmp.ge.s32.totalorder %s7937_s13, 4   ;;  %s9848_s24 = smov %s7766_s25 }
 0x4e5   : > { %s9849_s25 = smov %s7770_s26  ;;  %s9850_s26 = smov %s7953_s17 }
 0x4e6   : > { %s9851_s27 = smov %s7937_s13  ;;  %23 = sbr.rel (!%p21_p2) target bundleno = 6 (0x6), region = 102 }
 0x4ed   :  { %5781 = vsyncpa [#allocation4], 1 }
 0x4ee   :  { %5783 = vsyncpa [#allocation4 + $0x1], 1 }
 0x4ef   :  { %5784 = vsyncpa [#allocation7], 1 }
 0x4f0   :  { %5785 = vsyncpa [#allocation5], 1 }
 0x4f1   :  { %5787 = vsyncpa [#allocation5 + $0x1], 1 }

</bundles_post_ra>
